<compile_context>
chip_gen: v7x
topology: tpu7x:2x2x1
jax: 0.10.0
libtpu: 0.0.40
codegen_flags: <defaults>
</compile_context>

<pallas_src>
import jax
import jax.numpy as jnp
from jax import lax
from jax.experimental import pallas as pl
from jax.experimental.pallas import tpu as pltpu


# --------------------------- fused Pallas kernel -----------------------------

def _decoder_fused_kernel(xc_ref, x_ref, wup_ref, bup_ref,
                          w1_ref, s1_ref, t1_ref,
                          w2_ref, s2_ref, t2_ref,
                          o_ref, cat_pad, mid_pad):
    # xc_ref : (N, Hs, Ws, 4*C1)   skip connection, 2x2-grouped, bf16
    # x_ref  : (N*Hs*Ws, Cin)      low-res input, flattened, bf16
    # wup_ref: (Cin, 4*C1)         deconv weight, cols ordered (dh, dw, co), bf16
    # bup_ref: (1, 4*C1)           deconv bias (f32)
    # w1_ref : (3, 3, 8*C1, 4*Cm)  merged grouped conv1 weight (rows: [xc ‖ up])
    # s1/t1  : (1, 4*Cm)           folded BN1 scale / shift (f32)
    # w2_ref : (3, 3, 4*Cm, 4*Cout)
    # s2/t2  : (1, 4*Cout)
    # o_ref  : (N, Hs*Ws, 4*Cout)  output, 2x2-grouped (f32)
    # cat_pad: (N, Hs+2, Ws+2, 8*C1) bf16 scratch (zero halo, concat interior)
    # mid_pad: (N, Hs+2, Ws+2, 4*Cm) bf16 scratch (zero halo, conv1 output)
    N, Hs, Ws, C4 = xc_ref.shape
    M = N * Hs * Ws
    Ccat = cat_pad.shape[-1]
    Cm4 = mid_pad.shape[-1]

    # Zero ONLY the 1-group halo border of the padded scratch (interior is
    # fully overwritten below).  Single grid step -> this runs exactly once.
    zr_c = jnp.zeros((N, 1, Ws + 2, Ccat), cat_pad.dtype)
    zc_c = jnp.zeros((N, Hs + 2, 1, Ccat), cat_pad.dtype)
    cat_pad[:, 0:1, :, :] = zr_c
    cat_pad[:, Hs + 1:Hs + 2, :, :] = zr_c
    cat_pad[:, :, 0:1, :] = zc_c
    cat_pad[:, :, Ws + 1:Ws + 2, :] = zc_c
    zr_m = jnp.zeros((N, 1, Ws + 2, Cm4), mid_pad.dtype)
    zc_m = jnp.zeros((N, Hs + 2, 1, Cm4), mid_pad.dtype)
    mid_pad[:, 0:1, :, :] = zr_m
    mid_pad[:, Hs + 1:Hs + 2, :, :] = zr_m
    mid_pad[:, :, 0:1, :] = zc_m
    mid_pad[:, :, Ws + 1:Ws + 2, :] = zc_m

    # --- ConvTranspose2d(k=2, s=2): one bf16 MXU matmul, f32 accumulation.
    # The (dh, dw, co) column order IS the 2x2-grouped layout -> no scatter.
    up = jnp.dot(x_ref[...], wup_ref[...], preferred_element_type=jnp.float32)
    up = up + bup_ref[...]                                    # (M, 4*C1), f32

    # --- stage concat([x_copy, up], channel) into ONE padded scratch.  The
    # merged conv1 weight rows are ordered [grouped xc ‖ grouped up] to match.
    cat_val = jnp.concatenate(
        [xc_ref[...], up.reshape(N, Hs, Ws, C4).astype(cat_pad.dtype)], axis=-1)
    cat_pad[:, 1:Hs + 1, 1:Ws + 1, :] = cat_val

    # --- conv1 (3x3, pad=1, bias=False) + folded BN + ReLU.
    # One dot per tap with K = 8*C1 (merged weight), windows sliced from the ref.
    acc = None
    for sh in range(3):
        for sw in range(3):
            win = cat_pad[:, sh:sh + Hs, sw:sw + Ws, :].reshape(M, Ccat)
            part = jnp.dot(win, w1_ref[sh, sw], preferred_element_type=jnp.float32)
            acc = part if acc is None else acc + part
    mid = jnp.maximum(acc * s1_ref[...] + t1_ref[...], 0.0)   # (M, 4*Cm), f32
    mid_pad[:, 1:Hs + 1, 1:Ws + 1, :] = mid.reshape(N, Hs, Ws, Cm4).astype(mid_pad.dtype)

    # --- conv2 (3x3, pad=1, bias=False) + folded BN + ReLU.
    acc2 = None
    for sh in range(3):
        for sw in range(3):
            win = mid_pad[:, sh:sh + Hs, sw:sw + Ws, :].reshape(M, Cm4)
            part = jnp.dot(win, w2_ref[sh, sw], preferred_element_type=jnp.float32)
            acc2 = part if acc2 is None else acc2 + part
    out = jnp.maximum(acc2 * s2_ref[...] + t2_ref[...], 0.0)  # (M, 4*Cout)
    o_ref[...] = out.reshape(N, Hs * Ws, out.shape[-1]).astype(o_ref.dtype)


# --------------------------- wrapper ------------------------------------------

def _group_conv3x3_weight(w_hwio):
    """Re-index a (3,3,Ci,Co) HWIO conv weight for 2x2 space-to-depth tensors.

    Returns (3, 3, 4*Ci, 4*Co).  Index [sh, sw] selects the group shift
    (-1..+1 along H and W); rows are ordered (a, b, ci) = input sub-position,
    columns (alpha, beta, co) = output sub-position inside a 2x2 group.
    """
    Ci, Co = w_hwio.shape[2], w_hwio.shape[3]
    wg = jnp.zeros((3, 3, 4 * Ci, 4 * Co), w_hwio.dtype)
    for sh in range(3):
        for sw in range(3):
            for a in range(2):
                for b in range(2):
                    for al in range(2):
                        for be in range(2):
                            dy = 2 * (sh - 1) + a - al + 1
                            dx = 2 * (sw - 1) + b - be + 1
                            if 0 <= dy <= 2 and 0 <= dx <= 2:
                                r = (2 * a + b) * Ci
                                c = (2 * al + be) * Co
                                wg = wg.at[sh, sw, r:r + Ci, c:c + Co].set(
                                    w_hwio[dy, dx])
    return wg


def decoder_forward(x_copy_nchw, x_nchw, params, eps=1e-5):
    """Pallas implementation of decoder.forward(x_copy, x) (single fused kernel)."""
    N, Cin, Hs, Ws = x_nchw.shape
    C1 = Cin // 2
    Hc, Wc = 2 * Hs, 2 * Ws
    assert x_copy_nchw.shape == (N, C1, Hc, Wc), x_copy_nchw.shape
    # TODO(synk): the bilinear F.interpolate / F.pad branch for mismatched skip
    # sizes is not implemented; k=2,s=2 upsampling of a half-resolution input
    # always matches x_copy here, so the branch is never taken.

    Cm = params['c1_w'].shape[0]
    Cout = params['c2_w'].shape[0]
    M = N * Hs * Ws
    cdt = jnp.bfloat16   # MXU input dtype; accumulation / BN / ReLU stay f32

    # --- plain-JAX layout glue at the module boundary (NCHW -> 2x2-grouped) ---
    xc_g = jnp.transpose(
        x_copy_nchw.reshape(N, C1, Hs, 2, Ws, 2), (0, 2, 4, 3, 5, 1)
    ).reshape(N, Hs, Ws, 4 * C1).astype(cdt)
    x2d = jnp.transpose(x_nchw, (0, 2, 3, 1)).reshape(M, Cin).astype(cdt)

    # --- fold parameters into kernel-friendly forms (tiny, one-time) ----------
    wup = jnp.transpose(params['up_w'], (0, 2, 3, 1)).reshape(Cin, 4 * C1).astype(cdt)
    bup = jnp.tile(params['up_b'], 4).reshape(1, 4 * C1).astype(jnp.float32)

    w1 = jnp.transpose(params['c1_w'], (2, 3, 1, 0))            # (3,3,2*C1,Cm) HWIO
    w1g = jnp.concatenate(
        [_group_conv3x3_weight(w1[:, :, :C1, :]),               # x_copy half
         _group_conv3x3_weight(w1[:, :, C1:, :])], axis=2       # upsample half
    ).astype(cdt)                                               # (3,3,8*C1,4*Cm)
    w2g = _group_conv3x3_weight(
        jnp.transpose(params['c2_w'], (2, 3, 1, 0))).astype(cdt)

    def bn_fold(g, b, m, v):
        # TODO(synk): BatchNorm2d folded with running stats (inference mode),
        # not training-mode batch statistics.
        s = g / jnp.sqrt(v + eps)
        return (jnp.tile(s, 4).reshape(1, -1).astype(jnp.float32),
                jnp.tile(b - m * s, 4).reshape(1, -1).astype(jnp.float32))

    s1, t1 = bn_fold(params['bn1_g'], params['bn1_b'], params['bn1_m'], params['bn1_v'])
    s2, t2 = bn_fold(params['bn2_g'], params['bn2_b'], params['bn2_m'], params['bn2_v'])

    flops = 2 * M * (Cin * 4 * C1 + 9 * (8 * C1) * (4 * Cm) + 9 * (4 * Cm) * (4 * Cout))
    bytes_accessed = (
        2 * (xc_g.size + x2d.size + wup.size + w1g.size + w2g.size)
        + 4 * (bup.size + s1.size + t1.size + s2.size + t2.size)
        + 4 * M * 4 * Cout)

    # TODO(synk): at real decoder resolutions add an H row-block "parallel" grid
    # axis with a 1-group halo and set vmem_limit_bytes for v7x's 64 MiB VMEM
    # (also keeps both v7x TensorCores busy).  At production channel widths
    # 4*Cout >= 128, so output stores become lane-dense automatically; a 4x4
    # space-to-depth regroup would only be needed for tiny channel counts.
    # TODO(synk): the deconv matmul could be folded into conv1's "up" weight
    # half offline (removes cat_pad's up block) but needs a border bias mask.
    out_g = pl.pallas_call(
        _decoder_fused_kernel,
        out_shape=jax.ShapeDtypeStruct((N, Hs * Ws, 4 * Cout), x_nchw.dtype),
        grid=(1,),
        in_specs=[
            pl.BlockSpec((N, Hs, Ws, 4 * C1), lambda i: (0, 0, 0, 0)),
            pl.BlockSpec((M, Cin), lambda i: (0, 0)),
            pl.BlockSpec((Cin, 4 * C1), lambda i: (0, 0)),
            pl.BlockSpec((1, 4 * C1), lambda i: (0, 0)),
            pl.BlockSpec((3, 3, 8 * C1, 4 * Cm), lambda i: (0, 0, 0, 0)),
            pl.BlockSpec((1, 4 * Cm), lambda i: (0, 0)),
            pl.BlockSpec((1, 4 * Cm), lambda i: (0, 0)),
            pl.BlockSpec((3, 3, 4 * Cm, 4 * Cout), lambda i: (0, 0, 0, 0)),
            pl.BlockSpec((1, 4 * Cout), lambda i: (0, 0)),
            pl.BlockSpec((1, 4 * Cout), lambda i: (0, 0)),
        ],
        out_specs=pl.BlockSpec((N, Hs * Ws, 4 * Cout), lambda i: (0, 0, 0)),
        scratch_shapes=[
            pltpu.VMEM((N, Hs + 2, Ws + 2, 8 * C1), cdt),   # padded [x_copy ‖ up]
            pltpu.VMEM((N, Hs + 2, Ws + 2, 4 * Cm), cdt),   # padded conv1 output
        ],
        compiler_params=pltpu.CompilerParams(dimension_semantics=("arbitrary",)),
        cost_estimate=pl.CostEstimate(flops=flops, transcendentals=0,
                                      bytes_accessed=bytes_accessed),
    )(xc_g, x2d, wup, bup, w1g, s1, t1, w2g, s2, t2)

    # un-group 2x2 space-to-depth and return NCHW
    out = out_g.reshape(N, Hs, Ws, 2, 2, Cout)
    out = jnp.transpose(out, (0, 5, 1, 3, 2, 4)).reshape(N, Cout, Hc, Wc)
    return out


# --------------------------- pure-JAX reference ------------------------------

def reference_forward(x_copy_nchw, x_nchw, params, eps=1e-5):
    x_copy = jnp.transpose(x_copy_nchw, (0, 2, 3, 1))
    x = jnp.transpose(x_nchw, (0, 2, 3, 1))
    # ConvTranspose2d(k=2, s=2): out[n, 2h+dh, 2w+dw, co] = sum_ci x*W + b
    y = jnp.einsum('nhwc,codk->nhdwko', x, params['up_w'])
    N, H, _, W, _, Cout = y.shape
    y = y.reshape(N, 2 * H, 2 * W, Cout) + params['up_b']
    y = jnp.concatenate([x_copy, y], axis=-1)

    def cbr(z, w_oihw, g, b, m, v):
        w = jnp.transpose(w_oihw, (2, 3, 1, 0))
        z = lax.conv_general_dilated(z, w, (1, 1), 'SAME',
                                     dimension_numbers=('NHWC', 'HWIO', 'NHWC'))
        s = g / jnp.sqrt(v + eps)
        return jnp.maximum(z * s + (b - m * s), 0.0)

    y = cbr(y, params['c1_w'], params['bn1_g'], params['bn1_b'],
            params['bn1_m'], params['bn1_v'])
    y = cbr(y, params['c2_w'], params['bn2_g'], params['bn2_b'],
            params['bn2_m'], params['bn2_v'])
    return jnp.transpose(y, (0, 3, 1, 2))


# --------------------------- main --------------------------------------------

if __name__ == "__main__":
    key = jax.random.PRNGKey(0)
    keys = jax.random.split(key, 16)

    N = 2
    in_channels = 8
    out_channels = 8
    inner = out_channels // 2           # x2conv inner channels
    Hs, Ws = 8, 8                       # low-res input spatial
    Hc, Wc = 2 * Hs, 2 * Ws             # skip-connection spatial

    # Inputs (PyTorch NCHW convention)
    x = jax.random.normal(keys[0], (N, in_channels, Hs, Ws), jnp.float32)
    x_copy = jax.random.normal(keys[1], (N, in_channels // 2, Hc, Wc), jnp.float32)

    # Deterministic parameter init (shapes from the module __init__)
    params = dict(
        # ConvTranspose2d(in, in//2, 2, 2): weight (Cin, Cout, 2, 2), bias (Cout,)
        up_w=0.2 * jax.random.normal(keys[2], (in_channels, in_channels // 2, 2, 2), jnp.float32),
        up_b=0.1 * jax.random.normal(keys[3], (in_channels // 2,), jnp.float32),
        # Conv2d(in, inner, 3, pad=1, bias=False): (Cout, Cin, 3, 3)
        c1_w=0.2 * jax.random.normal(keys[4], (inner, in_channels, 3, 3), jnp.float32),
        bn1_g=1.0 + 0.1 * jax.random.normal(keys[5], (inner,), jnp.float32),
        bn1_b=0.1 * jax.random.normal(keys[6], (inner,), jnp.float32),
        bn1_m=0.05 * jax.random.normal(keys[7], (inner,), jnp.float32),
        bn1_v=1.0 + 0.1 * jax.nn.softplus(jax.random.normal(keys[8], (inner,), jnp.float32)),
        # Conv2d(inner, out, 3, pad=1, bias=False)
        c2_w=0.2 * jax.random.normal(keys[9], (out_channels, inner, 3, 3), jnp.float32),
        bn2_g=1.0 + 0.1 * jax.random.normal(keys[10], (out_channels,), jnp.float32),
        bn2_b=0.1 * jax.random.normal(keys[11], (out_channels,), jnp.float32),
        bn2_m=0.05 * jax.random.normal(keys[12], (out_channels,), jnp.float32),
        bn2_v=1.0 + 0.1 * jax.nn.softplus(jax.random.normal(keys[13], (out_channels,), jnp.float32)),
    )

    out = decoder_forward(x_copy, x, params)
    out = jax.block_until_ready(out)

    ref = reference_forward(x_copy, x, params)
    assert out.shape == (N, out_channels, Hc, Wc), out.shape

    # bf16 MXU inputs (f32 accumulation) move numerics off exact f32 parity:
    # expect <~1% relative error; a layout/indexing bug would produce O(1)
    # errors at most positions, which these checks still catch easily.
    max_err = float(jnp.max(jnp.abs(out - ref)))
    rel_fro = float(jnp.linalg.norm(out - ref) / (jnp.linalg.norm(ref) + 1e-12))
    if not (rel_fro < 2e-2 and max_err < 0.25):
        raise AssertionError(
            f"Pallas output mismatch vs reference: max_err={max_err}, rel_fro={rel_fro}")

    print("KERNEL_OK")
</pallas_src>

<mosaic_0001>
module attributes {stable_mosaic.version = 11 : i64} {
  func.func @_decoder_fused_kernel(%arg0: i32, %arg1: memref<2x8x8x16xbf16, #tpu.memory_space<vmem>>, %arg2: memref<128x8xbf16, #tpu.memory_space<vmem>>, %arg3: memref<8x16xbf16, #tpu.memory_space<vmem>>, %arg4: memref<1x16xf32, #tpu.memory_space<vmem>>, %arg5: memref<3x3x32x16xbf16, #tpu.memory_space<vmem>>, %arg6: memref<1x16xf32, #tpu.memory_space<vmem>>, %arg7: memref<1x16xf32, #tpu.memory_space<vmem>>, %arg8: memref<3x3x16x32xbf16, #tpu.memory_space<vmem>>, %arg9: memref<1x32xf32, #tpu.memory_space<vmem>>, %arg10: memref<1x32xf32, #tpu.memory_space<vmem>>, %arg11: memref<2x64x32xf32, #tpu.memory_space<vmem>>, %arg12: memref<2x10x10x32xbf16, #tpu.memory_space<vmem>>, %arg13: memref<2x10x10x16xbf16, #tpu.memory_space<vmem>>) attributes {dimension_semantics = [#tpu.dimension_semantics<arbitrary>], iteration_bounds = array<i64: 1>, scalar_prefetch = 0 : i64, scratch_operands = 2 : i64, tpu.core_type = #tpu.core_type<tc>, window_params = [{pipeline_mode = #tpu.pipeline_mode<synchronous>, transform_indices = @transform_0, window_bounds = array<i64: 2, 8, 8, 16>}, {pipeline_mode = #tpu.pipeline_mode<synchronous>, transform_indices = @transform_1, window_bounds = array<i64: 128, 8>}, {pipeline_mode = #tpu.pipeline_mode<synchronous>, transform_indices = @transform_2, window_bounds = array<i64: 8, 16>}, {pipeline_mode = #tpu.pipeline_mode<synchronous>, transform_indices = @transform_3, window_bounds = array<i64: 1, 16>}, {pipeline_mode = #tpu.pipeline_mode<synchronous>, transform_indices = @transform_4, window_bounds = array<i64: 3, 3, 32, 16>}, {pipeline_mode = #tpu.pipeline_mode<synchronous>, transform_indices = @transform_5, window_bounds = array<i64: 1, 16>}, {pipeline_mode = #tpu.pipeline_mode<synchronous>, transform_indices = @transform_6, window_bounds = array<i64: 1, 16>}, {pipeline_mode = #tpu.pipeline_mode<synchronous>, transform_indices = @transform_7, window_bounds = array<i64: 3, 3, 16, 32>}, {pipeline_mode = #tpu.pipeline_mode<synchronous>, transform_indices = @transform_8, window_bounds = array<i64: 1, 32>}, {pipeline_mode = #tpu.pipeline_mode<synchronous>, transform_indices = @transform_9, window_bounds = array<i64: 1, 32>}, {pipeline_mode = #tpu.pipeline_mode<synchronous>, transform_indices = @transform_10, window_bounds = array<i64: 2, 64, 32>}]} {
    %cst = arith.constant 0.000000e+00 : bf16
    %0 = vector.broadcast %cst : bf16 to vector<2x1x10x32xbf16>
    %cst_0 = arith.constant 0.000000e+00 : bf16
    %1 = vector.broadcast %cst_0 : bf16 to vector<2x10x1x32xbf16>
    %c0 = arith.constant 0 : index
    %c0_1 = arith.constant 0 : index
    %c0_2 = arith.constant 0 : index
    %c0_3 = arith.constant 0 : index
    %2 = vector.load %arg12[%c0, %c0_1, %c0_2, %c0_3] : memref<2x10x10x32xbf16, #tpu.memory_space<vmem>>, vector<2x1x10x32xbf16>
    tpu.vector_store %arg12[%c0, %c0_1, %c0_2, %c0_3], %0 {strides = array<i32>} : memref<2x10x10x32xbf16, #tpu.memory_space<vmem>>, vector<2x1x10x32xbf16>,
    %c0_4 = arith.constant 0 : index
    %c9 = arith.constant 9 : index
    %c0_5 = arith.constant 0 : index
    %c0_6 = arith.constant 0 : index
    %3 = vector.load %arg12[%c0_4, %c9, %c0_5, %c0_6] : memref<2x10x10x32xbf16, #tpu.memory_space<vmem>>, vector<2x1x10x32xbf16>
    tpu.vector_store %arg12[%c0_4, %c9, %c0_5, %c0_6], %0 {strides = array<i32>} : memref<2x10x10x32xbf16, #tpu.memory_space<vmem>>, vector<2x1x10x32xbf16>,
    %c0_7 = arith.constant 0 : index
    %c0_8 = arith.constant 0 : index
    %c0_9 = arith.constant 0 : index
    %c0_10 = arith.constant 0 : index
    %4 = vector.load %arg12[%c0_7, %c0_8, %c0_9, %c0_10] : memref<2x10x10x32xbf16, #tpu.memory_space<vmem>>, vector<2x10x1x32xbf16>
    tpu.vector_store %arg12[%c0_7, %c0_8, %c0_9, %c0_10], %1 {strides = array<i32>} : memref<2x10x10x32xbf16, #tpu.memory_space<vmem>>, vector<2x10x1x32xbf16>,
    %c0_11 = arith.constant 0 : index
    %c0_12 = arith.constant 0 : index
    %c9_13 = arith.constant 9 : index
    %c0_14 = arith.constant 0 : index
    %5 = vector.load %arg12[%c0_11, %c0_12, %c9_13, %c0_14] : memref<2x10x10x32xbf16, #tpu.memory_space<vmem>>, vector<2x10x1x32xbf16>
    tpu.vector_store %arg12[%c0_11, %c0_12, %c9_13, %c0_14], %1 {strides = array<i32>} : memref<2x10x10x32xbf16, #tpu.memory_space<vmem>>, vector<2x10x1x32xbf16>,
    %cst_15 = arith.constant 0.000000e+00 : bf16
    %6 = vector.broadcast %cst_15 : bf16 to vector<2x1x10x16xbf16>
    %cst_16 = arith.constant 0.000000e+00 : bf16
    %7 = vector.broadcast %cst_16 : bf16 to vector<2x10x1x16xbf16>
    %c0_17 = arith.constant 0 : index
    %c0_18 = arith.constant 0 : index
    %c0_19 = arith.constant 0 : index
    %c0_20 = arith.constant 0 : index
    %8 = vector.load %arg13[%c0_17, %c0_18, %c0_19, %c0_20] : memref<2x10x10x16xbf16, #tpu.memory_space<vmem>>, vector<2x1x10x16xbf16>
    tpu.vector_store %arg13[%c0_17, %c0_18, %c0_19, %c0_20], %6 {strides = array<i32>} : memref<2x10x10x16xbf16, #tpu.memory_space<vmem>>, vector<2x1x10x16xbf16>,
    %c0_21 = arith.constant 0 : index
    %c9_22 = arith.constant 9 : index
    %c0_23 = arith.constant 0 : index
    %c0_24 = arith.constant 0 : index
    %9 = vector.load %arg13[%c0_21, %c9_22, %c0_23, %c0_24] : memref<2x10x10x16xbf16, #tpu.memory_space<vmem>>, vector<2x1x10x16xbf16>
    tpu.vector_store %arg13[%c0_21, %c9_22, %c0_23, %c0_24], %6 {strides = array<i32>} : memref<2x10x10x16xbf16, #tpu.memory_space<vmem>>, vector<2x1x10x16xbf16>,
    %c0_25 = arith.constant 0 : index
    %c0_26 = arith.constant 0 : index
    %c0_27 = arith.constant 0 : index
    %c0_28 = arith.constant 0 : index
    %10 = vector.load %arg13[%c0_25, %c0_26, %c0_27, %c0_28] : memref<2x10x10x16xbf16, #tpu.memory_space<vmem>>, vector<2x10x1x16xbf16>
    tpu.vector_store %arg13[%c0_25, %c0_26, %c0_27, %c0_28], %7 {strides = array<i32>} : memref<2x10x10x16xbf16, #tpu.memory_space<vmem>>, vector<2x10x1x16xbf16>,
    %c0_29 = arith.constant 0 : index
    %c0_30 = arith.constant 0 : index
    %c9_31 = arith.constant 9 : index
    %c0_32 = arith.constant 0 : index
    %11 = vector.load %arg13[%c0_29, %c0_30, %c9_31, %c0_32] : memref<2x10x10x16xbf16, #tpu.memory_space<vmem>>, vector<2x10x1x16xbf16>
    tpu.vector_store %arg13[%c0_29, %c0_30, %c9_31, %c0_32], %7 {strides = array<i32>} : memref<2x10x10x16xbf16, #tpu.memory_space<vmem>>, vector<2x10x1x16xbf16>,
    %c0_33 = arith.constant 0 : index
    %c0_34 = arith.constant 0 : index
    %12 = vector.load %arg2[%c0_33, %c0_34] : memref<128x8xbf16, #tpu.memory_space<vmem>>, vector<128x8xbf16>
    %c0_35 = arith.constant 0 : index
    %c0_36 = arith.constant 0 : index
    %13 = vector.load %arg3[%c0_35, %c0_36] : memref<8x16xbf16, #tpu.memory_space<vmem>>, vector<8x16xbf16>
    %cst_37 = arith.constant dense<0.000000e+00> : vector<128x16xf32>
    %14 = tpu.matmul %12, %13, %cst_37 {dimension_numbers = #tpu.dot_dimension_numbers<[1], [0], [0], [1], [0, 0, 1, 1], [], []>} : vector<128x8xbf16>, vector<8x16xbf16>, vector<128x16xf32> -> vector<128x16xf32>
    %c0_38 = arith.constant 0 : index
    %c0_39 = arith.constant 0 : index
    %15 = vector.load %arg4[%c0_38, %c0_39] : memref<1x16xf32, #tpu.memory_space<vmem>>, vector<1x16xf32>
    %16 = vector.broadcast %15 : vector<1x16xf32> to vector<128x16xf32>
    %17 = arith.addf %14, %16 : vector<128x16xf32>
    %c0_40 = arith.constant 0 : index
    %c0_41 = arith.constant 0 : index
    %c0_42 = arith.constant 0 : index
    %c0_43 = arith.constant 0 : index
    %18 = vector.load %arg1[%c0_40, %c0_41, %c0_42, %c0_43] : memref<2x8x8x16xbf16, #tpu.memory_space<vmem>>, vector<2x8x8x16xbf16>
    %19 = vector.shape_cast %17 : vector<128x16xf32> to vector<2x8x8x16xf32>
    %20 = arith.truncf %19 : vector<2x8x8x16xf32> to vector<2x8x8x16xbf16>
    %21 = tpu.concatenate %18, %20 in 3 : vector<2x8x8x16xbf16>, vector<2x8x8x16xbf16> -> vector<2x8x8x32xbf16>
    %c0_44 = arith.constant 0 : index
    %c1 = arith.constant 1 : index
    %c1_45 = arith.constant 1 : index
    %c0_46 = arith.constant 0 : index
    %22 = vector.load %arg12[%c0_44, %c1, %c1_45, %c0_46] : memref<2x10x10x32xbf16, #tpu.memory_space<vmem>>, vector<2x8x8x32xbf16>
    tpu.vector_store %arg12[%c0_44, %c1, %c1_45, %c0_46], %21 {strides = array<i32>} : memref<2x10x10x32xbf16, #tpu.memory_space<vmem>>, vector<2x8x8x32xbf16>,
    %c0_47 = arith.constant 0 : index
    %c0_48 = arith.constant 0 : index
    %c0_49 = arith.constant 0 : index
    %c0_50 = arith.constant 0 : index
    %23 = vector.load %arg12[%c0_47, %c0_48, %c0_49, %c0_50] : memref<2x10x10x32xbf16, #tpu.memory_space<vmem>>, vector<2x8x8x32xbf16>
    %24 = vector.shape_cast %23 : vector<2x8x8x32xbf16> to vector<128x32xbf16>
    %c0_51 = arith.constant 0 : index
    %c0_52 = arith.constant 0 : index
    %c0_53 = arith.constant 0 : index
    %c0_54 = arith.constant 0 : index
    %25 = vector.load %arg5[%c0_51, %c0_52, %c0_53, %c0_54] : memref<3x3x32x16xbf16, #tpu.memory_space<vmem>>, vector<1x1x32x16xbf16>
    %26 = vector.shape_cast %25 : vector<1x1x32x16xbf16> to vector<32x16xbf16>
    %cst_55 = arith.constant dense<0.000000e+00> : vector<128x16xf32>
    %27 = tpu.matmul %24, %26, %cst_55 {dimension_numbers = #tpu.dot_dimension_numbers<[1], [0], [0], [1], [0, 0, 1, 1], [], []>} : vector<128x32xbf16>, vector<32x16xbf16>, vector<128x16xf32> -> vector<128x16xf32>
    %c0_56 = arith.constant 0 : index
    %c0_57 = arith.constant 0 : index
    %c1_58 = arith.constant 1 : index
    %c0_59 = arith.constant 0 : index
    %28 = vector.load %arg12[%c0_56, %c0_57, %c1_58, %c0_59] : memref<2x10x10x32xbf16, #tpu.memory_space<vmem>>, vector<2x8x8x32xbf16>
    %29 = vector.shape_cast %28 : vector<2x8x8x32xbf16> to vector<128x32xbf16>
    %c0_60 = arith.constant 0 : index
    %c1_61 = arith.constant 1 : index
    %c0_62 = arith.constant 0 : index
    %c0_63 = arith.constant 0 : index
    %30 = vector.load %arg5[%c0_60, %c1_61, %c0_62, %c0_63] : memref<3x3x32x16xbf16, #tpu.memory_space<vmem>>, vector<1x1x32x16xbf16>
    %31 = vector.shape_cast %30 : vector<1x1x32x16xbf16> to vector<32x16xbf16>
    %cst_64 = arith.constant dense<0.000000e+00> : vector<128x16xf32>
    %32 = tpu.matmul %29, %31, %cst_64 {dimension_numbers = #tpu.dot_dimension_numbers<[1], [0], [0], [1], [0, 0, 1, 1], [], []>} : vector<128x32xbf16>, vector<32x16xbf16>, vector<128x16xf32> -> vector<128x16xf32>
    %33 = arith.addf %27, %32 : vector<128x16xf32>
    %c0_65 = arith.constant 0 : index
    %c0_66 = arith.constant 0 : index
    %c2 = arith.constant 2 : index
    %c0_67 = arith.constant 0 : index
    %34 = vector.load %arg12[%c0_65, %c0_66, %c2, %c0_67] : memref<2x10x10x32xbf16, #tpu.memory_space<vmem>>, vector<2x8x8x32xbf16>
    %35 = vector.shape_cast %34 : vector<2x8x8x32xbf16> to vector<128x32xbf16>
    %c0_68 = arith.constant 0 : index
    %c2_69 = arith.constant 2 : index
    %c0_70 = arith.constant 0 : index
    %c0_71 = arith.constant 0 : index
    %36 = vector.load %arg5[%c0_68, %c2_69, %c0_70, %c0_71] : memref<3x3x32x16xbf16, #tpu.memory_space<vmem>>, vector<1x1x32x16xbf16>
    %37 = vector.shape_cast %36 : vector<1x1x32x16xbf16> to vector<32x16xbf16>
    %cst_72 = arith.constant dense<0.000000e+00> : vector<128x16xf32>
    %38 = tpu.matmul %35, %37, %cst_72 {dimension_numbers = #tpu.dot_dimension_numbers<[1], [0], [0], [1], [0, 0, 1, 1], [], []>} : vector<128x32xbf16>, vector<32x16xbf16>, vector<128x16xf32> -> vector<128x16xf32>
    %39 = arith.addf %33, %38 : vector<128x16xf32>
    %c0_73 = arith.constant 0 : index
    %c1_74 = arith.constant 1 : index
    %c0_75 = arith.constant 0 : index
    %c0_76 = arith.constant 0 : index
    %40 = vector.load %arg12[%c0_73, %c1_74, %c0_75, %c0_76] : memref<2x10x10x32xbf16, #tpu.memory_space<vmem>>, vector<2x8x8x32xbf16>
    %41 = vector.shape_cast %40 : vector<2x8x8x32xbf16> to vector<128x32xbf16>
    %c1_77 = arith.constant 1 : index
    %c0_78 = arith.constant 0 : index
    %c0_79 = arith.constant 0 : index
    %c0_80 = arith.constant 0 : index
    %42 = vector.load %arg5[%c1_77, %c0_78, %c0_79, %c0_80] : memref<3x3x32x16xbf16, #tpu.memory_space<vmem>>, vector<1x1x32x16xbf16>
    %43 = vector.shape_cast %42 : vector<1x1x32x16xbf16> to vector<32x16xbf16>
    %cst_81 = arith.constant dense<0.000000e+00> : vector<128x16xf32>
    %44 = tpu.matmul %41, %43, %cst_81 {dimension_numbers = #tpu.dot_dimension_numbers<[1], [0], [0], [1], [0, 0, 1, 1], [], []>} : vector<128x32xbf16>, vector<32x16xbf16>, vector<128x16xf32> -> vector<128x16xf32>
    %45 = arith.addf %39, %44 : vector<128x16xf32>
    %c0_82 = arith.constant 0 : index
    %c1_83 = arith.constant 1 : index
    %c1_84 = arith.constant 1 : index
    %c0_85 = arith.constant 0 : index
    %46 = vector.load %arg12[%c0_82, %c1_83, %c1_84, %c0_85] : memref<2x10x10x32xbf16, #tpu.memory_space<vmem>>, vector<2x8x8x32xbf16>
    %47 = vector.shape_cast %46 : vector<2x8x8x32xbf16> to vector<128x32xbf16>
    %c1_86 = arith.constant 1 : index
    %c1_87 = arith.constant 1 : index
    %c0_88 = arith.constant 0 : index
    %c0_89 = arith.constant 0 : index
    %48 = vector.load %arg5[%c1_86, %c1_87, %c0_88, %c0_89] : memref<3x3x32x16xbf16, #tpu.memory_space<vmem>>, vector<1x1x32x16xbf16>
    %49 = vector.shape_cast %48 : vector<1x1x32x16xbf16> to vector<32x16xbf16>
    %cst_90 = arith.constant dense<0.000000e+00> : vector<128x16xf32>
    %50 = tpu.matmul %47, %49, %cst_90 {dimension_numbers = #tpu.dot_dimension_numbers<[1], [0], [0], [1], [0, 0, 1, 1], [], []>} : vector<128x32xbf16>, vector<32x16xbf16>, vector<128x16xf32> -> vector<128x16xf32>
    %51 = arith.addf %45, %50 : vector<128x16xf32>
    %c0_91 = arith.constant 0 : index
    %c1_92 = arith.constant 1 : index
    %c2_93 = arith.constant 2 : index
    %c0_94 = arith.constant 0 : index
    %52 = vector.load %arg12[%c0_91, %c1_92, %c2_93, %c0_94] : memref<2x10x10x32xbf16, #tpu.memory_space<vmem>>, vector<2x8x8x32xbf16>
    %53 = vector.shape_cast %52 : vector<2x8x8x32xbf16> to vector<128x32xbf16>
    %c1_95 = arith.constant 1 : index
    %c2_96 = arith.constant 2 : index
    %c0_97 = arith.constant 0 : index
    %c0_98 = arith.constant 0 : index
    %54 = vector.load %arg5[%c1_95, %c2_96, %c0_97, %c0_98] : memref<3x3x32x16xbf16, #tpu.memory_space<vmem>>, vector<1x1x32x16xbf16>
    %55 = vector.shape_cast %54 : vector<1x1x32x16xbf16> to vector<32x16xbf16>
    %cst_99 = arith.constant dense<0.000000e+00> : vector<128x16xf32>
    %56 = tpu.matmul %53, %55, %cst_99 {dimension_numbers = #tpu.dot_dimension_numbers<[1], [0], [0], [1], [0, 0, 1, 1], [], []>} : vector<128x32xbf16>, vector<32x16xbf16>, vector<128x16xf32> -> vector<128x16xf32>
    %57 = arith.addf %51, %56 : vector<128x16xf32>
    %c0_100 = arith.constant 0 : index
    %c2_101 = arith.constant 2 : index
    %c0_102 = arith.constant 0 : index
    %c0_103 = arith.constant 0 : index
    %58 = vector.load %arg12[%c0_100, %c2_101, %c0_102, %c0_103] : memref<2x10x10x32xbf16, #tpu.memory_space<vmem>>, vector<2x8x8x32xbf16>
    %59 = vector.shape_cast %58 : vector<2x8x8x32xbf16> to vector<128x32xbf16>
    %c2_104 = arith.constant 2 : index
    %c0_105 = arith.constant 0 : index
    %c0_106 = arith.constant 0 : index
    %c0_107 = arith.constant 0 : index
    %60 = vector.load %arg5[%c2_104, %c0_105, %c0_106, %c0_107] : memref<3x3x32x16xbf16, #tpu.memory_space<vmem>>, vector<1x1x32x16xbf16>
    %61 = vector.shape_cast %60 : vector<1x1x32x16xbf16> to vector<32x16xbf16>
    %cst_108 = arith.constant dense<0.000000e+00> : vector<128x16xf32>
    %62 = tpu.matmul %59, %61, %cst_108 {dimension_numbers = #tpu.dot_dimension_numbers<[1], [0], [0], [1], [0, 0, 1, 1], [], []>} : vector<128x32xbf16>, vector<32x16xbf16>, vector<128x16xf32> -> vector<128x16xf32>
    %63 = arith.addf %57, %62 : vector<128x16xf32>
    %c0_109 = arith.constant 0 : index
    %c2_110 = arith.constant 2 : index
    %c1_111 = arith.constant 1 : index
    %c0_112 = arith.constant 0 : index
    %64 = vector.load %arg12[%c0_109, %c2_110, %c1_111, %c0_112] : memref<2x10x10x32xbf16, #tpu.memory_space<vmem>>, vector<2x8x8x32xbf16>
    %65 = vector.shape_cast %64 : vector<2x8x8x32xbf16> to vector<128x32xbf16>
    %c2_113 = arith.constant 2 : index
    %c1_114 = arith.constant 1 : index
    %c0_115 = arith.constant 0 : index
    %c0_116 = arith.constant 0 : index
    %66 = vector.load %arg5[%c2_113, %c1_114, %c0_115, %c0_116] : memref<3x3x32x16xbf16, #tpu.memory_space<vmem>>, vector<1x1x32x16xbf16>
    %67 = vector.shape_cast %66 : vector<1x1x32x16xbf16> to vector<32x16xbf16>
    %cst_117 = arith.constant dense<0.000000e+00> : vector<128x16xf32>
    %68 = tpu.matmul %65, %67, %cst_117 {dimension_numbers = #tpu.dot_dimension_numbers<[1], [0], [0], [1], [0, 0, 1, 1], [], []>} : vector<128x32xbf16>, vector<32x16xbf16>, vector<128x16xf32> -> vector<128x16xf32>
    %69 = arith.addf %63, %68 : vector<128x16xf32>
    %c0_118 = arith.constant 0 : index
    %c2_119 = arith.constant 2 : index
    %c2_120 = arith.constant 2 : index
    %c0_121 = arith.constant 0 : index
    %70 = vector.load %arg12[%c0_118, %c2_119, %c2_120, %c0_121] : memref<2x10x10x32xbf16, #tpu.memory_space<vmem>>, vector<2x8x8x32xbf16>
    %71 = vector.shape_cast %70 : vector<2x8x8x32xbf16> to vector<128x32xbf16>
    %c2_122 = arith.constant 2 : index
    %c2_123 = arith.constant 2 : index
    %c0_124 = arith.constant 0 : index
    %c0_125 = arith.constant 0 : index
    %72 = vector.load %arg5[%c2_122, %c2_123, %c0_124, %c0_125] : memref<3x3x32x16xbf16, #tpu.memory_space<vmem>>, vector<1x1x32x16xbf16>
    %73 = vector.shape_cast %72 : vector<1x1x32x16xbf16> to vector<32x16xbf16>
    %cst_126 = arith.constant dense<0.000000e+00> : vector<128x16xf32>
    %74 = tpu.matmul %71, %73, %cst_126 {dimension_numbers = #tpu.dot_dimension_numbers<[1], [0], [0], [1], [0, 0, 1, 1], [], []>} : vector<128x32xbf16>, vector<32x16xbf16>, vector<128x16xf32> -> vector<128x16xf32>
    %75 = arith.addf %69, %74 : vector<128x16xf32>
    %c0_127 = arith.constant 0 : index
    %c0_128 = arith.constant 0 : index
    %76 = vector.load %arg6[%c0_127, %c0_128] : memref<1x16xf32, #tpu.memory_space<vmem>>, vector<1x16xf32>
    %77 = vector.broadcast %76 : vector<1x16xf32> to vector<128x16xf32>
    %78 = arith.mulf %75, %77 : vector<128x16xf32>
    %c0_129 = arith.constant 0 : index
    %c0_130 = arith.constant 0 : index
    %79 = vector.load %arg7[%c0_129, %c0_130] : memref<1x16xf32, #tpu.memory_space<vmem>>, vector<1x16xf32>
    %80 = vector.broadcast %79 : vector<1x16xf32> to vector<128x16xf32>
    %81 = arith.addf %78, %80 : vector<128x16xf32>
    %cst_131 = arith.constant 0.000000e+00 : f32
    %82 = vector.broadcast %cst_131 : f32 to vector<128x16xf32>
    %83 = arith.maximumf %81, %82 : vector<128x16xf32>
    %84 = vector.shape_cast %83 : vector<128x16xf32> to vector<2x8x8x16xf32>
    %85 = arith.truncf %84 : vector<2x8x8x16xf32> to vector<2x8x8x16xbf16>
    %c0_132 = arith.constant 0 : index
    %c1_133 = arith.constant 1 : index
    %c1_134 = arith.constant 1 : index
    %c0_135 = arith.constant 0 : index
    %86 = vector.load %arg13[%c0_132, %c1_133, %c1_134, %c0_135] : memref<2x10x10x16xbf16, #tpu.memory_space<vmem>>, vector<2x8x8x16xbf16>
    tpu.vector_store %arg13[%c0_132, %c1_133, %c1_134, %c0_135], %85 {strides = array<i32>} : memref<2x10x10x16xbf16, #tpu.memory_space<vmem>>, vector<2x8x8x16xbf16>,
    %c0_136 = arith.constant 0 : index
    %c0_137 = arith.constant 0 : index
    %c0_138 = arith.constant 0 : index
    %c0_139 = arith.constant 0 : index
    %87 = vector.load %arg13[%c0_136, %c0_137, %c0_138, %c0_139] : memref<2x10x10x16xbf16, #tpu.memory_space<vmem>>, vector<2x8x8x16xbf16>
    %88 = vector.shape_cast %87 : vector<2x8x8x16xbf16> to vector<128x16xbf16>
    %c0_140 = arith.constant 0 : index
    %c0_141 = arith.constant 0 : index
    %c0_142 = arith.constant 0 : index
    %c0_143 = arith.constant 0 : index
    %89 = vector.load %arg8[%c0_140, %c0_141, %c0_142, %c0_143] : memref<3x3x16x32xbf16, #tpu.memory_space<vmem>>, vector<1x1x16x32xbf16>
    %90 = vector.shape_cast %89 : vector<1x1x16x32xbf16> to vector<16x32xbf16>
    %cst_144 = arith.constant dense<0.000000e+00> : vector<128x32xf32>
    %91 = tpu.matmul %88, %90, %cst_144 {dimension_numbers = #tpu.dot_dimension_numbers<[1], [0], [0], [1], [0, 0, 1, 1], [], []>} : vector<128x16xbf16>, vector<16x32xbf16>, vector<128x32xf32> -> vector<128x32xf32>
    %c0_145 = arith.constant 0 : index
    %c0_146 = arith.constant 0 : index
    %c1_147 = arith.constant 1 : index
    %c0_148 = arith.constant 0 : index
    %92 = vector.load %arg13[%c0_145, %c0_146, %c1_147, %c0_148] : memref<2x10x10x16xbf16, #tpu.memory_space<vmem>>, vector<2x8x8x16xbf16>
    %93 = vector.shape_cast %92 : vector<2x8x8x16xbf16> to vector<128x16xbf16>
    %c0_149 = arith.constant 0 : index
    %c1_150 = arith.constant 1 : index
    %c0_151 = arith.constant 0 : index
    %c0_152 = arith.constant 0 : index
    %94 = vector.load %arg8[%c0_149, %c1_150, %c0_151, %c0_152] : memref<3x3x16x32xbf16, #tpu.memory_space<vmem>>, vector<1x1x16x32xbf16>
    %95 = vector.shape_cast %94 : vector<1x1x16x32xbf16> to vector<16x32xbf16>
    %cst_153 = arith.constant dense<0.000000e+00> : vector<128x32xf32>
    %96 = tpu.matmul %93, %95, %cst_153 {dimension_numbers = #tpu.dot_dimension_numbers<[1], [0], [0], [1], [0, 0, 1, 1], [], []>} : vector<128x16xbf16>, vector<16x32xbf16>, vector<128x32xf32> -> vector<128x32xf32>
    %97 = arith.addf %91, %96 : vector<128x32xf32>
    %c0_154 = arith.constant 0 : index
    %c0_155 = arith.constant 0 : index
    %c2_156 = arith.constant 2 : index
    %c0_157 = arith.constant 0 : index
    %98 = vector.load %arg13[%c0_154, %c0_155, %c2_156, %c0_157] : memref<2x10x10x16xbf16, #tpu.memory_space<vmem>>, vector<2x8x8x16xbf16>
    %99 = vector.shape_cast %98 : vector<2x8x8x16xbf16> to vector<128x16xbf16>
    %c0_158 = arith.constant 0 : index
    %c2_159 = arith.constant 2 : index
    %c0_160 = arith.constant 0 : index
    %c0_161 = arith.constant 0 : index
    %100 = vector.load %arg8[%c0_158, %c2_159, %c0_160, %c0_161] : memref<3x3x16x32xbf16, #tpu.memory_space<vmem>>, vector<1x1x16x32xbf16>
    %101 = vector.shape_cast %100 : vector<1x1x16x32xbf16> to vector<16x32xbf16>
    %cst_162 = arith.constant dense<0.000000e+00> : vector<128x32xf32>
    %102 = tpu.matmul %99, %101, %cst_162 {dimension_numbers = #tpu.dot_dimension_numbers<[1], [0], [0], [1], [0, 0, 1, 1], [], []>} : vector<128x16xbf16>, vector<16x32xbf16>, vector<128x32xf32> -> vector<128x32xf32>
    %103 = arith.addf %97, %102 : vector<128x32xf32>
    %c0_163 = arith.constant 0 : index
    %c1_164 = arith.constant 1 : index
    %c0_165 = arith.constant 0 : index
    %c0_166 = arith.constant 0 : index
    %104 = vector.load %arg13[%c0_163, %c1_164, %c0_165, %c0_166] : memref<2x10x10x16xbf16, #tpu.memory_space<vmem>>, vector<2x8x8x16xbf16>
    %105 = vector.shape_cast %104 : vector<2x8x8x16xbf16> to vector<128x16xbf16>
    %c1_167 = arith.constant 1 : index
    %c0_168 = arith.constant 0 : index
    %c0_169 = arith.constant 0 : index
    %c0_170 = arith.constant 0 : index
    %106 = vector.load %arg8[%c1_167, %c0_168, %c0_169, %c0_170] : memref<3x3x16x32xbf16, #tpu.memory_space<vmem>>, vector<1x1x16x32xbf16>
    %107 = vector.shape_cast %106 : vector<1x1x16x32xbf16> to vector<16x32xbf16>
    %cst_171 = arith.constant dense<0.000000e+00> : vector<128x32xf32>
    %108 = tpu.matmul %105, %107, %cst_171 {dimension_numbers = #tpu.dot_dimension_numbers<[1], [0], [0], [1], [0, 0, 1, 1], [], []>} : vector<128x16xbf16>, vector<16x32xbf16>, vector<128x32xf32> -> vector<128x32xf32>
    %109 = arith.addf %103, %108 : vector<128x32xf32>
    %c0_172 = arith.constant 0 : index
    %c1_173 = arith.constant 1 : index
    %c1_174 = arith.constant 1 : index
    %c0_175 = arith.constant 0 : index
    %110 = vector.load %arg13[%c0_172, %c1_173, %c1_174, %c0_175] : memref<2x10x10x16xbf16, #tpu.memory_space<vmem>>, vector<2x8x8x16xbf16>
    %111 = vector.shape_cast %110 : vector<2x8x8x16xbf16> to vector<128x16xbf16>
    %c1_176 = arith.constant 1 : index
    %c1_177 = arith.constant 1 : index
    %c0_178 = arith.constant 0 : index
    %c0_179 = arith.constant 0 : index
    %112 = vector.load %arg8[%c1_176, %c1_177, %c0_178, %c0_179] : memref<3x3x16x32xbf16, #tpu.memory_space<vmem>>, vector<1x1x16x32xbf16>
    %113 = vector.shape_cast %112 : vector<1x1x16x32xbf16> to vector<16x32xbf16>
    %cst_180 = arith.constant dense<0.000000e+00> : vector<128x32xf32>
    %114 = tpu.matmul %111, %113, %cst_180 {dimension_numbers = #tpu.dot_dimension_numbers<[1], [0], [0], [1], [0, 0, 1, 1], [], []>} : vector<128x16xbf16>, vector<16x32xbf16>, vector<128x32xf32> -> vector<128x32xf32>
    %115 = arith.addf %109, %114 : vector<128x32xf32>
    %c0_181 = arith.constant 0 : index
    %c1_182 = arith.constant 1 : index
    %c2_183 = arith.constant 2 : index
    %c0_184 = arith.constant 0 : index
    %116 = vector.load %arg13[%c0_181, %c1_182, %c2_183, %c0_184] : memref<2x10x10x16xbf16, #tpu.memory_space<vmem>>, vector<2x8x8x16xbf16>
    %117 = vector.shape_cast %116 : vector<2x8x8x16xbf16> to vector<128x16xbf16>
    %c1_185 = arith.constant 1 : index
    %c2_186 = arith.constant 2 : index
    %c0_187 = arith.constant 0 : index
    %c0_188 = arith.constant 0 : index
    %118 = vector.load %arg8[%c1_185, %c2_186, %c0_187, %c0_188] : memref<3x3x16x32xbf16, #tpu.memory_space<vmem>>, vector<1x1x16x32xbf16>
    %119 = vector.shape_cast %118 : vector<1x1x16x32xbf16> to vector<16x32xbf16>
    %cst_189 = arith.constant dense<0.000000e+00> : vector<128x32xf32>
    %120 = tpu.matmul %117, %119, %cst_189 {dimension_numbers = #tpu.dot_dimension_numbers<[1], [0], [0], [1], [0, 0, 1, 1], [], []>} : vector<128x16xbf16>, vector<16x32xbf16>, vector<128x32xf32> -> vector<128x32xf32>
    %121 = arith.addf %115, %120 : vector<128x32xf32>
    %c0_190 = arith.constant 0 : index
    %c2_191 = arith.constant 2 : index
    %c0_192 = arith.constant 0 : index
    %c0_193 = arith.constant 0 : index
    %122 = vector.load %arg13[%c0_190, %c2_191, %c0_192, %c0_193] : memref<2x10x10x16xbf16, #tpu.memory_space<vmem>>, vector<2x8x8x16xbf16>
    %123 = vector.shape_cast %122 : vector<2x8x8x16xbf16> to vector<128x16xbf16>
    %c2_194 = arith.constant 2 : index
    %c0_195 = arith.constant 0 : index
    %c0_196 = arith.constant 0 : index
    %c0_197 = arith.constant 0 : index
    %124 = vector.load %arg8[%c2_194, %c0_195, %c0_196, %c0_197] : memref<3x3x16x32xbf16, #tpu.memory_space<vmem>>, vector<1x1x16x32xbf16>
    %125 = vector.shape_cast %124 : vector<1x1x16x32xbf16> to vector<16x32xbf16>
    %cst_198 = arith.constant dense<0.000000e+00> : vector<128x32xf32>
    %126 = tpu.matmul %123, %125, %cst_198 {dimension_numbers = #tpu.dot_dimension_numbers<[1], [0], [0], [1], [0, 0, 1, 1], [], []>} : vector<128x16xbf16>, vector<16x32xbf16>, vector<128x32xf32> -> vector<128x32xf32>
    %127 = arith.addf %121, %126 : vector<128x32xf32>
    %c0_199 = arith.constant 0 : index
    %c2_200 = arith.constant 2 : index
    %c1_201 = arith.constant 1 : index
    %c0_202 = arith.constant 0 : index
    %128 = vector.load %arg13[%c0_199, %c2_200, %c1_201, %c0_202] : memref<2x10x10x16xbf16, #tpu.memory_space<vmem>>, vector<2x8x8x16xbf16>
    %129 = vector.shape_cast %128 : vector<2x8x8x16xbf16> to vector<128x16xbf16>
    %c2_203 = arith.constant 2 : index
    %c1_204 = arith.constant 1 : index
    %c0_205 = arith.constant 0 : index
    %c0_206 = arith.constant 0 : index
    %130 = vector.load %arg8[%c2_203, %c1_204, %c0_205, %c0_206] : memref<3x3x16x32xbf16, #tpu.memory_space<vmem>>, vector<1x1x16x32xbf16>
    %131 = vector.shape_cast %130 : vector<1x1x16x32xbf16> to vector<16x32xbf16>
    %cst_207 = arith.constant dense<0.000000e+00> : vector<128x32xf32>
    %132 = tpu.matmul %129, %131, %cst_207 {dimension_numbers = #tpu.dot_dimension_numbers<[1], [0], [0], [1], [0, 0, 1, 1], [], []>} : vector<128x16xbf16>, vector<16x32xbf16>, vector<128x32xf32> -> vector<128x32xf32>
    %133 = arith.addf %127, %132 : vector<128x32xf32>
    %c0_208 = arith.constant 0 : index
    %c2_209 = arith.constant 2 : index
    %c2_210 = arith.constant 2 : index
    %c0_211 = arith.constant 0 : index
    %134 = vector.load %arg13[%c0_208, %c2_209, %c2_210, %c0_211] : memref<2x10x10x16xbf16, #tpu.memory_space<vmem>>, vector<2x8x8x16xbf16>
    %135 = vector.shape_cast %134 : vector<2x8x8x16xbf16> to vector<128x16xbf16>
    %c2_212 = arith.constant 2 : index
    %c2_213 = arith.constant 2 : index
    %c0_214 = arith.constant 0 : index
    %c0_215 = arith.constant 0 : index
    %136 = vector.load %arg8[%c2_212, %c2_213, %c0_214, %c0_215] : memref<3x3x16x32xbf16, #tpu.memory_space<vmem>>, vector<1x1x16x32xbf16>
    %137 = vector.shape_cast %136 : vector<1x1x16x32xbf16> to vector<16x32xbf16>
    %cst_216 = arith.constant dense<0.000000e+00> : vector<128x32xf32>
    %138 = tpu.matmul %135, %137, %cst_216 {dimension_numbers = #tpu.dot_dimension_numbers<[1], [0], [0], [1], [0, 0, 1, 1], [], []>} : vector<128x16xbf16>, vector<16x32xbf16>, vector<128x32xf32> -> vector<128x32xf32>
    %139 = arith.addf %133, %138 : vector<128x32xf32>
    %c0_217 = arith.constant 0 : index
    %c0_218 = arith.constant 0 : index
    %140 = vector.load %arg9[%c0_217, %c0_218] : memref<1x32xf32, #tpu.memory_space<vmem>>, vector<1x32xf32>
    %141 = vector.broadcast %140 : vector<1x32xf32> to vector<128x32xf32>
    %142 = arith.mulf %139, %141 : vector<128x32xf32>
    %c0_219 = arith.constant 0 : index
    %c0_220 = arith.constant 0 : index
    %143 = vector.load %arg10[%c0_219, %c0_220] : memref<1x32xf32, #tpu.memory_space<vmem>>, vector<1x32xf32>
    %144 = vector.broadcast %143 : vector<1x32xf32> to vector<128x32xf32>
    %145 = arith.addf %142, %144 : vector<128x32xf32>
    %cst_221 = arith.constant 0.000000e+00 : f32
    %146 = vector.broadcast %cst_221 : f32 to vector<128x32xf32>
    %147 = arith.maximumf %145, %146 : vector<128x32xf32>
    %148 = vector.shape_cast %147 : vector<128x32xf32> to vector<2x64x32xf32>
    %c0_222 = arith.constant 0 : index
    %c0_223 = arith.constant 0 : index
    %c0_224 = arith.constant 0 : index
    %149 = vector.load %arg11[%c0_222, %c0_223, %c0_224] : memref<2x64x32xf32, #tpu.memory_space<vmem>>, vector<2x64x32xf32>
    tpu.vector_store %arg11[%c0_222, %c0_223, %c0_224], %148 {strides = array<i32>} : memref<2x64x32xf32, #tpu.memory_space<vmem>>, vector<2x64x32xf32>,
    return
  }
  func.func @transform_0(%arg0: i32) -> (i32, i32, i32, i32) {
    %c0_i32 = arith.constant 0 : i32
    %c0_i32_0 = arith.constant 0 : i32
    %c0_i32_1 = arith.constant 0 : i32
    %c0_i32_2 = arith.constant 0 : i32
    %c0_i32_3 = arith.constant 0 : i32
    return %c0_i32, %c0_i32_0, %c0_i32_1, %c0_i32_2 : i32, i32, i32, i32
  }
  func.func @transform_1(%arg0: i32) -> (i32, i32) {
    %c0_i32 = arith.constant 0 : i32
    %c0_i32_0 = arith.constant 0 : i32
    %c0_i32_1 = arith.constant 0 : i32
    return %c0_i32, %c0_i32_0 : i32, i32
  }
  func.func @transform_2(%arg0: i32) -> (i32, i32) {
    %c0_i32 = arith.constant 0 : i32
    %c0_i32_0 = arith.constant 0 : i32
    %c0_i32_1 = arith.constant 0 : i32
    return %c0_i32, %c0_i32_0 : i32, i32
  }
  func.func @transform_3(%arg0: i32) -> (i32, i32) {
    %c0_i32 = arith.constant 0 : i32
    %c0_i32_0 = arith.constant 0 : i32
    %c0_i32_1 = arith.constant 0 : i32
    return %c0_i32, %c0_i32_0 : i32, i32
  }
  func.func @transform_4(%arg0: i32) -> (i32, i32, i32, i32) {
    %c0_i32 = arith.constant 0 : i32
    %c0_i32_0 = arith.constant 0 : i32
    %c0_i32_1 = arith.constant 0 : i32
    %c0_i32_2 = arith.constant 0 : i32
    %c0_i32_3 = arith.constant 0 : i32
    return %c0_i32, %c0_i32_0, %c0_i32_1, %c0_i32_2 : i32, i32, i32, i32
  }
  func.func @transform_5(%arg0: i32) -> (i32, i32) {
    %c0_i32 = arith.constant 0 : i32
    %c0_i32_0 = arith.constant 0 : i32
    %c0_i32_1 = arith.constant 0 : i32
    return %c0_i32, %c0_i32_0 : i32, i32
  }
  func.func @transform_6(%arg0: i32) -> (i32, i32) {
    %c0_i32 = arith.constant 0 : i32
    %c0_i32_0 = arith.constant 0 : i32
    %c0_i32_1 = arith.constant 0 : i32
    return %c0_i32, %c0_i32_0 : i32, i32
  }
  func.func @transform_7(%arg0: i32) -> (i32, i32, i32, i32) {
    %c0_i32 = arith.constant 0 : i32
    %c0_i32_0 = arith.constant 0 : i32
    %c0_i32_1 = arith.constant 0 : i32
    %c0_i32_2 = arith.constant 0 : i32
    %c0_i32_3 = arith.constant 0 : i32
    return %c0_i32, %c0_i32_0, %c0_i32_1, %c0_i32_2 : i32, i32, i32, i32
  }
  func.func @transform_8(%arg0: i32) -> (i32, i32) {
    %c0_i32 = arith.constant 0 : i32
    %c0_i32_0 = arith.constant 0 : i32
    %c0_i32_1 = arith.constant 0 : i32
    return %c0_i32, %c0_i32_0 : i32, i32
  }
  func.func @transform_9(%arg0: i32) -> (i32, i32) {
    %c0_i32 = arith.constant 0 : i32
    %c0_i32_0 = arith.constant 0 : i32
    %c0_i32_1 = arith.constant 0 : i32
    return %c0_i32, %c0_i32_0 : i32, i32
  }
  func.func @transform_10(%arg0: i32) -> (i32, i32, i32) {
    %c0_i32 = arith.constant 0 : i32
    %c0_i32_0 = arith.constant 0 : i32
    %c0_i32_1 = arith.constant 0 : i32
    %c0_i32_2 = arith.constant 0 : i32
    return %c0_i32, %c0_i32_0, %c0_i32_1 : i32, i32, i32
  }
}

</mosaic_0001>

<bundles_post_ra>
// kernel: tpu_custom_call.1
= control target key start
LH: loop header
LB: loop body
LE: loop exit
PB: predicated region body
PF: predicated region fallthrough
CT: control target
= control target key end

     0   :  { %vm395_vm0 = vcmask 1043456   ;;  %vm370_vm1 = vcmask 64512   ;;  %vm38_vm2 = vcmask 253952   ;;  %vm48_vm3 = vsmask.f32 256  ;;  %s10263_s2 = inlined_call_operand.vmem [shape: bf16[8,16], index: 2, kind: input, shape index: {}]   ;;  %s10264_s1 = inlined_call_operand.vmem [shape: bf16[128,8], index: 1, kind: input, shape index: {}]   ;;  %s10265_s3 = inlined_call_operand.vmem [shape: f32[1,16], index: 3, kind: input, shape index: {}]   ;;  %s10266_s4 = inlined_call_operand.vmem [shape: bf16[3,3,32,16], index: 4, kind: input, shape index: {}]   ;;  %s10267_s0 = inlined_call_operand.vmem [shape: bf16[2,8,8,16], index: 0, kind: input, shape index: {}]   ;;  %s10268_s7 = inlined_call_operand.vmem [shape: bf16[3,3,16,32], index: 7, kind: input, shape index: {}]   ;;  %s10269_s5 = inlined_call_operand.vmem [shape: f32[1,16], index: 5, kind: input, shape index: {}]   ;;  %s10270_s6 = inlined_call_operand.vmem [shape: f32[1,16], index: 6, kind: input, shape index: {}]   ;;  %s10271_s8 = inlined_call_operand.vmem [shape: f32[1,32], index: 8, kind: input, shape index: {}]   ;;  %s10272_s9 = inlined_call_operand.vmem [shape: f32[1,32], index: 9, kind: input, shape index: {}]   ;;  %s10273_s10 = inlined_call_operand.vmem [shape: f32[2,64,32], index: 10, kind: output, shape index: {}]  }
   0x1   :  { %v322_v0 = vld [vmem:[%s10263_s2] sm:$0xf]  ;;  %v8173_v3 = vld [vmem:[%s10264_s1 + $0x8] sm:$0xff]   ;;  %v8174_v4 = vld [vmem:[%s10264_s1 + $0x10] sm:$0xff]   ;;  %vm110_vm5 = vsmask.f32 7938 }
   0x2   :  { %8168 = vmatprep.subr.msk.bf16.mxu0 %vm395_vm0, %v322_v0  ;;  %v397_v1 = vsel %vm395_vm0, %v322_v0, 0  ;;  %v8172_v2 = vld [vmem:[%s10264_s1] sm:$0xff]   ;;  %8169 = vmatprep.subr.msk.bf16.mxu1 %vm395_vm0, %v322_v0  ;;  %v8177_v6 = vld [vmem:[%s10264_s1 + $0x28] sm:$0xff]   ;;  %v8178_v7 = vld [vmem:[%s10264_s1 + $0x30] sm:$0xff]   ;;  %vm36_vm7 = vcmask 257024   ;;  %v8257_v29 = vmov 0  }
   0x3   :  { %7551 = vmatpush3.bf16.msra.mxu0 %v397_v1  ;;  %7911 = vmatpush3.bf16.msra.mxu1 %v397_v1  ;;  %v8176_v5 = vld [vmem:[%s10264_s1 + $0x20] sm:$0xff]   ;;  %v8175_v8 = vld [vmem:[%s10264_s1 + $0x18] sm:$0xff]   ;;  %vm8351_vm4 = vmand %vm38_vm2, %vm48_vm3  ;;  %37 = vst.msk [vmem:[#allocation2] sm:$0xf] %vm36_vm7, %v8257_v29  ;;  %vm576_vm8 = vcmask 130048   ;;  %vm1236_vm13 = vcmask 261120  }
   0x4   :  { %7552 = vmatprep.mubr.msk.bf16.mxu0 %vm370_vm1, %v8172_v2  ;;  %7560 = vmatprep.mubr.msk.bf16.mxu1 %vm370_vm1, %v8176_v5  ;;  %v8179_v9 = vld [vmem:[%s10264_s1 + $0x38] sm:$0xff]   ;;  %vm8359_vm6 = vmand %vm38_vm2, %vm110_vm5  ;;  %v53_v16 = vld [vmem:[#allocation2 + $0x8] sm:$0x1]  ;;  %39 = vst.msk [vmem:[#allocation2 + $0x4] sm:$0x1] %vm38_vm2, %v8257_v29  ;;  %vm1579_vm14 = vcmask 1042432  }
   0x5   :  { %v59_v10 = vld [vmem:[#allocation2 + $0x18] sm:$0x1]  ;;  %v121_v12 = vld [vmem:[#allocation2 + $0x1c] sm:$0x1]  ;;  %v115_v17 = vld [vmem:[#allocation2 + $0xc] sm:$0x1] }
   0x6   :  { %7553 = vmatmul.mubr.msk.bf16.vlgmr.msra.gmra.mrb[0].mxu0 %vm370_vm1, %v8173_v3  ;;  %7561 = vmatmul.mubr.msk.bf16.vlgmr.msra.gmra.mrb[0].mxu1 %vm370_vm1, %v8177_v6  ;;  %v60_v13 = vsel %vm8351_vm4, 0, %v59_v10  ;;  %v122_v15 = vsel %vm8359_vm6, 0, %v121_v12  ;;  %v54_v18 = vsel %vm8351_vm4, 0, %v53_v16  ;;  %v116_v19 = vsel %vm8359_vm6, 0, %v115_v17  ;;  %v62_v20 = vld [vmem:[#allocation2 + $0x20] sm:$0x1]  ;;  %vm8545_vm11 = vmand %vm36_vm7, %vm110_vm5 }
   0x7   :  { %7556 = vmatprep.mubr.msk.bf16.mxu0 %vm370_vm1, %v8174_v4  ;;  %7564 = vmatprep.mubr.msk.bf16.mxu1 %vm370_vm1, %v8178_v7  ;;  %61 = vst [vmem:[#allocation2 + $0x18] sm:$0x1] %v60_v13  ;;  %123 = vst [vmem:[#allocation2 + $0x1c] sm:$0x1] %v122_v15  ;;  %v124_v21 = vld [vmem:[#allocation2 + $0x24] sm:$0x1] }
   0x8   :  { %55 = vst [vmem:[#allocation2 + $0x8] sm:$0x1] %v54_v18  ;;  %117 = vst [vmem:[#allocation2 + $0xc] sm:$0x1] %v116_v19  ;;  %v63_v22 = vsel %vm8351_vm4, 0, %v62_v20  ;;  %v125_v23 = vsel %vm8359_vm6, 0, %v124_v21 }
   0x9   :  { %v56_v24 = vld [vmem:[#allocation2 + $0x10] sm:$0x1]  ;;  %v118_v25 = vld [vmem:[#allocation2 + $0x14] sm:$0x1]  ;;  %64 = vst [vmem:[#allocation2 + $0x20] sm:$0x1] %v63_v22 }
   0xa   :  { %126 = vst [vmem:[#allocation2 + $0x24] sm:$0x1] %v125_v23  ;;  %v57_v26 = vsel %vm8351_vm4, 0, %v56_v24  ;;  %v119_v27 = vsel %vm8359_vm6, 0, %v118_v25  ;;  %v8380_v28 = vld [vmem:[%s10265_s3] ss:$0 sm:$0xff] }
   0xb   :  { %58 = vst [vmem:[#allocation2 + $0x10] sm:$0x1] %v57_v26  ;;  %120 = vst [vmem:[#allocation2 + $0x14] sm:$0x1] %v119_v27  ;;  %v65_v31 = vld [vmem:[#allocation2 + $0x28] sm:$0x1] }
   0xc   :  { %40 = vst.msk [vmem:[#allocation2 + $0x50] sm:$0xf] %vm36_vm7, %v8257_v29  ;;  %43 = vst.msk [vmem:[#allocation2 + $0x48] sm:$0xf] %vm36_vm7, %v8257_v29  ;;  %v127_v32 = vld [vmem:[#allocation2 + $0x2c] sm:$0x1] }
   0xd   :  { %41 = vst.msk [vmem:[#allocation2 + $0x54] sm:$0x1] %vm38_vm2, %v8257_v29  ;;  %44 = vst.msk [vmem:[#allocation2 + $0x4c] sm:$0x1] %vm38_vm2, %v8257_v29  ;;  %v66_v35 = vsel %vm8351_vm4, 0, %v65_v31  ;;  %v128_v38 = vsel %vm8359_vm6, 0, %v127_v32 }
   0xe   :  { %7557 = vmatmul.mubr.msk.bf16.gmra.mrb[4].mxu0 %vm370_vm1, %v8175_v8  ;;  %7565 = vmatmul.mubr.msk.bf16.gmra.mrb[4].mxu1 %vm370_vm1, %v8179_v9  ;;  %45 = vst.msk [vmem:[#allocation2 + $0x98] sm:$0xf] %vm36_vm7, %v8257_v29  ;;  %67 = vst [vmem:[#allocation2 + $0x28] sm:$0x1] %v66_v35  ;;  %v68_v39 = vld [vmem:[#allocation2 + $0x30] sm:$0x1] }
   0xf   :  { %46 = vst.msk [vmem:[#allocation2 + $0x9c] sm:$0x1] %vm38_vm2, %v8257_v29  ;;  %129 = vst [vmem:[#allocation2 + $0x2c] sm:$0x1] %v128_v38  ;;  %v69_v44 = vsel %vm8351_vm4, 0, %v68_v39  ;;  %s8258_s3 = smov 16  }
  0x10   :  { %v130_v45 = vld [vmem:[#allocation2 + $0x34] sm:$0x1]  ;;  %70 = vst [vmem:[#allocation2 + $0x30] sm:$0x1] %v69_v44  ;;  %v71_v52 = vld [vmem:[#allocation2 + $0x38] sm:$0x1] }
  0x11   :  { %v131_v49 = vsel %vm8359_vm6, 0, %v130_v45  ;;  %v72_v54 = vsel %vm8351_vm4, 0, %v71_v52  ;;  %v133_v55 = vld [vmem:[#allocation2 + $0x3c] sm:$0x1]  ;;  %v83_v59 = vld [vmem:[#allocation2 + $0x58] sm:$0x1] }
  0x12   :  { %132 = vst [vmem:[#allocation2 + $0x34] sm:$0x1] %v131_v49  ;;  %73 = vst [vmem:[#allocation2 + $0x38] sm:$0x1] %v72_v54  ;;  %v134_v58 = vsel %vm8359_vm6, 0, %v133_v55  ;;  %v84_v62 = vsel %vm8351_vm4, 0, %v83_v59 }
  0x13   :  { %v145_v60 = vld [vmem:[#allocation2 + $0x5c] sm:$0x1]  ;;  %135 = vst [vmem:[#allocation2 + $0x3c] sm:$0x1] %v134_v58  ;;  %85 = vst [vmem:[#allocation2 + $0x58] sm:$0x1] %v84_v62 }
  0x14   :  { %v146_v63 = vsel %vm8359_vm6, 0, %v145_v60  ;;  %v86_v5 = vld [vmem:[#allocation2 + $0x60] sm:$0x1]  ;;  %v148_v12 = vld [vmem:[#allocation2 + $0x64] sm:$0x1]  ;;  %v8180_v32 = vld [vmem:[%s10266_s4 + $0x10] sm:$0xff]  }
  0x15   :  { %147 = vst [vmem:[#allocation2 + $0x5c] sm:$0x1] %v146_v63  ;;  %v87_v10 = vsel %vm8351_vm4, 0, %v86_v5  ;;  %v149_v15 = vsel %vm8359_vm6, 0, %v148_v12  ;;  %v89_v16 = vld [vmem:[#allocation2 + $0x68] sm:$0x1]  ;;  %7568 = vmatprep.subr.bf16.mxu1 %v8180_v32 }
  0x16   :  { %88 = vst [vmem:[#allocation2 + $0x60] sm:$0x1] %v87_v10  ;;  %150 = vst [vmem:[#allocation2 + $0x64] sm:$0x1] %v149_v15  ;;  %v90_v20 = vsel %vm8351_vm4, 0, %v89_v16  ;;  %7569 = vmatpush3.bf16.msra.mxu1 %v8180_v32  ;;  %vm1580_vm15 = vcmask 1046532  }
  0x17   :  { %v151_v21 = vld [vmem:[#allocation2 + $0x6c] sm:$0x1]  ;;  %91 = vst [vmem:[#allocation2 + $0x68] sm:$0x1] %v90_v20  ;;  %v92_v23 = vld [vmem:[#allocation2 + $0x70] sm:$0x1]  ;;  %vm8830_vm0 = vmor %vm1579_vm14, %vm1580_vm15 }
  0x18   :  { %v152_v22 = vsel %vm8359_vm6, 0, %v151_v21  ;;  %v93_v26 = vsel %vm8351_vm4, 0, %v92_v23  ;;  %v154_v27 = vld [vmem:[#allocation2 + $0x74] sm:$0x1]  ;;  %v157_v35 = vld [vmem:[#allocation2 + $0x7c] sm:$0x1] }
  0x19   :  { %153 = vst [vmem:[#allocation2 + $0x6c] sm:$0x1] %v152_v22  ;;  %94 = vst [vmem:[#allocation2 + $0x70] sm:$0x1] %v93_v26  ;;  %v158_v39 = vsel %vm8359_vm6, 0, %v157_v35  ;;  %vm172_vm1 = vcmask 125952  }
  0x1a   :  { %159 = vst [vmem:[#allocation2 + $0x7c] sm:$0x1] %v158_v39  ;;  %v101_v49 = vld [vmem:[#allocation2 + $0x88] sm:$0x1]  ;;  %v74_v55 = vld [vmem:[#allocation2 + $0x40] sm:$0x1] }
  0x1b   :  { %v104_v60 = vld [vmem:[#allocation2 + $0x90] sm:$0x1]  ;;  %v142_v10 = vld [vmem:[#allocation2 + $0x54] sm:$0x1]  ;;  %v498_v22 = vld [vmem:[%s10267_s0 + $0x8] sm:$0xf] }
  0x1c   :  { %v143_v12 = vsel %vm8359_vm6, 0, %v142_v10  ;;  %v496_v23 = vld [vmem:[%s10267_s0] sm:$0xf]  ;;  %vm968_vm9 = vsmask.f32 3328  ;;  %vm174_vm2 = vcmask 122880  }
  0x1d   :  { %144 = vst [vmem:[#allocation2 + $0x54] sm:$0x1] %v143_v12  ;;  %vm969_vm10 = vsmask.f32 7440  ;;  %v854_v12 = vld [vmem:[#allocation2 + $0x20] sm:$0xf] }
  0x1e   :  { %vm8577_vm12 = vmor %vm968_vm9, %vm969_vm10  ;;  %173 = vst.msk [vmem:[#allocation3] sm:$0xf] %vm172_vm1, %v8257_v29 }
  0x1f   :  { %175 = vst.msk [vmem:[#allocation3 + $0x4] sm:$0x1] %vm174_vm2, %v8257_v29  ;;  %177 = vst.msk [vmem:[#allocation3 + $0x54] sm:$0x1] %vm174_vm2, %v8257_v29 }
  0x20   :  { %176 = vst.msk [vmem:[#allocation3 + $0x50] sm:$0xf] %vm172_vm1, %v8257_v29  ;;  %179 = vst.msk [vmem:[#allocation3 + $0x48] sm:$0xf] %vm172_vm1, %v8257_v29 }
  0x21   :  { %180 = vst.msk [vmem:[#allocation3 + $0x4c] sm:$0x1] %vm174_vm2, %v8257_v29  ;;  %182 = vst.msk [vmem:[#allocation3 + $0x9c] sm:$0x1] %vm174_vm2, %v8257_v29 }
  0x22   :  { %181 = vst.msk [vmem:[#allocation3 + $0x98] sm:$0xf] %vm172_vm1, %v8257_v29 }
  0xd9   :  { %v7554_v30 = vpop.f32.mrb[0].mxu0  ;;  %v8405_v43 = vpop.f32.mrb[0].mxu1 }
  0xda   :  { %v442_v33 = vadd.f32 %v7554_v30, %v8380_v28  ;;  %v433_v34 = vpop.f32.mrb[1].mxu0  ;;  %v465_v48 = vpop.f32.mrb[1].mxu1  ;;  %v474_v30 = vadd.f32 %v8405_v43, %v8380_v28 }
  0xdb   :  { %v434_v36 = vadd.f32 %v8380_v28, %v433_v34  ;;  %v7555_v37 = vpop.f32.mrb[2].mxu0  ;;  %v8413_v50 = vpop.f32.mrb[2].mxu1  ;;  %v466_v3 = vadd.f32 %v8380_v28, %v465_v48  ;;  %v95_v34 = vld [vmem:[#allocation2 + $0x78] sm:$0x1] }
  0xdc   :  { %v514_v40 = vpack.c.bf16 %v442_v33, %v442_v33  ;;  %v445_v41 = vadd.f32 %v7555_v37, %v8380_v28  ;;  %v436_v42 = vpop.f32.mrb[3].mxu0  ;;  %v468_v51 = vpop.f32.mrb[3].mxu1  ;;  %v155_v33 = vsel %vm8359_vm6, 0, %v154_v27  ;;  %v96_v38 = vsel %vm8351_vm4, 0, %v95_v34  ;;  %v8181_v48 = vld [vmem:[%s10266_s4 + $0x18] sm:$0xff]  }
  0xdd   :  { %v512_v46 = vpack.c.bf16 %v434_v36, %v434_v36  ;;  %v437_v47 = vadd.f32 %v8380_v28, %v436_v42  ;;  %v469_v18 = vadd.f32 %v8380_v28, %v468_v51  ;;  %v520_v25 = vpack.c.bf16 %v466_v3, %v466_v3  ;;  %156 = vst [vmem:[#allocation2 + $0x74] sm:$0x1] %v155_v33  ;;  %v160_v42 = vld [vmem:[#allocation2 + $0x84] sm:$0x1]  ;;  %v163_v51 = vld [vmem:[#allocation2 + $0x8c] sm:$0x1] }
  0xde   :  { %548 = vrot.lane.b32.xlu1 %v514_v40, %s8258_s3  ;;  %v515_v53 = vpack.c.bf16 %v445_v41, %v445_v41  ;;  %v477_v36 = vadd.f32 %v8413_v50, %v8380_v28  ;;  %v98_v40 = vld [vmem:[#allocation2 + $0x80] sm:$0x1]  ;;  %97 = vst [vmem:[#allocation2 + $0x78] sm:$0x1] %v96_v38  ;;  %v522_v43 = vpack.c.bf16 %v474_v30, %v474_v30  ;;  %v161_v45 = vsel %vm8359_vm6, 0, %v160_v42 }
  0xdf   :  { %544 = vrot.lane.b32.xlu0 %v512_v46, %s8258_s3  ;;  %v513_v56 = vpack.c.bf16 %v437_v47, %v437_v47  ;;  %v521_v31 = vpack.c.bf16 %v469_v18, %v469_v18  ;;  %v99_v41 = vsel %vm8351_vm4, 0, %v98_v40  ;;  %162 = vst [vmem:[#allocation2 + $0x84] sm:$0x1] %v161_v45  ;;  %v102_v50 = vsel %vm8351_vm4, 0, %v101_v49  ;;  %7570 = vmatprep.subr.bf16.mxu1 %v8181_v48  ;;  %v112_v3 = vld [vmem:[#allocation2 + $0x4] sm:$0x1] }
  0xe0   :  { %100 = vst [vmem:[#allocation2 + $0x80] sm:$0x1] %v99_v41  ;;  %v523_v46 = vpack.c.bf16 %v477_v36, %v477_v36  ;;  %103 = vst [vmem:[#allocation2 + $0x88] sm:$0x1] %v102_v50  ;;  %v164_v54 = vsel %vm8359_vm6, 0, %v163_v51  ;;  %7571 = vmatpush3.bf16.msra.mxu1 %v8181_v48 }
  0xe1   :  { %v7558_v57 = vpop.f32.mrb[4].mxu0  ;;  %v8430_v4 = vpop.f32.mrb[4].mxu1  ;;  %165 = vst [vmem:[#allocation2 + $0x8c] sm:$0x1] %v164_v54  ;;  %v499_v36 = vld [vmem:[%s10267_s0 + $0xc] sm:$0xf] }
  0xe2   :  { %550 = vrot.lane.b32.xlu1 %v515_v53, %s8258_s3  ;;  %v449_v61 = vpop.f32.mrb[5].mxu0  ;;  %v458_v6 = vadd.f32 %v7558_v57, %v8380_v28  ;;  %v481_v9 = vpop.f32.mrb[5].mxu1  ;;  %v490_v52 = vadd.f32 %v8430_v4, %v8380_v28  ;;  %v136_v57 = vld [vmem:[#allocation2 + $0x44] sm:$0x1]  ;;  %v851_v50 = vld [vmem:[#allocation2 + $0x1c] sm:$0x1] }
  0xe3   :  { %v450_v0 = vadd.f32 %v8380_v28, %v449_v61  ;;  %v8426_v1 = vpop.f32.mrb[6].mxu0  ;;  %546 = vrot.lane.b32.xlu0 %v513_v56, %s8258_s3  ;;  %v8436_v13 = vpop.f32.mrb[6].mxu1  ;;  %v482_v37 = vadd.f32 %v8380_v28, %v481_v9  ;;  %v75_v56 = vsel %vm8351_vm4, 0, %v74_v55  ;;  %v137_v59 = vsel %vm8359_vm6, 0, %v136_v57  ;;  %v166_v61 = vld [vmem:[#allocation2 + $0x94] sm:$0x1] }
  0xe4   :  { %v452_v2 = vpop.f32.mrb[7].mxu0  ;;  %v484_v19 = vpop.f32.mrb[7].mxu1  ;;  %v518_v24 = vpack.c.bf16 %v458_v6, %v458_v6  ;;  %v461_v58 = vadd.f32 %v8426_v1, %v8380_v28  ;;  %76 = vst [vmem:[#allocation2 + $0x40] sm:$0x1] %v75_v56  ;;  %138 = vst [vmem:[#allocation2 + $0x44] sm:$0x1] %v137_v59  ;;  %v526_v62 = vpack.c.bf16 %v490_v52, %v490_v52 }
  0xe5   :  { %v516_v7 = vpack.c.bf16 %v450_v0, %v450_v0  ;;  %v453_v8 = vadd.f32 %v8380_v28, %v452_v2  ;;  %v485_v44 = vadd.f32 %v8380_v28, %v484_v19  ;;  %v524_v47 = vpack.c.bf16 %v482_v37, %v482_v37  ;;  %v50_v2 = vld [vmem:[#allocation2] sm:$0x1]  ;;  %v497_v38 = vld [vmem:[%s10267_s0 + $0x4] sm:$0xf] }
  0xe6   :  { %v493_v63 = vadd.f32 %v8436_v13, %v8380_v28  ;;  %v105_v0 = vsel %vm8351_vm4, 0, %v104_v60  ;;  %v167_v1 = vsel %vm8359_vm6, 0, %v166_v61  ;;  %v519_v4 = vpack.c.bf16 %v461_v58, %v461_v58  ;;  %v500_v60 = vld [vmem:[%s10267_s0 + $0x10] sm:$0xf] }
  0xe7   :  { %v517_v17 = vpack.c.bf16 %v453_v8, %v453_v8  ;;  %552 = vrot.lane.b32.xlu0 %v516_v7, %s8258_s3  ;;  %v525_v53 = vpack.c.bf16 %v485_v44, %v485_v44  ;;  %106 = vst [vmem:[#allocation2 + $0x90] sm:$0x1] %v105_v0  ;;  %168 = vst [vmem:[#allocation2 + $0x94] sm:$0x1] %v167_v1  ;;  %v51_v5 = vsel %vm8351_vm4, 0, %v50_v2  ;;  %v113_v28 = vsel %vm8359_vm6, 0, %v112_v3 }
  0xe8   :  { %52 = vst [vmem:[#allocation2] sm:$0x1] %v51_v5  ;;  %114 = vst [vmem:[#allocation2 + $0x4] sm:$0x1] %v113_v28  ;;  %v527_v6 = vpack.c.bf16 %v493_v63, %v493_v63  ;;  %v8506_v7 = vld [vmem:[%s10266_s4] sm:$0xff]  }
  0xe9   :  { %554 = vrot.lane.b32.xlu1 %v517_v17, %s8258_s3  ;;  %v80_v8 = vld [vmem:[#allocation2 + $0x50] sm:$0x1]  ;;  %7588 = vmatprep.subr.bf16.mxu1 %v8506_v7  ;;  %v848_v44 = vld [vmem:[#allocation2 + $0x18] sm:$0xf]  ;;  %v839_v0 = vld [vmem:[#allocation2 + $0xc] sm:$0x1] }
  0xea   :  { %v81_v9 = vsel %vm8351_vm4, 0, %v80_v8  ;;  %v501_v8 = vld [vmem:[%s10267_s0 + $0x14] sm:$0xf] }
  0xeb   :  { %556 = vrot.lane.b32.xlu0 %v518_v24, %s8258_s3  ;;  %82 = vst [vmem:[#allocation2 + $0x50] sm:$0x1] %v81_v9 }
  0xed   :  { %560 = vrot.lane.b32.xlu1 %v520_v25, %s8258_s3 }
  0xef   :  { %562 = vrot.lane.b32.xlu0 %v521_v31, %s8258_s3  ;;  %v8513_v13 = vld [vmem:[#allocation2] sm:$0xf]  ;;  %v8523_v24 = vld [vmem:[#allocation2 + $0x4] sm:$0x1] }
  0xf0   :  { %v972_v16 = vshrl.u32 %v8513_v13, 16  ;;  %v975_v17 = vshll.u32 %v8513_v13, 16  ;;  %v981_v30 = vshll.u32 %v8523_v24, 16 }
  0xf1   :  { %564 = vrot.lane.b32.xlu1 %v522_v43, %s8258_s3  ;;  %v8536_v43 = vld [vmem:[#allocation2 + $0x54] sm:$0x1] }
  0xf2   :  { %v940_v15 = vld [vmem:[#allocation2 + $0x50] sm:$0xf]  ;;  %v974_v20 = vrot.slane %v972_v16, 4  ;;  %v977_v21 = vrot.slane %v975_v17, 5  ;;  %v8534_v42 = vrot.slane %v981_v30, 5  ;;  %v1093_v49 = vshll.u32 %v8536_v43, 16 }
  0xf3   :  { %566 = vrot.lane.b32.xlu0 %v523_v46, %s8258_s3  ;;  %v1084_v18 = vshrl.u32 %v940_v15, 16  ;;  %v1087_v19 = vshll.u32 %v940_v15, 16  ;;  %v845_v30 = vld [vmem:[#allocation2 + $0x14] sm:$0x1] }
  0xf4   :  { %v978_v33 = vor.u32 %v977_v21, %v974_v20 }
  0xf5   :  { %568 = vrot.lane.b32.xlu1 %v524_v47, %s8258_s3  ;;  %v1086_v25 = vrot.slane %v1084_v18, 4  ;;  %v1089_v26 = vrot.slane %v1087_v19, 5  ;;  %v857_v19 = vld [vmem:[#allocation2 + $0x24] sm:$0x1] }
  0xf6   :  { %v8539_v48 = vrot.slane %v978_v33, 4 }
  0xf7   :  { %570 = vrot.lane.b32.xlu0 %v525_v53, %s8258_s3  ;;  %v1090_v39 = vor.u32 %v1089_v26, %v1086_v25  ;;  %v836_v53 = vld [vmem:[#allocation2 + $0x8] sm:$0xf] }
  0xf9   :  { %572 = vrot.lane.b32.xlu1 %v526_v62, %s8258_s3  ;;  %v8552_v61 = vrot.slane %v1090_v39, 4 }
  0xfb   :  { %558 = vrot.lane.b32.xlu0 %v519_v4, %s8258_s3 }
  0xfd   :  { %574 = vrot.lane.b32.xlu1 %v527_v6, %s8258_s3 }
 0x150   :  { %v549_v27 = vpop.permute.xlu1 %548 }
 0x151   :  { %v585_v31 = vsel %vm576_vm8, %v498_v22, %v549_v27  ;;  %v545_v32 = vpop.permute.xlu0 %544  ;;  %v842_v27 = vld [vmem:[#allocation2 + $0x10] sm:$0xf] }
 0x152   :  { %v6861_v34 = vcombine.low %v585_v31, %v585_v31  ;;  %v579_v35 = vsel %vm576_vm8, %v496_v23, %v545_v32  ;;  %v502_v23 = vld [vmem:[%s10267_s0 + $0x18] sm:$0xf]  ;;  %v8570_v32 = vrot.slane %v1093_v49, 5 }
 0x153   :  { %v6859_v37 = vcombine.low %v579_v35, %v579_v35 }
 0x154   :  { %v690_v40 = vshrl.u32 %v6861_v34, 16  ;;  %v551_v41 = vpop.permute.xlu1 %550  ;;  %v693_v52 = vshll.u32 %v6861_v34, 16 }
 0x155   :  { %v674_v45 = vshrl.u32 %v6859_v37, 16  ;;  %v588_v46 = vsel %vm576_vm8, %v499_v36, %v551_v41  ;;  %v547_v47 = vpop.permute.xlu0 %546  ;;  %v677_v58 = vshll.u32 %v6859_v37, 16 }
 0x156   :  { %v692_v51 = vrot.slane %v690_v40, 7  ;;  %v6862_v54 = vcombine.low %v588_v46, %v588_v46  ;;  %v582_v55 = vsel %vm576_vm8, %v497_v38, %v547_v47  ;;  %v504_v38 = vld [vmem:[%s10267_s0 + $0x20] sm:$0xf] }
 0x157   :  { %v676_v57 = vrot.slane %v674_v45, 7  ;;  %v6860_v59 = vcombine.low %v582_v55, %v582_v55 }
 0x158   :  { %v695_v62 = vor.u32 %v693_v52, %v692_v51  ;;  %v696_v63 = vrot.slane %v692_v51, 4  ;;  %v698_v1 = vshrl.u32 %v6862_v54, 16  ;;  %v701_v2 = vshll.u32 %v6862_v54, 16  ;;  %v505_v52 = vld [vmem:[%s10267_s0 + $0x24] sm:$0xf] }
 0x159   :  { %v679_v3 = vor.u32 %v677_v58, %v676_v57  ;;  %v680_v4 = vrot.slane %v676_v57, 4  ;;  %v682_v5 = vshrl.u32 %v6860_v59, 16  ;;  %v685_v28 = vshll.u32 %v6860_v59, 16  ;;  %v553_v6 = vpop.permute.xlu0 %552  ;;  %v863_v54 = vld [vmem:[#allocation2 + $0x2c] sm:$0x1] }
 0x15a   :  { %v849_v9 = vsel %vm8545_vm11, %v695_v62, %v848_v44  ;;  %v852_v10 = vsel %vm8351_vm4, %v696_v63, %v851_v50  ;;  %v700_v15 = vrot.slane %v698_v1, 7  ;;  %v591_v16 = vsel %vm576_vm8, %v500_v60, %v553_v6  ;;  %v866_v63 = vld [vmem:[#allocation2 + $0x30] sm:$0xf] }
 0x15b   :  { %850 = vst [vmem:[#allocation2 + $0x18] sm:$0xf] %v849_v9  ;;  %853 = vst [vmem:[#allocation2 + $0x1c] sm:$0x1] %v852_v10  ;;  %v837_v17 = vsel %vm8545_vm11, %v679_v3, %v836_v53  ;;  %v840_v18 = vsel %vm8351_vm4, %v680_v4, %v839_v0  ;;  %v684_v20 = vrot.slane %v682_v5, 7  ;;  %v6863_v21 = vcombine.low %v591_v16, %v591_v16  ;;  %v555_v22 = vpop.permute.xlu1 %554 }
 0x15c   :  { %838 = vst [vmem:[#allocation2 + $0x8] sm:$0xf] %v837_v17  ;;  %841 = vst [vmem:[#allocation2 + $0xc] sm:$0x1] %v840_v18  ;;  %v703_v25 = vor.u32 %v701_v2, %v700_v15  ;;  %v704_v26 = vrot.slane %v700_v15, 4  ;;  %v594_v31 = vsel %vm576_vm8, %v501_v8, %v555_v22  ;;  %v984_v58 = vsel %vm8577_vm12, %v8539_v48, %v8534_v42 }
 0x15d   :  { %v687_v33 = vor.u32 %v685_v28, %v684_v20  ;;  %v688_v34 = vrot.slane %v684_v20, 4  ;;  %v706_v35 = vshrl.u32 %v6863_v21, 16  ;;  %v709_v36 = vshll.u32 %v6863_v21, 16  ;;  %v557_v37 = vpop.permute.xlu0 %556  ;;  %v860_v53 = vld [vmem:[#allocation2 + $0x28] sm:$0xf] }
 0x15e   :  { %v855_v40 = vsel %vm8545_vm11, %v703_v25, %v854_v12  ;;  %v858_v41 = vsel %vm8351_vm4, %v704_v26, %v857_v19  ;;  %v6864_v44 = vcombine.low %v594_v31, %v594_v31  ;;  %v597_v45 = vsel %vm576_vm8, %v502_v23, %v557_v37  ;;  %v869_v3 = vld [vmem:[#allocation2 + $0x34] sm:$0x1]  ;;  %v506_v8 = vld [vmem:[%s10267_s0 + $0x28] sm:$0xf]  ;;  %v872_v12 = vld [vmem:[#allocation2 + $0x38] sm:$0xf] }
 0x15f   :  { %856 = vst [vmem:[#allocation2 + $0x20] sm:$0xf] %v855_v40  ;;  %859 = vst [vmem:[#allocation2 + $0x24] sm:$0x1] %v858_v41  ;;  %v843_v46 = vsel %vm8545_vm11, %v687_v33, %v842_v27  ;;  %v846_v47 = vsel %vm8351_vm4, %v688_v34, %v845_v30  ;;  %v708_v49 = vrot.slane %v706_v35, 7  ;;  %v6865_v50 = vcombine.low %v597_v45, %v597_v45  ;;  %v561_v51 = vpop.permute.xlu1 %560 }
 0x160   :  { %844 = vst [vmem:[#allocation2 + $0x10] sm:$0xf] %v843_v46  ;;  %847 = vst [vmem:[#allocation2 + $0x14] sm:$0x1] %v846_v47  ;;  %v714_v55 = vshrl.u32 %v6864_v44, 16  ;;  %v603_v57 = vsel %vm576_vm8, %v504_v38, %v561_v51  ;;  %v1096_v59 = vsel %vm8577_vm12, %v8552_v61, %v8570_v32  ;;  %v717_v0 = vshll.u32 %v6864_v44, 16 }
 0x161   :  { %v711_v60 = vor.u32 %v709_v36, %v708_v49  ;;  %v712_v62 = vrot.slane %v708_v49, 4  ;;  %v722_v1 = vshrl.u32 %v6865_v50, 16  ;;  %v563_v2 = vpop.permute.xlu0 %562  ;;  %v725_v5 = vshll.u32 %v6865_v50, 16  ;;  %v875_v15 = vld [vmem:[#allocation2 + $0x3c] sm:$0x1] }
 0x162   :  { %v716_v4 = vrot.slane %v714_v55, 7  ;;  %v6867_v28 = vcombine.low %v603_v57, %v603_v57  ;;  %v606_v6 = vsel %vm576_vm8, %v505_v52, %v563_v2  ;;  %v507_v23 = vld [vmem:[%s10267_s0 + $0x2c] sm:$0xf]  ;;  %v508_v33 = vld [vmem:[%s10267_s0 + $0x30] sm:$0xf] }
 0x163   :  { %v861_v9 = vsel %vm8545_vm11, %v711_v60, %v860_v53  ;;  %v864_v10 = vsel %vm8351_vm4, %v712_v62, %v863_v54  ;;  %v724_v16 = vrot.slane %v722_v1, 7  ;;  %v6868_v17 = vcombine.low %v606_v6, %v606_v6  ;;  %v565_v18 = vpop.permute.xlu1 %564  ;;  %v884_v36 = vld [vmem:[#allocation2 + $0x58] sm:$0xf]  ;;  %v887_v44 = vld [vmem:[#allocation2 + $0x5c] sm:$0x1] }
 0x164   :  { %862 = vst [vmem:[#allocation2 + $0x28] sm:$0xf] %v861_v9  ;;  %865 = vst [vmem:[#allocation2 + $0x2c] sm:$0x1] %v864_v10  ;;  %v719_v19 = vor.u32 %v717_v0, %v716_v4  ;;  %v720_v20 = vrot.slane %v716_v4, 4  ;;  %v738_v21 = vshrl.u32 %v6867_v28, 16  ;;  %v609_v38 = vsel %vm576_vm8, %v506_v8, %v565_v18 }
 0x165   :  { %v741_v22 = vshll.u32 %v6867_v28, 16  ;;  %v727_v25 = vor.u32 %v725_v5, %v724_v16  ;;  %v728_v26 = vrot.slane %v724_v16, 4  ;;  %v746_v27 = vshrl.u32 %v6868_v17, 16  ;;  %v567_v31 = vpop.permute.xlu0 %566  ;;  %v890_v45 = vld [vmem:[#allocation2 + $0x60] sm:$0xf] }
 0x166   :  { %v749_v30 = vshll.u32 %v6868_v17, 16  ;;  %v867_v34 = vsel %vm8545_vm11, %v719_v19, %v866_v63  ;;  %v870_v35 = vsel %vm8351_vm4, %v720_v20, %v869_v3  ;;  %v740_v37 = vrot.slane %v738_v21, 7  ;;  %v893_v52 = vld [vmem:[#allocation2 + $0x64] sm:$0x1]  ;;  %v509_v55 = vld [vmem:[%s10267_s0 + $0x34] sm:$0xf] }
 0x167   :  { %868 = vst [vmem:[#allocation2 + $0x30] sm:$0xf] %v867_v34  ;;  %871 = vst [vmem:[#allocation2 + $0x34] sm:$0x1] %v870_v35  ;;  %v873_v40 = vsel %vm8545_vm11, %v727_v25, %v872_v12  ;;  %v876_v41 = vsel %vm8351_vm4, %v728_v26, %v875_v15  ;;  %v748_v46 = vrot.slane %v746_v27, 7  ;;  %v6869_v47 = vcombine.low %v609_v38, %v609_v38  ;;  %v569_v49 = vpop.permute.xlu1 %568 }
 0x168   :  { %874 = vst [vmem:[#allocation2 + $0x38] sm:$0xf] %v873_v40  ;;  %877 = vst [vmem:[#allocation2 + $0x3c] sm:$0x1] %v876_v41  ;;  %v743_v50 = vor.u32 %v741_v22, %v740_v37  ;;  %v744_v51 = vrot.slane %v740_v37, 4  ;;  %v612_v53 = vsel %vm576_vm8, %v507_v23, %v567_v31  ;;  %v615_v54 = vsel %vm576_vm8, %v508_v33, %v569_v49 }
 0x169   :  { %v751_v57 = vor.u32 %v749_v30, %v748_v46  ;;  %v752_v60 = vrot.slane %v748_v46, 4  ;;  %v754_v62 = vshrl.u32 %v6869_v47, 16  ;;  %v757_v63 = vshll.u32 %v6869_v47, 16  ;;  %v571_v0 = vpop.permute.xlu0 %570  ;;  %v510_v5 = vld [vmem:[%s10267_s0 + $0x38] sm:$0xf] }
 0x16a   :  { %v885_v1 = vsel %vm8545_vm11, %v743_v50, %v884_v36  ;;  %v888_v2 = vsel %vm8351_vm4, %v744_v51, %v887_v44  ;;  %v6870_v3 = vcombine.low %v612_v53, %v612_v53  ;;  %v6871_v4 = vcombine.low %v615_v54, %v615_v54  ;;  %v896_v8 = vld [vmem:[#allocation2 + $0x68] sm:$0xf]  ;;  %v503_v15 = vld [vmem:[%s10267_s0 + $0x1c] sm:$0xf]  ;;  %v899_v16 = vld [vmem:[#allocation2 + $0x6c] sm:$0x1] }
 0x16b   :  { %886 = vst [vmem:[#allocation2 + $0x58] sm:$0xf] %v885_v1  ;;  %889 = vst [vmem:[#allocation2 + $0x5c] sm:$0x1] %v888_v2  ;;  %v891_v28 = vsel %vm8545_vm11, %v751_v57, %v890_v45  ;;  %v894_v6 = vsel %vm8351_vm4, %v752_v60, %v893_v52  ;;  %v756_v9 = vrot.slane %v754_v62, 7  ;;  %v618_v10 = vsel %vm576_vm8, %v509_v55, %v571_v0  ;;  %v573_v12 = vpop.permute.xlu1 %572 }
 0x16c   :  { %892 = vst [vmem:[#allocation2 + $0x60] sm:$0xf] %v891_v28  ;;  %895 = vst [vmem:[#allocation2 + $0x64] sm:$0x1] %v894_v6  ;;  %v762_v17 = vshrl.u32 %v6870_v3, 16  ;;  %v765_v18 = vshll.u32 %v6870_v3, 16  ;;  %v6872_v23 = vcombine.low %v618_v10, %v618_v10  ;;  %v621_v25 = vsel %vm576_vm8, %v510_v5, %v573_v12 }
 0x16d   :  { %v770_v19 = vshrl.u32 %v6871_v4, 16  ;;  %v773_v20 = vshll.u32 %v6871_v4, 16  ;;  %v759_v21 = vor.u32 %v757_v63, %v756_v9  ;;  %v760_v22 = vrot.slane %v756_v9, 4  ;;  %v559_v26 = vpop.permute.xlu0 %558  ;;  %v902_v27 = vld [vmem:[#allocation2 + $0x70] sm:$0xf] }
 0x16e   :  { %v905_v30 = vld [vmem:[#allocation2 + $0x74] sm:$0x1]  ;;  %v764_v31 = vrot.slane %v762_v17, 7  ;;  %v6873_v34 = vcombine.low %v621_v25, %v621_v25  ;;  %v600_v35 = vsel %vm576_vm8, %v503_v15, %v559_v26  ;;  %v908_v38 = vld [vmem:[#allocation2 + $0x78] sm:$0xf]  ;;  %v778_v41 = vshrl.u32 %v6872_v23, 16 }
 0x16f   :  { %v772_v33 = vrot.slane %v770_v19, 7  ;;  %v897_v36 = vsel %vm8545_vm11, %v759_v21, %v896_v8  ;;  %v900_v37 = vsel %vm8351_vm4, %v760_v22, %v899_v16  ;;  %v911_v40 = vld [vmem:[#allocation2 + $0x7c] sm:$0x1]  ;;  %v781_v44 = vshll.u32 %v6872_v23, 16  ;;  %v914_v50 = vld [vmem:[#allocation2 + $0x80] sm:$0xf]  ;;  %v575_v60 = vpop.permute.xlu1 %574 }
 0x170   :  { %898 = vst [vmem:[#allocation2 + $0x68] sm:$0xf] %v897_v36  ;;  %901 = vst [vmem:[#allocation2 + $0x6c] sm:$0x1] %v900_v37  ;;  %v767_v45 = vor.u32 %v765_v18, %v764_v31  ;;  %v768_v46 = vrot.slane %v764_v31, 4  ;;  %v780_v53 = vrot.slane %v778_v41, 7  ;;  %v6866_v57 = vcombine.low %v600_v35, %v600_v35 }
 0x171   :  { %v775_v47 = vor.u32 %v773_v20, %v772_v33  ;;  %v776_v49 = vrot.slane %v772_v33, 4  ;;  %v511_v51 = vld [vmem:[%s10267_s0 + $0x3c] sm:$0xf]  ;;  %v8654_v52 = vld [vmem:[#allocation2 + $0x8] sm:$0xf]  ;;  %v786_v54 = vshrl.u32 %v6873_v34, 16 }
 0x172   :  { %v789_v55 = vshll.u32 %v6873_v34, 16  ;;  %v903_v62 = vsel %vm8545_vm11, %v767_v45, %v902_v27  ;;  %v906_v63 = vsel %vm8351_vm4, %v768_v46, %v905_v30  ;;  %v917_v2 = vld [vmem:[#allocation2 + $0x84] sm:$0x1]  ;;  %v920_v3 = vld [vmem:[#allocation2 + $0x88] sm:$0xf]  ;;  %v783_v5 = vor.u32 %v781_v44, %v780_v53 }
 0x173   :  { %v909_v0 = vsel %vm8545_vm11, %v775_v47, %v908_v38  ;;  %v912_v1 = vsel %vm8351_vm4, %v776_v49, %v911_v40  ;;  %v923_v4 = vld [vmem:[#allocation2 + $0x8c] sm:$0x1]  ;;  %904 = vst [vmem:[#allocation2 + $0x70] sm:$0xf] %v903_v62  ;;  %907 = vst [vmem:[#allocation2 + $0x74] sm:$0x1] %v906_v63  ;;  %v624_v12 = vsel %vm576_vm8, %v511_v51, %v575_v60 }
 0x174   :  { %910 = vst [vmem:[#allocation2 + $0x78] sm:$0xf] %v909_v0  ;;  %913 = vst [vmem:[#allocation2 + $0x7c] sm:$0x1] %v912_v1  ;;  %v784_v28 = vrot.slane %v780_v53, 4  ;;  %v788_v6 = vrot.slane %v786_v54, 7  ;;  %v915_v18 = vsel %vm8545_vm11, %v783_v5, %v914_v50  ;;  %v6874_v26 = vcombine.low %v624_v12, %v624_v12 }
 0x175   :  { %v730_v8 = vshrl.u32 %v6866_v57, 16  ;;  %v8664_v9 = vld [vmem:[#allocation2 + $0xc] sm:$0x1]  ;;  %v733_v10 = vshll.u32 %v6866_v57, 16  ;;  %v986_v15 = vshrl.u32 %v8654_v52, 16  ;;  %v989_v16 = vshll.u32 %v8654_v52, 16 }
 0x176   :  { %v8669_v17 = vld [vmem:[#allocation2 + $0x10] sm:$0xf]  ;;  %v918_v19 = vsel %vm8351_vm4, %v784_v28, %v917_v2  ;;  %v791_v20 = vor.u32 %v789_v55, %v788_v6  ;;  %v792_v21 = vrot.slane %v788_v6, 4  ;;  %v878_v22 = vld [vmem:[#allocation2 + $0x40] sm:$0xf]  ;;  %v995_v34 = vshll.u32 %v8664_v9, 16 }
 0x177   :  { %916 = vst [vmem:[#allocation2 + $0x80] sm:$0xf] %v915_v18  ;;  %919 = vst [vmem:[#allocation2 + $0x84] sm:$0x1] %v918_v19  ;;  %v881_v23 = vld [vmem:[#allocation2 + $0x44] sm:$0x1] }
 0x178   :  { %v732_v25 = vrot.slane %v730_v8, 7  ;;  %v988_v27 = vrot.slane %v986_v15, 4  ;;  %v991_v30 = vrot.slane %v989_v16, 5  ;;  %v921_v31 = vsel %vm8545_vm11, %v791_v20, %v920_v3  ;;  %v8680_v35 = vld [vmem:[#allocation2 + $0x18] sm:$0xf] }
 0x179   :  { %v924_v33 = vsel %vm8351_vm4, %v792_v21, %v923_v4  ;;  %v8682_v36 = vld [vmem:[#allocation2 + $0x14] sm:$0x1]  ;;  %v1000_v37 = vshrl.u32 %v8669_v17, 16  ;;  %v8685_v38 = vld [vmem:[#allocation2] sm:$0xe]  ;;  %v794_v44 = vshrl.u32 %v6874_v26, 16 }
 0x17a   :  { %922 = vst [vmem:[#allocation2 + $0x88] sm:$0xf] %v921_v31  ;;  %925 = vst [vmem:[#allocation2 + $0x8c] sm:$0x1] %v924_v33  ;;  %v735_v40 = vor.u32 %v733_v10, %v732_v25  ;;  %v736_v41 = vrot.slane %v732_v25, 4  ;;  %v797_v45 = vshll.u32 %v6874_v26, 16  ;;  %v992_v47 = vor.u32 %v991_v30, %v988_v27 }
 0x17b   :  { %v8687_v46 = vld [vmem:[#allocation2 + $0x1c] sm:$0x1]  ;;  %v997_v49 = vrot.slane %v995_v34, 5  ;;  %v1002_v50 = vrot.slane %v1000_v37, 4  ;;  %v1003_v51 = vshll.u32 %v8669_v17, 16  ;;  %v796_v57 = vrot.slane %v794_v44, 7 }
 0x17c   :  { %v879_v53 = vsel %vm8545_vm11, %v735_v40, %v878_v22  ;;  %v882_v54 = vsel %vm8351_vm4, %v736_v41, %v881_v23  ;;  %v926_v55 = vld [vmem:[#allocation2 + $0x90] sm:$0xf]  ;;  %v1009_v60 = vshll.u32 %v8682_v36, 16  ;;  %v929_v62 = vld [vmem:[#allocation2 + $0x94] sm:$0x1]  ;;  %v993_v63 = vrot.slane %v992_v47, 4 }
 0x17d   :  { %880 = vst [vmem:[#allocation2 + $0x40] sm:$0xf] %v879_v53  ;;  %883 = vst [vmem:[#allocation2 + $0x44] sm:$0x1] %v882_v54  ;;  %v1005_v0 = vrot.slane %v1003_v51, 5  ;;  %v1014_v1 = vshrl.u32 %v8680_v35, 16  ;;  %v799_v3 = vor.u32 %v797_v45, %v796_v57 }
 0x17e   :  { %v1017_v2 = vshll.u32 %v8680_v35, 16  ;;  %v800_v4 = vrot.slane %v796_v57, 4  ;;  %v1023_v5 = vshll.u32 %v8687_v46, 16  ;;  %v8698_v28 = vld [vmem:[#allocation2 + $0x20] sm:$0xf]  ;;  %v6915_v6 = vrot.slane %v8685_v38, 9 }
 0x17f   :  { %v998_v8 = vsel %vm8577_vm12, %v993_v63, %v997_v49  ;;  %v1006_v10 = vor.u32 %v1005_v0, %v1002_v50  ;;  %v1016_v12 = vrot.slane %v1014_v1, 4  ;;  %v8703_v16 = vld [vmem:[#allocation2 + $0x28] sm:$0xf]  ;;  %v8705_v18 = vld [vmem:[#allocation2 + $0x24] sm:$0x1]  ;;  %v927_v19 = vsel %vm8545_vm11, %v799_v3, %v926_v55 }
 0x180   :  { %v1019_v15 = vrot.slane %v1017_v2, 5  ;;  %v930_v20 = vsel %vm8351_vm4, %v800_v4, %v929_v62  ;;  %v6879_v21 = vcombine.low %v984_v58, %v998_v8  ;;  %v1011_v22 = vrot.slane %v1009_v60, 5  ;;  %v8716_v23 = vld [vmem:[#allocation2 + $0x2c] sm:$0x1]  ;;  %v8718_v25 = vld [vmem:[#allocation2 + $0x30] sm:$0xf] }
 0x181   :  { %928 = vst [vmem:[#allocation2 + $0x90] sm:$0xf] %v927_v19  ;;  %931 = vst [vmem:[#allocation2 + $0x94] sm:$0x1] %v930_v20  ;;  %v1007_v26 = vrot.slane %v1006_v10, 4  ;;  %v1028_v56 = vshrl.u32 %v8698_v28, 16 }
 0x182   :  { %v1020_v27 = vor.u32 %v1019_v15, %v1016_v12  ;;  %v1031_v30 = vshll.u32 %v8698_v28, 16  ;;  %v8722_v31 = vld [vmem:[#allocation2 + $0x34] sm:$0x1]  ;;  %7572 = vmatprep.mubr.msk.bf16.mxu1 %vm1236_vm13, %v6879_v21  ;;  %v1025_v33 = vrot.slane %v1023_v5, 5  ;;  %v1037_v42 = vshll.u32 %v8705_v18, 16  ;;  %v8183_v54 = vld [vmem:[%s10266_s4 + $0x8] sm:$0xff]  }
 0x183   :  { %v1042_v48 = vshrl.u32 %v8703_v16, 16  ;;  %v1045_v58 = vshll.u32 %v8703_v16, 16  ;;  %v8728_v34 = vld [vmem:[#allocation2 + $0x38] sm:$0xf]  ;;  %v1012_v37 = vsel %vm8577_vm12, %v1007_v26, %v1011_v22  ;;  %v1030_v41 = vrot.slane %v1028_v56, 4 }
 0x184   :  { %v1021_v40 = vrot.slane %v1020_v27, 4  ;;  %v1033_v44 = vrot.slane %v1031_v30, 5  ;;  %v8732_v45 = vld [vmem:[#allocation2 + $0x3c] sm:$0x1]  ;;  %v1039_v47 = vrot.slane %v1037_v42, 5  ;;  %v1051_v51 = vshll.u32 %v8716_v23, 16 }
 0x185   :  { %v1044_v49 = vrot.slane %v1042_v48, 4  ;;  %v1047_v50 = vrot.slane %v1045_v58, 5  ;;  %v8735_v53 = vld [vmem:[#allocation2 + $0x58] sm:$0xf]  ;;  %v1056_v60 = vshrl.u32 %v8718_v25, 16  ;;  %v1059_v62 = vshll.u32 %v8718_v25, 16 }
 0x186   :  { %v1026_v55 = vsel %vm8577_vm12, %v1021_v40, %v1025_v33  ;;  %v1034_v57 = vor.u32 %v1033_v44, %v1030_v41  ;;  %v8744_v63 = vld [vmem:[#allocation2 + $0x5c] sm:$0x1]  ;;  %v1065_v2 = vshll.u32 %v8722_v31, 16  ;;  %v1070_v3 = vshrl.u32 %v8728_v34, 16  ;;  %v8749_v12 = vld [vmem:[#allocation2 + $0x60] sm:$0xf] }
 0x187   :  { %v6880_v0 = vcombine.low %v1012_v37, %v1026_v55  ;;  %v1048_v1 = vor.u32 %v1047_v50, %v1044_v49  ;;  %v1058_v5 = vrot.slane %v1056_v60, 4  ;;  %v1061_v8 = vrot.slane %v1059_v62, 5  ;;  %v8753_v22 = vld [vmem:[#allocation2 + $0x64] sm:$0x1]  ;;  %v8768_v37 = vld [vmem:[#allocation2 + $0x68] sm:$0xf] }
 0x188   :  { %v1035_v4 = vrot.slane %v1034_v57, 4  ;;  %v1073_v10 = vshll.u32 %v8728_v34, 16  ;;  %v1053_v19 = vrot.slane %v1051_v51, 5  ;;  %v1072_v20 = vrot.slane %v1070_v3, 4  ;;  %v8760_v33 = vld [vmem:[%s10266_s4 + $0x20] sm:$0xff]  }
 0x189   :  { %7573 = vmatmul.mubr.msk.bf16.vlgmr.msra.gmra.mrb[8].mxu1 %vm1236_vm13, %v6880_v0  ;;  %v1049_v15 = vrot.slane %v1048_v1, 4  ;;  %v1079_v21 = vshll.u32 %v8732_v45, 16  ;;  %v1062_v26 = vor.u32 %v1061_v8, %v1058_v5  ;;  %v1067_v27 = vrot.slane %v1065_v2, 5  ;;  %v8770_v50 = vld [vmem:[#allocation2 + $0x6c] sm:$0x1] }
 0x18a   :  { %7589 = vmatpush3.bf16.msra.mxu1 %v8506_v7  ;;  %v1075_v56 = vrot.slane %v1073_v10, 5  ;;  %v1098_v30 = vshrl.u32 %v8735_v53, 16  ;;  %v1040_v42 = vsel %vm8577_vm12, %v1035_v4, %v1039_v47  ;;  %v1101_v58 = vshll.u32 %v8735_v53, 16  ;;  %v8774_v60 = vld [vmem:[#allocation2 + $0x50] sm:$0xe] }
 0x18b   :  { %v1054_v48 = vsel %vm8577_vm12, %v1049_v15, %v1053_v19  ;;  %v1107_v7 = vshll.u32 %v8744_v63, 16  ;;  %7590 = vmatprep.subr.bf16.mxu1 %v8183_v54  ;;  %v1063_v41 = vrot.slane %v1062_v26, 4  ;;  %v1081_v51 = vrot.slane %v1079_v21, 5  ;;  %v8780_v10 = vld [vmem:[#allocation2 + $0x70] sm:$0xf] }
 0x18c   :  { %v6881_v40 = vcombine.low %v1040_v42, %v1054_v48  ;;  %v1076_v44 = vor.u32 %v1075_v56, %v1072_v20  ;;  %v1100_v49 = vrot.slane %v1098_v30, 4  ;;  %v1103_v55 = vrot.slane %v1101_v58, 5  ;;  %v8788_v21 = vld [vmem:[#allocation2 + $0x78] sm:$0xf]  ;;  %v8790_v48 = vld [vmem:[#allocation2 + $0x74] sm:$0x1] }
 0x18d   :  { %v1112_v47 = vshrl.u32 %v8749_v12, 16  ;;  %v1115_v57 = vshll.u32 %v8749_v12, 16  ;;  %v1109_v0 = vrot.slane %v1107_v7, 5  ;;  %v1121_v1 = vshll.u32 %v8753_v22, 16  ;;  %v1534_v38 = vld [vmem:[#allocation2 + $0x18] sm:$0xe] }
 0x18e   :  { %7576 = vmatprep.mubr.msk.bf16.mxu1 %vm1236_vm13, %v6881_v40  ;;  %v1077_v62 = vrot.slane %v1076_v44, 4  ;;  %v1126_v2 = vshrl.u32 %v8768_v37, 16  ;;  %7591 = vmatpush3.bf16.msra.mxu1 %v8183_v54  ;;  %v1104_v3 = vor.u32 %v1103_v55, %v1100_v49  ;;  %v1129_v8 = vshll.u32 %v8768_v37, 16 }
 0x18f   :  { %v1114_v4 = vrot.slane %v1112_v47, 4  ;;  %v1117_v5 = vrot.slane %v1115_v57, 5  ;;  %7608 = vmatprep.subr.bf16.mxu1 %v8760_v33  ;;  %v1068_v15 = vsel %vm8577_vm12, %v1063_v41, %v1067_v27  ;;  %v1135_v54 = vshll.u32 %v8770_v50, 16  ;;  %v8802_v47 = vld [vmem:[#allocation2 + $0x80] sm:$0xf] }
 0x190   :  { %v1082_v19 = vsel %vm8577_vm12, %v1077_v62, %v1081_v51  ;;  %v1128_v20 = vrot.slane %v1126_v2, 4  ;;  %v1105_v56 = vrot.slane %v1104_v3, 4  ;;  %v1131_v42 = vrot.slane %v1129_v8, 5  ;;  %v8799_v51 = vld [vmem:[#allocation2 + $0x7c] sm:$0x1] }
 0x191   :  { %v6882_v26 = vcombine.low %v1068_v15, %v1082_v19  ;;  %v1118_v30 = vor.u32 %v1117_v5, %v1114_v4  ;;  %v1140_v58 = vshrl.u32 %v8780_v10, 16  ;;  %v1143_v7 = vshll.u32 %v8780_v10, 16  ;;  %v8809_v2 = vld [vmem:[#allocation2 + $0x88] sm:$0xf]  ;;  %v8812_v5 = vld [vmem:[#allocation2 + $0x84] sm:$0x1] }
 0x192   :  { %v1584_v27 = vrot.slane %v8523_v24, 5  ;;  %v6923_v40 = vrot.slane %v8774_v60, 9  ;;  %v1110_v41 = vsel %vm8577_vm12, %v1105_v56, %v1109_v0  ;;  %v1123_v44 = vrot.slane %v1121_v1, 5 }
 0x193   :  { %7577 = vmatmul.mubr.msk.bf16.gmra.mrb[12].mxu1 %vm1236_vm13, %v6882_v26  ;;  %v1132_v49 = vor.u32 %v1131_v42, %v1128_v20  ;;  %v1154_v55 = vshrl.u32 %v8788_v21, 16  ;;  %v6883_v24 = vcombine.low %v1096_v59, %v1110_v41  ;;  %v1119_v57 = vrot.slane %v1118_v30, 4 }
 0x194   :  { %v1142_v60 = vrot.slane %v1140_v58, 4  ;;  %v1145_v62 = vrot.slane %v1143_v7, 5  ;;  %v1137_v1 = vrot.slane %v1135_v54, 5  ;;  %v1157_v4 = vshll.u32 %v8788_v21, 16  ;;  %v8821_v54 = vld [vmem:[#allocation2 + $0x8c] sm:$0x1] }
 0x195   :  { %v1133_v0 = vrot.slane %v1132_v49, 4  ;;  %v1156_v3 = vrot.slane %v1154_v55, 4  ;;  %7580 = vmatprep.mubr.msk.bf16.mxu1 %vm1236_vm13, %v6883_v24  ;;  %v1149_v15 = vshll.u32 %v8790_v48, 16  ;;  %v1168_v61 = vshrl.u32 %v8802_v47, 16 }
 0x196   :  { %v1146_v8 = vor.u32 %v1145_v62, %v1142_v60  ;;  %v1171_v32 = vshll.u32 %v8802_v47, 16  ;;  %v1159_v19 = vrot.slane %v1157_v4, 5  ;;  %v1163_v20 = vshll.u32 %v8799_v51, 16  ;;  %v1532_v4 = vld [vmem:[#allocation2 + $0x8] sm:$0xe] }
 0x197   :  { %v1138_v59 = vsel %vm8577_vm12, %v1133_v0, %v1137_v1  ;;  %v1182_v26 = vshrl.u32 %v8809_v2, 16  ;;  %v1124_v56 = vsel %vm8577_vm12, %v1119_v57, %v1123_v44  ;;  %v1170_v30 = vrot.slane %v1168_v61, 4 }
 0x198   :  { %v1177_v42 = vshll.u32 %v8812_v5, 16  ;;  %v1616_v58 = vrot.slane %v8536_v43, 5  ;;  %v6884_v7 = vcombine.low %v1124_v56, %v1138_v59  ;;  %v1147_v41 = vrot.slane %v1146_v8, 4  ;;  %v1535_v56 = vld [vmem:[#allocation2 + $0x20] sm:$0xe] }
 0x199   :  { %v1160_v49 = vor.u32 %v1159_v19, %v1156_v3  ;;  %v1173_v55 = vrot.slane %v1171_v32, 5  ;;  %v1184_v60 = vrot.slane %v1182_v26, 4  ;;  %v1185_v62 = vshll.u32 %v8809_v2, 16  ;;  %v1533_v32 = vld [vmem:[#allocation2 + $0x10] sm:$0xe] }
 0x19a   :  { %v1191_v44 = vshll.u32 %v8821_v54, 16  ;;  %v1151_v57 = vrot.slane %v1149_v15, 5  ;;  %v1165_v43 = vrot.slane %v1163_v20, 5  ;;  %v1179_v3 = vrot.slane %v1177_v42, 5 }
 0x19b   :  { %7581 = vmatmul.mubr.msk.bf16.gmra.mrb[16].mxu1 %vm1236_vm13, %v6884_v7  ;;  %v1161_v0 = vrot.slane %v1160_v49, 4  ;;  %v1174_v1 = vor.u32 %v1173_v55, %v1170_v30  ;;  %v1187_v8 = vrot.slane %v1185_v62, 5  ;;  %v8841_v61 = vsel %vm8830_vm0, %v6915_v6, %v1584_v27  ;;  %v1536_v7 = vld [vmem:[#allocation2 + $0x28] sm:$0xe] }
 0x19c   :  { %v8845_v59 = vsel %vm8830_vm0, %v6923_v40, %v1616_v58  ;;  %v1152_v15 = vsel %vm8577_vm12, %v1147_v41, %v1151_v57  ;;  %v6897_v26 = vcombine.low %v8513_v13, %v8654_v52  ;;  %v1193_v27 = vrot.slane %v1191_v44, 5  ;;  %v1537_v57 = vld [vmem:[#allocation2 + $0x30] sm:$0xe] }
 0x19d   :  { %v1166_v19 = vsel %vm8577_vm12, %v1161_v0, %v1165_v43  ;;  %v1175_v20 = vrot.slane %v1174_v1, 4  ;;  %v1188_v6 = vor.u32 %v1187_v8, %v1184_v60  ;;  %v6916_v42 = vrot.slane %v1532_v4, 9  ;;  %v1541_v8 = vld [vmem:[#allocation2 + $0x60] sm:$0xe] }
 0x19e   :  { %v6885_v30 = vcombine.low %v1152_v15, %v1166_v19  ;;  %v1588_v58 = vrot.slane %v8664_v9, 5  ;;  %v6917_v41 = vrot.slane %v1533_v32, 9  ;;  %v1592_v49 = vrot.slane %v8682_v36, 5  ;;  %v1538_v36 = vld [vmem:[#allocation2 + $0x38] sm:$0xe] }
 0x19f   :  { %v1180_v40 = vsel %vm8577_vm12, %v1175_v20, %v1179_v3  ;;  %v1189_v55 = vrot.slane %v1188_v6, 4  ;;  %v6918_v62 = vrot.slane %v1534_v38, 9  ;;  %v1596_v13 = vrot.slane %v8687_v46, 5  ;;  %v1540_v3 = vld [vmem:[#allocation2 + $0x58] sm:$0xe] }
 0x1a0   :  { %7584 = vmatprep.mubr.msk.bf16.mxu1 %vm1236_vm13, %v6885_v30  ;;  %v6919_v52 = vrot.slane %v1535_v56, 9  ;;  %v8861_v60 = vsel %vm8830_vm0, %v6916_v42, %v1588_v58  ;;  %v8865_v44 = vsel %vm8830_vm0, %v6917_v41, %v1592_v49  ;;  %v1600_v9 = vrot.slane %v8705_v18, 5  ;;  %v1542_v20 = vld [vmem:[#allocation2 + $0x68] sm:$0xe]  ;;  %v1543_v6 = vld [vmem:[#allocation2 + $0x70] sm:$0xe] }
 0x1a1   :  { %v6920_v0 = vrot.slane %v1536_v7, 9  ;;  %v1194_v43 = vsel %vm8577_vm12, %v1189_v55, %v1193_v27  ;;  %v6935_v46 = vcombine.low %v8841_v61, %v8861_v60  ;;  %v8874_v1 = vsel %vm8830_vm0, %v6918_v62, %v1596_v13  ;;  %v1544_v58 = vld [vmem:[#allocation2 + $0x78] sm:$0xe]  ;;  %v1545_v55 = vld [vmem:[#allocation2 + $0x80] sm:$0xe]  ;;  %v8201_v60 = vld [vmem:[%s10266_s4 + $0x48] sm:$0xff]  }
 0x1a2   :  { %v1604_v4 = vrot.slane %v8716_v23, 5  ;;  %v6886_v32 = vcombine.low %v1180_v40, %v1194_v43  ;;  %v6936_v18 = vcombine.low %v8865_v44, %v8874_v1  ;;  %v8881_v15 = vsel %vm8830_vm0, %v6919_v52, %v1600_v9  ;;  %v8197_v61 = vld [vmem:[#allocation2 + $0x18] ss:$8 sps:$4 sm:$0xff]   ;;  %v2034_v44 = vld [vmem:[#allocation2 + $0x8] sm:$0xf] }
 0x1a3   :  { %v6921_v19 = vrot.slane %v1537_v57, 9  ;;  %v1608_v56 = vrot.slane %v8722_v31, 5  ;;  %v6922_v30 = vrot.slane %v1538_v36, 9  ;;  %v1612_v23 = vrot.slane %v8732_v45, 5  ;;  %v1546_v57 = vld [vmem:[#allocation2 + $0x88] sm:$0xe] }
 0x1a4   :  { %v8885_v38 = vsel %vm8830_vm0, %v6920_v0, %v1604_v4  ;;  %7585 = vmatmul.mubr.msk.bf16.gmra.mrb[20].mxu1 %vm1236_vm13, %v6886_v32  ;;  %v6924_v42 = vrot.slane %v1540_v3, 9  ;;  %v1620_v7 = vrot.slane %v8744_v63, 5  ;;  %v6925_v40 = vrot.slane %v1541_v8, 9  ;;  %v2036_v1 = vld [vmem:[#allocation2 + $0x10] sm:$0xf] }
 0x1a5   :  { %v6937_v27 = vcombine.low %v8881_v15, %v8885_v38  ;;  %7592 = vmatprep.mubr.msk.bf16.mxu1 %vm1236_vm13, %v6897_v26  ;;  %v1609_v41 = vsel %vm8830_vm0, %v6921_v19, %v1608_v56  ;;  %v1613_v31 = vsel %vm8830_vm0, %v6922_v30, %v1612_v23  ;;  %v1624_v45 = vrot.slane %v8753_v22, 5 }
 0x1a6   :  { %v6926_v49 = vrot.slane %v1542_v20, 9  ;;  %v6938_v62 = vcombine.low %v1609_v41, %v1613_v31  ;;  %v1621_v13 = vsel %vm8830_vm0, %v6924_v42, %v1620_v7  ;;  %v1628_v63 = vrot.slane %v8770_v50, 5  ;;  %v8193_v20 = vld [vmem:[%s10266_s4 + $0x30] sm:$0xff]   ;;  %v2040_v42 = vld [vmem:[#allocation2 + $0x20] sm:$0xf] }
 0x1a7   :  { %v6927_v52 = vrot.slane %v1543_v6, 9  ;;  %v6939_v26 = vcombine.low %v8845_v59, %v1621_v13  ;;  %v1625_v9 = vsel %vm8830_vm0, %v6925_v40, %v1624_v45  ;;  %v1632_v0 = vrot.slane %v8790_v48, 5  ;;  %v8189_v48 = vld [vmem:[%s10266_s4 + $0x28] sm:$0xff]   ;;  %v8199_v45 = vld [vmem:[#allocation2 + $0x38] ss:$8 sps:$4 sm:$0xff]  }
 0x1a8   :  { %v6928_v36 = vrot.slane %v1544_v58, 9  ;;  %v1629_v22 = vsel %vm8830_vm0, %v6926_v49, %v1628_v63  ;;  %v1636_v43 = vrot.slane %v8799_v51, 5  ;;  %v6929_v4 = vrot.slane %v1545_v55, 9  ;;  %v2038_v58 = vld [vmem:[#allocation2 + $0x18] sm:$0xf] }
 0x1a9   :  { %v1640_v3 = vrot.slane %v8812_v5, 5  ;;  %v6940_v8 = vcombine.low %v1625_v9, %v1629_v22  ;;  %v6930_v50 = vrot.slane %v1546_v57, 9  ;;  %v1644_v32 = vrot.slane %v8821_v54, 5  ;;  %v2042_v13 = vld [vmem:[#allocation2 + $0x28] sm:$0xf] }
 0x1aa   :  { %v6898_v59 = vcombine.low %v8669_v17, %v8680_v35  ;;  %v1633_v15 = vsel %vm8830_vm0, %v6927_v52, %v1632_v0  ;;  %v1637_v51 = vsel %vm8830_vm0, %v6928_v36, %v1636_v43  ;;  %v6899_v5 = vcombine.low %v8698_v28, %v8703_v16  ;;  %v8254_v16 = vld [vmem:[#allocation2 + $0x50] sm:$0xf]  ;;  %v8985_v63 = vld [vmem:[#allocation2 + $0xc] sm:$0x1]  ;;  %v8987_v52 = vld [vmem:[#allocation2 + $0x14] sm:$0x1] }
 0x1ab   :  { %v6941_v19 = vcombine.low %v1633_v15, %v1637_v51  ;;  %v1641_v54 = vsel %vm8830_vm0, %v6929_v4, %v1640_v3  ;;  %v1645_v17 = vsel %vm8830_vm0, %v6930_v50, %v1644_v32  ;;  %v6900_v28 = vcombine.low %v8718_v25, %v8728_v34  ;;  %v8194_v34 = vld [vmem:[%s10266_s4 + $0x38] sm:$0xff]   ;;  %v2044_v22 = vld [vmem:[#allocation2 + $0x30] sm:$0xf] }
 0x1ac   :  { %7593 = vmatmul.mubr.msk.bf16.vlgmr.msra.gmra.mrb[8].mxu1 %vm1236_vm13, %v6898_v59  ;;  %v6942_v35 = vcombine.low %v1641_v54, %v1645_v17  ;;  %v6901_v38 = vcombine.low %v8254_v16, %v8735_v53  ;;  %v6903_v56 = vcombine.low %v8780_v10, %v8788_v21  ;;  %v6904_v25 = vcombine.low %v8802_v47, %v8809_v2  ;;  %v8196_v53 = vld [vmem:[%s10266_s4 + $0x40] sm:$0xff]   ;;  %v8195_v47 = vld [vmem:[#allocation2 + $0x8] ss:$8 sps:$4 sm:$0xff]   ;;  %v139_v2 = vld [vmem:[#allocation2 + $0x4c] sm:$0x1] }
 0x1ad   :  { %7609 = vmatpush3.bf16.msra.mxu1 %v8760_v33  ;;  %7596 = vmatprep.mubr.msk.bf16.mxu1 %vm1236_vm13, %v6899_v5  ;;  %v6902_v33 = vcombine.low %v8749_v12, %v8768_v37  ;;  %v77_v12 = vld [vmem:[#allocation2 + $0x48] sm:$0x1]  ;;  %v107_v37 = vld [vmem:[#allocation2 + $0x98] sm:$0x1]  ;;  %v140_v11 = vsel %vm8359_vm6, 0, %v139_v2  ;;  %v2070_v30 = vshll.u32 %v2034_v44, 16 }
 0x1ae   :  { %7610 = vmatprep.subr.bf16.mxu1 %v8189_v48  ;;  %v78_v10 = vsel %vm8351_vm4, 0, %v77_v12  ;;  %v108_v21 = vsel %vm8351_vm4, 0, %v107_v37  ;;  %141 = vst [vmem:[#allocation2 + $0x4c] sm:$0x1] %v140_v11  ;;  %v2081_v23 = vshrl.u32 %v2036_v1, 16  ;;  %v2084_v6 = vshll.u32 %v2036_v1, 16  ;;  %vm9104_vm4 = vmand %vm174_vm2, %vm48_vm3 }
 0x1af   :  { %79 = vst [vmem:[#allocation2 + $0x48] sm:$0x1] %v78_v10  ;;  %109 = vst [vmem:[#allocation2 + $0x98] sm:$0x1] %v108_v21  ;;  %v2072_v40 = vrot.slane %v2070_v30, 5  ;;  %v2109_v41 = vshrl.u32 %v2040_v42, 16 }
 0x1b0   :  { %v2112_v31 = vshll.u32 %v2040_v42, 16  ;;  %v2083_v49 = vrot.slane %v2081_v23, 4  ;;  %v2086_v55 = vrot.slane %v2084_v6, 5  ;;  %v2095_v57 = vshrl.u32 %v2038_v58, 16  ;;  %v8990_v4 = vld [vmem:[#allocation2 + $0x1c] sm:$0x1]  ;;  %vm9129_vm3 = vmand %vm174_vm2, %vm110_vm5 }
 0x1b1   :  { %7611 = vmatpush3.bf16.msra.mxu1 %v8189_v48  ;;  %v2111_v0 = vrot.slane %v2109_v41, 4  ;;  %v2123_v3 = vshrl.u32 %v2042_v13, 16  ;;  %v2076_v50 = vshll.u32 %v8985_v63, 16  ;;  %v2090_v32 = vshll.u32 %v8987_v52, 16  ;;  %v8994_v59 = vld [vmem:[#allocation2 + $0x24] sm:$0x1] }
 0x1b2   :  { %7628 = vmatprep.subr.bf16.mxu1 %v8193_v20  ;;  %v2114_v36 = vrot.slane %v2112_v31, 5  ;;  %v2087_v43 = vor.u32 %v2086_v55, %v2083_v49  ;;  %v2097_v48 = vrot.slane %v2095_v57, 4  ;;  %v2137_v51 = vshrl.u32 %v2044_v22, 16  ;;  %v8203_v54 = vld [vmem:[#allocation2 + $0x78] ss:$8 sps:$4 sm:$0xff]  }
 0x1b3   :  { %v2140_v5 = vshll.u32 %v2044_v22, 16  ;;  %v2118_v16 = vshll.u32 %v8994_v59, 16  ;;  %v2092_v12 = vrot.slane %v2090_v32, 5  ;;  %v9009_v23 = vld [vmem:[#allocation2 + $0x3c] sm:$0x1] }
 0x1b4   :  { %7597 = vmatmul.mubr.msk.bf16.gmra.mrb[12].mxu1 %vm1236_vm13, %v6900_v28  ;;  %v2088_v28 = vrot.slane %v2087_v43, 4  ;;  %v2139_v10 = vrot.slane %v2137_v51, 4 }
 0x1b5   :  { %7600 = vmatprep.mubr.msk.bf16.mxu1 %vm1236_vm13, %v6901_v38  ;;  %v8998_v38 = vld [vmem:[#allocation2 + $0x2c] sm:$0x1]  ;;  %v2142_v21 = vrot.slane %v2140_v5, 5  ;;  %v2120_v11 = vrot.slane %v2118_v16, 5 }
 0x1b6   :  { %v2093_v1 = vsel %vm8577_vm12, %v2088_v28, %v2092_v12  ;;  %v9029_v12 = vld [vmem:[#allocation2 + $0x64] sm:$0x1] }
 0x1bc   :  { %7601 = vmatmul.mubr.msk.bf16.gmra.mrb[16].mxu1 %vm1236_vm13, %v6902_v33  ;;  %v2125_v33 = vrot.slane %v2123_v3, 4 }
 0x1bd   :  { %7604 = vmatprep.mubr.msk.bf16.mxu1 %vm1236_vm13, %v6903_v56 }
 0x1c4   :  { %7605 = vmatmul.mubr.msk.bf16.gmra.mrb[20].mxu1 %vm1236_vm13, %v6904_v25  ;;  %v2078_v25 = vrot.slane %v2076_v50, 5 }
 0x1c5   :  { %7612 = vmatprep.mubr.msk.bf16.mxu1 %vm1236_vm13, %v6935_v46  ;;  %v8198_v46 = vld [vmem:[#allocation2 + $0x28] ss:$8 sps:$4 sm:$0xff]  }
 0x1cc   :  { %7613 = vmatmul.mubr.msk.bf16.vlgmr.msra.gmra.mrb[8].mxu1 %vm1236_vm13, %v6936_v18  ;;  %v2067_v18 = vshrl.u32 %v2034_v44, 16  ;;  %v2132_v44 = vshll.u32 %v8998_v38, 16 }
 0x1cd   :  { %7629 = vmatpush3.bf16.msra.mxu1 %v8193_v20  ;;  %7616 = vmatprep.mubr.msk.bf16.mxu1 %vm1236_vm13, %v6937_v27  ;;  %v8981_v27 = vld [vmem:[%s10266_s4 + $0x50] sm:$0xff]   ;;  %v2115_v20 = vor.u32 %v2114_v36, %v2111_v0  ;;  %v2160_v36 = vshll.u32 %v9009_v23, 16 }
 0x1ce   :  { %7630 = vmatprep.subr.bf16.mxu1 %v8194_v34  ;;  %v2069_v7 = vrot.slane %v2067_v18, 4  ;;  %v9007_v18 = vld [vmem:[#allocation2 + $0x34] sm:$0x1]  ;;  %v2134_v57 = vrot.slane %v2132_v44, 5 }
 0x1cf   :  { %v9027_v16 = vrot.slane %v2160_v36, 5 }
 0x1d0   :  { %v2073_v9 = vor.u32 %v2072_v40, %v2069_v7 }
 0x1d1   :  { %7631 = vmatpush3.bf16.msra.mxu1 %v8194_v34  ;;  %v2046_v34 = vld [vmem:[#allocation2 + $0x38] sm:$0xf] }
 0x1d2   :  { %7648 = vmatprep.subr.bf16.mxu1 %v8196_v53  ;;  %v2074_v17 = vrot.slane %v2073_v9, 4  ;;  %v2151_v6 = vshrl.u32 %v2046_v34, 16  ;;  %v2154_v42 = vshll.u32 %v2046_v34, 16  ;;  %v8204_v9 = vld [vmem:[#allocation2 + $0x88] ss:$8 sps:$4 sm:$0xff]  }
 0x1d4   :  { %7617 = vmatmul.mubr.msk.bf16.gmra.mrb[12].mxu1 %vm1236_vm13, %v6938_v62  ;;  %v8200_v62 = vld [vmem:[#allocation2 + $0x58] ss:$8 sps:$4 sm:$0xff]   ;;  %v2079_v2 = vsel %vm8577_vm12, %v2074_v17, %v2078_v25  ;;  %v2153_v14 = vrot.slane %v2151_v6, 4  ;;  %v2156_v3 = vrot.slane %v2154_v42, 5  ;;  %v2054_v25 = vld [vmem:[#allocation2 + $0x68] sm:$0xf] }
 0x1d5   :  { %7620 = vmatprep.mubr.msk.bf16.mxu1 %vm1236_vm13, %v6939_v26  ;;  %v2098_v26 = vshll.u32 %v2038_v58, 16  ;;  %v2050_v58 = vld [vmem:[#allocation2 + $0x58] sm:$0xf]  ;;  %v2202_v6 = vshll.u32 %v9029_v12, 16 }
 0x1d6   :  { %v2179_v22 = vshrl.u32 %v2050_v58, 16  ;;  %v2182_v43 = vshll.u32 %v2050_v58, 16  ;;  %v2157_v34 = vor.u32 %v2156_v3, %v2153_v14  ;;  %v8206_v42 = vld [vmem:[%s10266_s4 + $0x58] sm:$0xff]   ;;  %v2062_v14 = vld [vmem:[#allocation2 + $0x88] sm:$0xf] }
 0x1d7   :  { %v2100_v15 = vrot.slane %v2098_v26, 5  ;;  %v2146_v26 = vshll.u32 %v9007_v18, 16 }
 0x1d9   :  { %v2101_v37 = vor.u32 %v2100_v15, %v2097_v48  ;;  %v9020_v15 = vld [vmem:[#allocation2 + $0x44] sm:$0x1]  ;;  %v2148_v17 = vrot.slane %v2146_v26, 5 }
 0x1da   :  { %v2174_v44 = vshll.u32 %v9020_v15, 16 }
 0x1db   :  { %v2102_v31 = vrot.slane %v2101_v37, 4 }
 0x1dc   :  { %7621 = vmatmul.mubr.msk.bf16.gmra.mrb[16].mxu1 %vm1236_vm13, %v6940_v8  ;;  %v2126_v8 = vshll.u32 %v2042_v13, 16 }
 0x1dd   :  { %7624 = vmatprep.mubr.msk.bf16.mxu1 %vm1236_vm13, %v6941_v19  ;;  %v8202_v19 = vld [vmem:[#allocation2 + $0x68] ss:$8 sps:$4 sm:$0xff]  }
 0x1de   :  { %v2128_v56 = vrot.slane %v2126_v8, 5 }
 0x1e0   :  { %v2129_v30 = vor.u32 %v2128_v56, %v2125_v33  ;;  %v2181_v33 = vrot.slane %v2179_v22, 4  ;;  %v2184_v56 = vrot.slane %v2182_v43, 5 }
 0x1e2   :  { %v2130_v0 = vrot.slane %v2129_v30, 4  ;;  %v2185_v30 = vor.u32 %v2184_v56, %v2181_v33 }
 0x1e4   :  { %7625 = vmatmul.mubr.msk.bf16.gmra.mrb[20].mxu1 %vm1236_vm13, %v6942_v35  ;;  %v2104_v35 = vshll.u32 %v8990_v4, 16  ;;  %v2135_v28 = vsel %vm8577_vm12, %v2130_v0, %v2134_v57  ;;  %v2176_v0 = vrot.slane %v2174_v44, 5  ;;  %v2186_v3 = vrot.slane %v2185_v30, 4 }
 0x1e5   :  { %7632 = vmatprep.mubr.msk.bf16.mxu1 %vm1236_vm13, %v8195_v47  ;;  %v169_v47 = vld [vmem:[#allocation2 + $0x9c] sm:$0x1] }
 0x1e6   :  { %v170_v41 = vsel %vm8359_vm6, 0, %v169_v47  ;;  %vm9471_vm6 = vmand %vm172_vm1, %vm110_vm5 }
 0x1e7   :  { %171 = vst [vmem:[#allocation2 + $0x9c] sm:$0x1] %v170_v41 }
 0x1ec   :  { %7633 = vmatmul.mubr.msk.bf16.vlgmr.msra.gmra.mrb[8].mxu1 %vm1236_vm13, %v8197_v61  ;;  %v2106_v61 = vrot.slane %v2104_v35, 5  ;;  %v9023_v35 = vld [vmem:[#allocation2 + $0x5c] sm:$0x1] }
 0x1ed   :  { %7649 = vmatpush3.bf16.msra.mxu1 %v8196_v53  ;;  %7636 = vmatprep.mubr.msk.bf16.mxu1 %vm1236_vm13, %v8198_v46  ;;  %v2048_v53 = vld [vmem:[#allocation2 + $0x40] sm:$0xf] }
 0x1ee   :  { %7650 = vmatprep.subr.bf16.mxu1 %v8201_v60  ;;  %v2052_v46 = vld [vmem:[#allocation2 + $0x60] sm:$0xf]  ;;  %v2165_v7 = vshrl.u32 %v2048_v53, 16  ;;  %v2168_v40 = vshll.u32 %v2048_v53, 16  ;;  %v2107_v32 = vsel %vm8577_vm12, %v2102_v31, %v2106_v61  ;;  %v9039_v31 = vld [vmem:[#allocation2 + $0x6c] sm:$0x1] }
 0x1ef   :  { %v2193_v49 = vshrl.u32 %v2052_v46, 16  ;;  %v2196_v55 = vshll.u32 %v2052_v46, 16  ;;  %v2188_v46 = vshll.u32 %v9023_v35, 16 }
 0x1f0   :  { %v2167_v8 = vrot.slane %v2165_v7, 4  ;;  %v2170_v50 = vrot.slane %v2168_v40, 5 }
 0x1f1   :  { %7651 = vmatpush3.bf16.msra.mxu1 %v8201_v60  ;;  %v2116_v60 = vrot.slane %v2115_v20, 4  ;;  %v2195_v51 = vrot.slane %v2193_v49, 4  ;;  %v2198_v5 = vrot.slane %v2196_v55, 5  ;;  %v2060_v20 = vld [vmem:[#allocation2 + $0x80] sm:$0xf]  ;;  %v2158_v55 = vrot.slane %v2157_v34, 4 }
 0x1f2   :  { %7668 = vmatprep.subr.bf16.mxu1 %v8981_v27  ;;  %v2171_v53 = vor.u32 %v2170_v50, %v2167_v8  ;;  %v2249_v61 = vshrl.u32 %v2060_v20, 16  ;;  %v2190_v36 = vrot.slane %v2188_v46, 5  ;;  %v2204_v8 = vrot.slane %v2202_v6, 5  ;;  %v9062_v34 = vld [vmem:[#allocation2 + $0x7c] sm:$0x1] }
 0x1f3   :  { %v2121_v13 = vsel %vm8577_vm12, %v2116_v60, %v2120_v11  ;;  %v2252_v60 = vshll.u32 %v2060_v20, 16  ;;  %v2210_v11 = vshll.u32 %v2054_v25, 16  ;;  %v2244_v46 = vshll.u32 %v9062_v34, 16 }
 0x1f4   :  { %7637 = vmatmul.mubr.msk.bf16.gmra.mrb[12].mxu1 %vm1236_vm13, %v8199_v45  ;;  %v2143_v45 = vor.u32 %v2142_v21, %v2139_v10  ;;  %v2058_v21 = vld [vmem:[#allocation2 + $0x78] sm:$0xf]  ;;  %v2172_v41 = vrot.slane %v2171_v53, 4  ;;  %v2251_v57 = vrot.slane %v2249_v61, 4  ;;  %v2263_v53 = vshrl.u32 %v2062_v14, 16 }
 0x1f5   :  { %7640 = vmatprep.mubr.msk.bf16.mxu1 %vm1236_vm13, %v8200_v62  ;;  %v6979_v62 = vcombine.low %v2079_v2, %v2093_v1  ;;  %v2199_v2 = vor.u32 %v2198_v5, %v2195_v51  ;;  %v2207_v1 = vshrl.u32 %v2054_v25, 16  ;;  %v2235_v7 = vshrl.u32 %v2058_v21, 16  ;;  %v9053_v5 = vld [vmem:[#allocation2 + $0x84] sm:$0x1] }
 0x1f6   :  { %v2144_v48 = vrot.slane %v2143_v45, 4  ;;  %v2238_v40 = vshll.u32 %v2058_v21, 16  ;;  %v2254_v26 = vrot.slane %v2252_v60, 5  ;;  %v2212_v43 = vrot.slane %v2210_v11, 5 }
 0x1f7   :  { %v2209_v22 = vrot.slane %v2207_v1, 4  ;;  %v2237_v50 = vrot.slane %v2235_v7, 4  ;;  %v2191_v21 = vsel %vm8577_vm12, %v2186_v3, %v2190_v36  ;;  %v2265_v6 = vrot.slane %v2263_v53, 4  ;;  %v2468_v3 = vld [vmem:[#allocation2 + $0x8] sm:$0xe] }
 0x1f8   :  { %v2149_v47 = vsel %vm8577_vm12, %v2144_v48, %v2148_v17  ;;  %v9049_v48 = vld [vmem:[%s10266_s4 + $0x60] sm:$0xff]   ;;  %v2163_v17 = vsel %vm8577_vm12, %v2158_v55, %v9027_v16  ;;  %v2255_v33 = vor.u32 %v2254_v26, %v2251_v57  ;;  %v2258_v16 = vshll.u32 %v9053_v5, 16  ;;  %v2469_v26 = vld [vmem:[#allocation2 + $0x10] sm:$0xe] }
 0x1f9   :  { %v6981_v58 = vcombine.low %v2135_v28, %v2149_v47  ;;  %v2216_v28 = vshll.u32 %v9039_v31, 16  ;;  %v2213_v56 = vor.u32 %v2212_v43, %v2209_v22 }
 0x1fa   :  { %v2256_v1 = vrot.slane %v2255_v33, 4 }
 0x1fb   :  { %v2214_v11 = vrot.slane %v2213_v56, 4  ;;  %v2471_v56 = vld [vmem:[#allocation2 + $0x20] sm:$0xe] }
 0x1fc   :  { %7641 = vmatmul.mubr.msk.bf16.gmra.mrb[16].mxu1 %vm1236_vm13, %v8202_v19  ;;  %v2056_v19 = vld [vmem:[#allocation2 + $0x70] sm:$0xf] }
 0x1fd   :  { %7644 = vmatprep.mubr.msk.bf16.mxu1 %vm1236_vm13, %v8203_v54  ;;  %v6980_v54 = vcombine.low %v2107_v32, %v2121_v13  ;;  %v2221_v37 = vshrl.u32 %v2056_v19, 16  ;;  %v2224_v10 = vshll.u32 %v2056_v19, 16  ;;  %v9042_v13 = vld [vmem:[#allocation2 + $0x74] sm:$0x1]  ;;  %v2240_v32 = vrot.slane %v2238_v40, 5 }
 0x1fe   :  { %v2230_v25 = vshll.u32 %v9042_v13, 16  ;;  %v2260_v40 = vrot.slane %v2258_v16, 5  ;;  %v2472_v16 = vld [vmem:[#allocation2 + $0x28] sm:$0xe] }
 0x1ff   :  { %v2223_v45 = vrot.slane %v2221_v37, 4  ;;  %v2226_v49 = vrot.slane %v2224_v10, 5  ;;  %v2266_v37 = vshll.u32 %v2062_v14, 16  ;;  %v2241_v47 = vor.u32 %v2240_v32, %v2237_v50 }
 0x200   :  { %v2232_v30 = vrot.slane %v2230_v25, 5  ;;  %v2261_v57 = vsel %vm8577_vm12, %v2256_v1, %v2260_v40  ;;  %v6998_v32 = vrot.slane %v2469_v26, 9  ;;  %v2473_v25 = vld [vmem:[#allocation2 + $0x30] sm:$0xe]  ;;  %v2526_v1 = vrot.slane %v8990_v4, 5 }
 0x201   :  { %v2227_v51 = vor.u32 %v2226_v49, %v2223_v45  ;;  %v2242_v7 = vrot.slane %v2241_v47, 4  ;;  %v9075_v49 = vld [vmem:[#allocation2 + $0x8c] sm:$0x1]  ;;  %v7000_v47 = vrot.slane %v2471_v56, 9  ;;  %v7001_v4 = vrot.slane %v2472_v16, 9 }
 0x202   :  { %v2272_v14 = vshll.u32 %v9075_v49, 16  ;;  %v2477_v40 = vld [vmem:[#allocation2 + $0x60] sm:$0xe] }
 0x203   :  { %v2228_v61 = vrot.slane %v2227_v51, 4 }
 0x204   :  { %7645 = vmatmul.mubr.msk.bf16.gmra.mrb[20].mxu1 %vm1236_vm13, %v8204_v9  ;;  %v2064_v9 = vld [vmem:[#allocation2 + $0x90] sm:$0xf] }
 0x205   :  { %7652 = vmatprep.mubr.msk.bf16.mxu1 %vm1236_vm13, %v6979_v62  ;;  %v2200_v62 = vrot.slane %v2199_v2, 4  ;;  %v2277_v19 = vshrl.u32 %v2064_v9, 16  ;;  %v2233_v45 = vsel %vm8577_vm12, %v2228_v61, %v2232_v30  ;;  %v2538_v61 = vrot.slane %v9007_v18, 5 }
 0x207   :  { %v2205_v20 = vsel %vm8577_vm12, %v2200_v62, %v2204_v8  ;;  %v2279_v60 = vrot.slane %v2277_v19, 4  ;;  %v2246_v62 = vrot.slane %v2244_v46, 5 }
 0x208   :  { %v6983_v2 = vcombine.low %v2191_v21, %v2205_v20  ;;  %v2274_v20 = vrot.slane %v2272_v14, 5  ;;  %v2470_v21 = vld [vmem:[#allocation2 + $0x18] sm:$0xe]  ;;  %v2542_v14 = vrot.slane %v9009_v23, 5  ;;  %v2481_v23 = vld [vmem:[#allocation2 + $0x80] sm:$0xe] }
 0x209   :  { %v2247_v43 = vsel %vm8577_vm12, %v2242_v7, %v2246_v62  ;;  %v6999_v46 = vrot.slane %v2470_v21, 9  ;;  %v8208_v62 = vld [vmem:[%s10266_s4 + $0x68] sm:$0xff]  }
 0x20a   :  { %v6985_v8 = vcombine.low %v2247_v43, %v2261_v57 }
 0x20b   :  { %v2527_v7 = vsel %vm8830_vm0, %v6999_v46, %v2526_v1  ;;  %v8209_v1 = vld [vmem:[#allocation2 + $0x10] ss:$8 sps:$4 sm:$0xff]  }
 0x20c   :  { %7653 = vmatmul.mubr.msk.bf16.vlgmr.msra.gmra.mrb[8].mxu1 %vm1236_vm13, %v6980_v54  ;;  %v2280_v54 = vshll.u32 %v2064_v9, 16 }
 0x20d   :  { %7669 = vmatpush3.bf16.msra.mxu1 %v8981_v27  ;;  %7656 = vmatprep.mubr.msk.bf16.mxu1 %vm1236_vm13, %v6981_v58  ;;  %v2177_v27 = vsel %vm8577_vm12, %v2172_v41, %v2176_v0  ;;  %v9071_v58 = vld [vmem:[#allocation2 + $0x94] sm:$0x1]  ;;  %v2218_v41 = vrot.slane %v2216_v28, 5 }
 0x20e   :  { %7670 = vmatprep.subr.bf16.mxu1 %v8206_v42  ;;  %v6982_v10 = vcombine.low %v2163_v17, %v2177_v27  ;;  %v2282_v44 = vrot.slane %v2280_v54, 5  ;;  %v2286_v36 = vshll.u32 %v9071_v58, 16  ;;  %v2522_v27 = vrot.slane %v8987_v52, 5 }
 0x20f   :  { %v2219_v9 = vsel %vm8577_vm12, %v2214_v11, %v2218_v41  ;;  %v6997_v54 = vrot.slane %v2468_v3, 9  ;;  %v2518_v17 = vrot.slane %v8985_v63, 5  ;;  %v2530_v63 = vrot.slane %v8994_v59, 5 }
 0x210   :  { %v2283_v55 = vor.u32 %v2282_v44, %v2279_v60  ;;  %v6984_v22 = vcombine.low %v2219_v9, %v2233_v45  ;;  %v2288_v19 = vrot.slane %v2286_v36, 5  ;;  %v2523_v33 = vsel %vm8830_vm0, %v6998_v32, %v2522_v27  ;;  %v194_v60 = vld [vmem:[#allocation3 + $0x18] sm:$0x1]  ;;  %v255_v44 = vld [vmem:[#allocation3 + $0x1c] sm:$0x1] }
 0x211   :  { %7671 = vmatpush3.bf16.msra.mxu1 %v8206_v42  ;;  %v2268_v42 = vrot.slane %v2266_v37, 5  ;;  %v2519_v53 = vsel %vm8830_vm0, %v6997_v54, %v2518_v17  ;;  %v2534_v59 = vrot.slane %v8998_v38, 5  ;;  %v195_v18 = vsel %vm9104_vm4, 0, %v194_v60  ;;  %v2475_v38 = vld [vmem:[#allocation2 + $0x40] sm:$0xe] }
 0x212   :  { %7688 = vmatprep.subr.bf16.mxu1 %v9049_v48  ;;  %v2284_v50 = vrot.slane %v2283_v55, 4  ;;  %196 = vst [vmem:[#allocation3 + $0x18] sm:$0x1] %v195_v18  ;;  %v2474_v55 = vld [vmem:[#allocation2 + $0x38] sm:$0xe]  ;;  %v7004_v26 = vrot.slane %v2475_v38, 9 }
 0x213   :  { %v2269_v0 = vor.u32 %v2268_v42, %v2265_v6  ;;  %v2531_v6 = vsel %vm8830_vm0, %v7000_v47, %v2530_v63  ;;  %v256_v42 = vsel %vm9129_vm3, 0, %v255_v44  ;;  %v2535_v45 = vsel %vm8830_vm0, %v7001_v4, %v2534_v59  ;;  %v2482_v63 = vld [vmem:[#allocation2 + $0x88] sm:$0xe]  ;;  %v8215_v59 = vld [vmem:[%s10266_s4 + $0x78] sm:$0xff]   ;;  %v2973_v38 = vld [vmem:[#allocation2 + $0x20] sm:$0xf] }
 0x214   :  { %7657 = vmatmul.mubr.msk.bf16.gmra.mrb[12].mxu1 %vm1236_vm13, %v6982_v10  ;;  %v2289_v28 = vsel %vm8577_vm12, %v2284_v50, %v2288_v19  ;;  %v7017_v10 = vcombine.low %v2519_v53, %v2523_v33  ;;  %257 = vst [vmem:[#allocation3 + $0x1c] sm:$0x1] %v256_v42  ;;  %v7018_v41 = vcombine.low %v2527_v7, %v2531_v6  ;;  %v2546_v9 = vrot.slane %v9020_v15, 5  ;;  %v8210_v15 = vld [vmem:[%s10266_s4 + $0x70] sm:$0xff]   ;;  %v8211_v4 = vld [vmem:[#allocation2 + $0x20] ss:$8 sps:$4 sm:$0xff]  }
 0x215   :  { %7660 = vmatprep.mubr.msk.bf16.mxu1 %vm1236_vm13, %v6983_v2  ;;  %v2270_v51 = vrot.slane %v2269_v0, 4  ;;  %v7002_v2 = vrot.slane %v2473_v25, 9  ;;  %v2476_v0 = vld [vmem:[#allocation2 + $0x58] sm:$0xe]  ;;  %v7006_v36 = vrot.slane %v2477_v40, 9  ;;  %v7003_v43 = vrot.slane %v2474_v55, 9 }
 0x216   :  { %v7005_v3 = vrot.slane %v2476_v0, 9  ;;  %v2547_v50 = vsel %vm8830_vm0, %v7004_v26, %v2546_v9  ;;  %v2562_v17 = vrot.slane %v9042_v13, 5  ;;  %v2570_v33 = vrot.slane %v9053_v5, 5  ;;  %v8212_v18 = vld [vmem:[#allocation2 + $0x30] ss:$8 sps:$4 sm:$0xff]  }
 0x217   :  { %v2275_v52 = vsel %vm8577_vm12, %v2270_v51, %v2274_v20  ;;  %v2539_v29 = vsel %vm8830_vm0, %v7002_v2, %v2538_v61  ;;  %v2543_v32 = vsel %vm8830_vm0, %v7003_v43, %v2542_v14  ;;  %v2478_v51 = vld [vmem:[#allocation2 + $0x68] sm:$0xe]  ;;  %v2480_v20 = vld [vmem:[#allocation2 + $0x78] sm:$0xe]  ;;  %v2558_v25 = vrot.slane %v9039_v31, 5 }
 0x218   :  { %v6986_v37 = vcombine.low %v2275_v52, %v2289_v28  ;;  %v7019_v57 = vcombine.low %v2535_v45, %v2539_v29  ;;  %v7020_v27 = vcombine.low %v2543_v32, %v2547_v50  ;;  %v7010_v28 = vrot.slane %v2481_v23, 9  ;;  %v2971_v42 = vld [vmem:[#allocation2 + $0x18] sm:$0xf]  ;;  %v9196_v29 = vld [vmem:[%s10266_s4 + $0x80] sm:$0xff]   ;;  %v2975_v7 = vld [vmem:[#allocation2 + $0x28] sm:$0xf] }
 0x219   :  { %v7007_v56 = vrot.slane %v2478_v51, 9  ;;  %v7009_v52 = vrot.slane %v2480_v20, 9  ;;  %v2566_v53 = vrot.slane %v9062_v34, 5  ;;  %v2578_v2 = vrot.slane %v9071_v58, 5  ;;  %v2969_v58 = vld [vmem:[#allocation2 + $0x10] sm:$0xf] }
 0x21a   :  { %v2571_v13 = vsel %vm8830_vm0, %v7010_v28, %v2570_v33  ;;  %v7011_v34 = vrot.slane %v2482_v63, 9  ;;  %v2574_v61 = vrot.slane %v9075_v49, 5  ;;  %v3002_v49 = vshrl.u32 %v2969_v58, 16  ;;  %v8213_v0 = vld [vmem:[#allocation2 + $0x40] ss:$8 sps:$4 sm:$0xff]  }
 0x21b   :  { %v2559_v21 = vsel %vm8830_vm0, %v7007_v56, %v2558_v25  ;;  %v2567_v5 = vsel %vm8830_vm0, %v7009_v52, %v2566_v53  ;;  %v3005_v6 = vshll.u32 %v2969_v58, 16  ;;  %v3016_v45 = vshrl.u32 %v2971_v42, 16  ;;  %v2979_v43 = vld [vmem:[#allocation2 + $0x38] sm:$0xf]  ;;  %v9200_v14 = vld [vmem:[#allocation2 + $0x14] sm:$0x1] }
 0x21c   :  { %7661 = vmatmul.mubr.msk.bf16.gmra.mrb[16].mxu1 %vm1236_vm13, %v6984_v22  ;;  %v2554_v22 = vrot.slane %v9029_v12, 5  ;;  %v7023_v16 = vcombine.low %v2567_v5, %v2571_v13  ;;  %v2575_v44 = vsel %vm8830_vm0, %v7011_v34, %v2574_v61  ;;  %v3004_v40 = vrot.slane %v3002_v49, 4  ;;  %v9203_v50 = vld [vmem:[#allocation2 + $0x1c] sm:$0x1]  ;;  %v9209_v33 = vld [vmem:[#allocation2 + $0x24] sm:$0x1] }
 0x21d   :  { %7664 = vmatprep.mubr.msk.bf16.mxu1 %vm1236_vm13, %v6985_v8  ;;  %v2550_v8 = vrot.slane %v9023_v35, 5  ;;  %v3019_v55 = vshll.u32 %v2971_v42, 16  ;;  %v3044_v26 = vshrl.u32 %v2975_v7, 16  ;;  %v3047_v9 = vshll.u32 %v2975_v7, 16  ;;  %v2981_v56 = vld [vmem:[#allocation2 + $0x40] sm:$0xf] }
 0x21e   :  { %v2555_v12 = vsel %vm8830_vm0, %v7006_v36, %v2554_v22  ;;  %v8214_v36 = vld [vmem:[#allocation2 + $0x60] ss:$8 sps:$4 sm:$0xff]   ;;  %v2977_v22 = vld [vmem:[#allocation2 + $0x30] sm:$0xf]  ;;  %v3025_v28 = vshll.u32 %v9203_v50, 16  ;;  %v3086_v34 = vshrl.u32 %v2981_v56, 16 }
 0x21f   :  { %v2551_v35 = vsel %vm8830_vm0, %v7005_v3, %v2550_v8  ;;  %v3018_v8 = vrot.slane %v3016_v45, 4  ;;  %v3046_v32 = vrot.slane %v3044_v26, 4  ;;  %v3049_v23 = vrot.slane %v3047_v9, 5  ;;  %v8216_v25 = vld [vmem:[#allocation2 + $0x70] ss:$8 sps:$4 sm:$0xff]  }
 0x220   :  { %v7021_v19 = vcombine.low %v2551_v35, %v2555_v12  ;;  %v3058_v35 = vshrl.u32 %v2977_v22, 16  ;;  %v3061_v51 = vshll.u32 %v2977_v22, 16  ;;  %v3089_v61 = vshll.u32 %v2981_v56, 16  ;;  %v9217_v42 = vld [vmem:[#allocation2 + $0x34] sm:$0x1] }
 0x222   :  { %v3063_v5 = vrot.slane %v3061_v51, 5 }
 0x224   :  { %7665 = vmatmul.mubr.msk.bf16.gmra.mrb[20].mxu1 %vm1236_vm13, %v6986_v37 }
 0x225   :  { %7672 = vmatprep.mubr.msk.bf16.mxu1 %vm1236_vm13, %v7017_v10  ;;  %v2483_v10 = vld [vmem:[#allocation2 + $0x90] sm:$0xe] }
 0x226   :  { %v7012_v31 = vrot.slane %v2483_v10, 9  ;;  %v2983_v10 = vld [vmem:[#allocation2 + $0x48] sm:$0xf] }
 0x227   :  { %v3103_v58 = vshll.u32 %v2983_v10, 16 }
 0x228   :  { %v2579_v60 = vsel %vm8830_vm0, %v7012_v31, %v2578_v2  ;;  %v3039_v2 = vshll.u32 %v9209_v33, 16 }
 0x229   :  { %v7024_v46 = vcombine.low %v2575_v44, %v2579_v60  ;;  %v2987_v60 = vld [vmem:[#allocation2 + $0x68] sm:$0xf] }
 0x22a   :  { %v3131_v45 = vshll.u32 %v2987_v60, 16 }
 0x22c   :  { %7673 = vmatmul.mubr.msk.bf16.vlgmr.msra.gmra.mrb[8].mxu1 %vm1236_vm13, %v7018_v41  ;;  %v3007_v41 = vrot.slane %v3005_v6, 5 }
 0x22d   :  { %7689 = vmatpush3.bf16.msra.mxu1 %v9049_v48  ;;  %7676 = vmatprep.mubr.msk.bf16.mxu1 %vm1236_vm13, %v7019_v57  ;;  %v2479_v48 = vld [vmem:[#allocation2 + $0x70] sm:$0xe]  ;;  %v3033_v57 = vshll.u32 %v2973_v38, 16 }
 0x22e   :  { %7690 = vmatprep.subr.bf16.mxu1 %v8208_v62  ;;  %v7008_v54 = vrot.slane %v2479_v48, 9  ;;  %v3008_v3 = vor.u32 %v3007_v41, %v3004_v40  ;;  %v3128_v41 = vshrl.u32 %v2987_v60, 16 }
 0x22f   :  { %v3035_v48 = vrot.slane %v3033_v57, 5  ;;  %v3091_v57 = vrot.slane %v3089_v61, 5 }
 0x230   :  { %v2563_v37 = vsel %vm8830_vm0, %v7008_v54, %v2562_v17  ;;  %v3075_v54 = vshll.u32 %v2979_v43, 16  ;;  %v3011_v17 = vshll.u32 %v9200_v14, 16  ;;  %v3009_v52 = vrot.slane %v3008_v3, 4 }
 0x231   :  { %7691 = vmatpush3.bf16.msra.mxu1 %v8208_v62  ;;  %v7022_v47 = vcombine.low %v2559_v21, %v2563_v37  ;;  %v3030_v62 = vshrl.u32 %v2973_v38, 16  ;;  %v3050_v37 = vor.u32 %v3049_v23, %v3046_v32  ;;  %v8217_v21 = vld [vmem:[#allocation2 + $0x80] ss:$8 sps:$4 sm:$0xff]   ;;  %v9219_v38 = vld [vmem:[#allocation2 + $0x3c] sm:$0x1]  ;;  %v3130_v51 = vrot.slane %v3128_v41, 4 }
 0x232   :  { %7708 = vmatprep.subr.bf16.mxu1 %v8210_v15  ;;  %v3013_v31 = vrot.slane %v3011_v17, 5  ;;  %v8218_v32 = vld [vmem:[#allocation2 + $0x90] ss:$8 sps:$4 sm:$0xff]  }
 0x233   :  { %v3032_v12 = vrot.slane %v3030_v62, 4  ;;  %v3051_v49 = vrot.slane %v3050_v37, 4  ;;  %v3088_v62 = vrot.slane %v3086_v34, 4  ;;  %v2989_v34 = vld [vmem:[#allocation2 + $0x70] sm:$0xf] }
 0x234   :  { %7677 = vmatmul.mubr.msk.bf16.gmra.mrb[12].mxu1 %vm1236_vm13, %v7020_v27  ;;  %v9205_v27 = vld [vmem:[#allocation2 + $0x2c] sm:$0x1] }
 0x235   :  { %7680 = vmatprep.mubr.msk.bf16.mxu1 %vm1236_vm13, %v7021_v19  ;;  %v3072_v19 = vshrl.u32 %v2979_v43, 16  ;;  %v3036_v53 = vor.u32 %v3035_v48, %v3032_v12  ;;  %v3053_v13 = vshll.u32 %v9205_v27, 16  ;;  %v3105_v43 = vrot.slane %v3103_v58, 5  ;;  %v2991_v48 = vld [vmem:[#allocation2 + $0x78] sm:$0xf] }
 0x236   :  { %v3081_v12 = vshll.u32 %v9219_v38, 16  ;;  %v3092_v17 = vor.u32 %v3091_v57, %v3088_v62  ;;  %v3159_v61 = vshll.u32 %v2991_v48, 16  ;;  %v2993_v58 = vld [vmem:[#allocation2 + $0x80] sm:$0xf]  ;;  %v8220_v62 = vld [vmem:[%s10266_s4 + $0x88] sm:$0xff]  }
 0x237   :  { %v3074_v63 = vrot.slane %v3072_v19, 4  ;;  %v3055_v6 = vrot.slane %v3053_v13, 5  ;;  %v3133_v19 = vrot.slane %v3131_v45, 5  ;;  %v9237_v13 = vld [vmem:[#allocation2 + $0x6c] sm:$0x1] }
 0x238   :  { %v3161_v57 = vrot.slane %v3159_v61, 5 }
 0x23c   :  { %7681 = vmatmul.mubr.msk.bf16.gmra.mrb[16].mxu1 %vm1236_vm13, %v7022_v47  ;;  %v3060_v47 = vrot.slane %v3058_v35, 4 }
 0x23d   :  { %7684 = vmatprep.mubr.msk.bf16.mxu1 %vm1236_vm13, %v7023_v16  ;;  %v3077_v16 = vrot.slane %v3075_v54, 5 }
 0x23e   :  { %v3064_v7 = vor.u32 %v3063_v5, %v3060_v47  ;;  %v3156_v5 = vshrl.u32 %v2991_v48, 16 }
 0x23f   :  { %v3078_v40 = vor.u32 %v3077_v16, %v3074_v63  ;;  %v2995_v63 = vld [vmem:[#allocation2 + $0x88] sm:$0xf] }
 0x240   :  { %v3065_v23 = vrot.slane %v3064_v7, 4  ;;  %v3142_v7 = vshrl.u32 %v2989_v34, 16  ;;  %v3158_v41 = vrot.slane %v3156_v5, 4 }
 0x241   :  { %v3079_v54 = vrot.slane %v3078_v40, 4  ;;  %v3145_v40 = vshll.u32 %v2989_v34, 16 }
 0x244   :  { %7685 = vmatmul.mubr.msk.bf16.gmra.mrb[20].mxu1 %vm1236_vm13, %v7024_v46  ;;  %v3027_v46 = vrot.slane %v3025_v28, 5 }
 0x245   :  { %7692 = vmatprep.mubr.msk.bf16.mxu1 %vm1236_vm13, %v8209_v1  ;;  %v3100_v1 = vshrl.u32 %v2983_v10, 16 }
 0x247   :  { %v3102_v22 = vrot.slane %v3100_v1, 4 }
 0x249   :  { %v3106_v37 = vor.u32 %v3105_v43, %v3102_v22  ;;  %v2997_v22 = vld [vmem:[#allocation2 + $0x90] sm:$0xf] }
 0x24c   :  { %7693 = vmatmul.mubr.msk.bf16.vlgmr.msra.gmra.mrb[8].mxu1 %vm1236_vm13, %v8211_v4  ;;  %v2985_v4 = vld [vmem:[#allocation2 + $0x60] sm:$0xf] }
 0x24d   :  { %7709 = vmatpush3.bf16.msra.mxu1 %v8210_v15  ;;  %7696 = vmatprep.mubr.msk.bf16.mxu1 %vm1236_vm13, %v8212_v18  ;;  %v3021_v15 = vrot.slane %v3019_v55, 5  ;;  %v3037_v18 = vrot.slane %v3036_v53, 4  ;;  %v9221_v55 = vld [vmem:[#allocation2 + $0x44] sm:$0x1]  ;;  %v3114_v26 = vshrl.u32 %v2985_v4, 16  ;;  %v3117_v9 = vshll.u32 %v2985_v4, 16 }
 0x24e   :  { %7710 = vmatprep.subr.bf16.mxu1 %v8215_v59  ;;  %v3095_v35 = vshll.u32 %v9221_v55, 16  ;;  %v9235_v53 = vld [vmem:[#allocation2 + $0x4c] sm:$0x1]  ;;  %v3107_v4 = vrot.slane %v3106_v37, 4 }
 0x24f   :  { %v3022_v20 = vor.u32 %v3021_v15, %v3018_v8  ;;  %v3041_v8 = vrot.slane %v3039_v2, 5  ;;  %v3056_v15 = vsel %vm8577_vm12, %v3051_v49, %v3055_v6  ;;  %v3116_v28 = vrot.slane %v3114_v26, 4 }
 0x250   :  { %v3119_v56 = vrot.slane %v3117_v9, 5  ;;  %v3109_v47 = vshll.u32 %v9235_v53, 16  ;;  %v3134_v2 = vor.u32 %v3133_v19, %v3130_v51  ;;  %v3187_v49 = vshll.u32 %v2995_v63, 16 }
 0x251   :  { %7711 = vmatpush3.bf16.msra.mxu1 %v8215_v59  ;;  %v3023_v44 = vrot.slane %v3022_v20, 4  ;;  %v3014_v59 = vsel %vm8577_vm12, %v3009_v52, %v3013_v31  ;;  %v9230_v20 = vld [vmem:[#allocation2 + $0x64] sm:$0x1]  ;;  %v3097_v31 = vrot.slane %v3095_v35, 5  ;;  %v3170_v26 = vshrl.u32 %v2993_v58, 16 }
 0x252   :  { %7728 = vmatprep.subr.bf16.mxu1 %v9196_v29  ;;  %v3123_v1 = vshll.u32 %v9230_v20, 16  ;;  %v3111_v6 = vrot.slane %v3109_v47, 5  ;;  %v3135_v45 = vrot.slane %v3134_v2, 4  ;;  %v3173_v9 = vshll.u32 %v2993_v58, 16  ;;  %v9269_v2 = vld [vmem:[#allocation2 + $0x84] sm:$0x1] }
 0x253   :  { %v3144_v35 = vrot.slane %v3142_v7, 4  ;;  %v3147_v51 = vrot.slane %v3145_v40, 5  ;;  %v9275_v7 = vld [vmem:[#allocation2 + $0x94] sm:$0x1] }
 0x254   :  { %7697 = vmatmul.mubr.msk.bf16.gmra.mrb[12].mxu1 %vm1236_vm13, %v8213_v0  ;;  %v3028_v0 = vsel %vm8577_vm12, %v3023_v44, %v3027_v46  ;;  %v3093_v44 = vrot.slane %v3092_v17, 4  ;;  %v3120_v46 = vor.u32 %v3119_v56, %v3116_v28  ;;  %v3112_v48 = vsel %vm8577_vm12, %v3107_v4, %v3111_v6 }
 0x255   :  { %7700 = vmatprep.mubr.msk.bf16.mxu1 %vm1236_vm13, %v8214_v36  ;;  %v3067_v36 = vshll.u32 %v9217_v42, 16  ;;  %v7061_v3 = vcombine.low %v3014_v59, %v3028_v0  ;;  %v3137_v59 = vshll.u32 %v9237_v13, 16  ;;  %v3162_v17 = vor.u32 %v3161_v57, %v3158_v41 }
 0x256   :  { %v3098_v43 = vsel %vm8577_vm12, %v3093_v44, %v3097_v31  ;;  %v3172_v28 = vrot.slane %v3170_v26, 4  ;;  %v3175_v56 = vrot.slane %v3173_v9, 5 }
 0x257   :  { %v3069_v52 = vrot.slane %v3067_v36, 5  ;;  %v3125_v36 = vrot.slane %v3123_v1, 5  ;;  %v7064_v5 = vcombine.low %v3098_v43, %v3112_v48  ;;  %v3163_v61 = vrot.slane %v3162_v17, 4 }
 0x259   :  { %v3070_v16 = vsel %vm8577_vm12, %v3065_v23, %v3069_v52  ;;  %v9257_v23 = vld [vmem:[#allocation2 + $0x74] sm:$0x1]  ;;  %v3201_v52 = vshll.u32 %v2997_v22, 16 }
 0x25b   :  { %v3203_v1 = vrot.slane %v3201_v52, 5  ;;  %v3457_v52 = vrot.slane %v9203_v50, 5  ;;  %v3465_v50 = vrot.slane %v9205_v27, 5 }
 0x25c   :  { %7701 = vmatmul.mubr.msk.bf16.gmra.mrb[16].mxu1 %vm1236_vm13, %v8216_v25  ;;  %v3042_v25 = vsel %vm8577_vm12, %v3037_v18, %v3041_v8  ;;  %v3184_v18 = vshrl.u32 %v2995_v63, 16 }
 0x25d   :  { %7704 = vmatprep.mubr.msk.bf16.mxu1 %vm1236_vm13, %v8217_v21  ;;  %v7062_v10 = vcombine.low %v3042_v25, %v3056_v15  ;;  %v3083_v21 = vrot.slane %v3081_v12, 5  ;;  %v3189_v15 = vrot.slane %v3187_v49, 5  ;;  %v2999_v12 = vld [vmem:[#allocation2 + $0x98] sm:$0xf]  ;;  %v3198_v25 = vshrl.u32 %v2997_v22, 16 }
 0x25e   :  { %v3186_v8 = vrot.slane %v3184_v18, 4  ;;  %v3212_v37 = vshrl.u32 %v2999_v12, 16 }
 0x25f   :  { %v3084_v60 = vsel %vm8577_vm12, %v3079_v54, %v3083_v21  ;;  %v9261_v54 = vld [vmem:[#allocation2 + $0x7c] sm:$0x1]  ;;  %v3151_v21 = vshll.u32 %v9257_v23, 16 }
 0x260   :  { %v7063_v0 = vcombine.low %v3070_v16, %v3084_v60  ;;  %v3190_v47 = vor.u32 %v3189_v15, %v3186_v8  ;;  %v3148_v16 = vor.u32 %v3147_v51, %v3144_v35  ;;  %v3165_v31 = vshll.u32 %v9261_v54, 16  ;;  %v3403_v8 = vld [vmem:[#allocation2 + $0x10] sm:$0xe] }
 0x261   :  { %v3176_v60 = vor.u32 %v3175_v56, %v3172_v28  ;;  %v3214_v58 = vrot.slane %v3212_v37, 4  ;;  %v3153_v40 = vrot.slane %v3151_v21, 5  ;;  %v7079_v17 = vrot.slane %v3403_v8, 9  ;;  %v3414_v8 = vld [vmem:[#allocation2 + $0x78] sm:$0xe] }
 0x262   :  { %v3191_v18 = vrot.slane %v3190_v47, 4  ;;  %v3149_v49 = vrot.slane %v3148_v16, 4  ;;  %v3167_v6 = vrot.slane %v3165_v31, 5  ;;  %v3453_v28 = vrot.slane %v9200_v14, 5  ;;  %v3406_v47 = vld [vmem:[#allocation2 + $0x28] sm:$0xe] }
 0x263   :  { %v3177_v41 = vrot.slane %v3176_v60, 4  ;;  %v3405_v16 = vld [vmem:[#allocation2 + $0x20] sm:$0xe] }
 0x264   :  { %7705 = vmatmul.mubr.msk.bf16.gmra.mrb[20].mxu1 %vm1236_vm13, %v8218_v32  ;;  %v3121_v32 = vrot.slane %v3120_v46, 4  ;;  %v3200_v46 = vrot.slane %v3198_v25, 4  ;;  %v3168_v57 = vsel %vm8577_vm12, %v3163_v61, %v3167_v6  ;;  %v3154_v43 = vsel %vm8577_vm12, %v3149_v49, %v3153_v40  ;;  %v3407_v61 = vld [vmem:[#allocation2 + $0x30] sm:$0xe]  ;;  %v3410_v49 = vld [vmem:[#allocation2 + $0x48] sm:$0xe] }
 0x265   :  { %7712 = vmatprep.mubr.msk.bf16.mxu1 %vm1236_vm13, %v7061_v3  ;;  %v3139_v3 = vrot.slane %v3137_v59, 5  ;;  %v3179_v59 = vshll.u32 %v9269_v2, 16  ;;  %v7066_v15 = vcombine.low %v3154_v43, %v3168_v57  ;;  %v3454_v21 = vsel %vm8830_vm0, %v7079_v17, %v3453_v28 }
 0x266   :  { %v3126_v63 = vsel %vm8577_vm12, %v3121_v32, %v3125_v36  ;;  %v3204_v26 = vor.u32 %v3203_v1, %v3200_v46  ;;  %v7081_v46 = vrot.slane %v3405_v16, 9  ;;  %v3461_v1 = vrot.slane %v9209_v33, 5 }
 0x267   :  { %v3140_v19 = vsel %vm8577_vm12, %v3135_v45, %v3139_v3  ;;  %v3181_v36 = vrot.slane %v3179_v59, 5  ;;  %v3207_v3 = vshll.u32 %v9275_v7, 16  ;;  %v7086_v57 = vrot.slane %v3410_v49, 9  ;;  %v206_v49 = vld [vmem:[#allocation3 + $0x38] sm:$0x1] }
 0x268   :  { %v7065_v34 = vcombine.low %v3126_v63, %v3140_v19  ;;  %v3205_v32 = vrot.slane %v3204_v26, 4  ;;  %v3404_v19 = vld [vmem:[#allocation2 + $0x18] sm:$0xe]  ;;  %v3462_v6 = vsel %vm8830_vm0, %v7081_v46, %v3461_v1  ;;  %v3481_v26 = vrot.slane %v9235_v53, 5  ;;  %v258_v46 = vld [vmem:[#allocation3 + $0x24] sm:$0x1] }
 0x269   :  { %v3209_v56 = vrot.slane %v3207_v3, 5  ;;  %v7080_v25 = vrot.slane %v3404_v19, 9  ;;  %v3485_v43 = vrot.slane %v9230_v20, 5  ;;  %v3497_v20 = vrot.slane %v9261_v54, 5 }
 0x26b   :  { %v3210_v37 = vsel %vm8577_vm12, %v3205_v32, %v3209_v56  ;;  %v3458_v14 = vsel %vm8830_vm0, %v7080_v25, %v3457_v52  ;;  %v3493_v56 = vrot.slane %v9257_v23, 5  ;;  %v3501_v52 = vrot.slane %v9269_v2, 5 }
 0x26c   :  { %7713 = vmatmul.mubr.msk.bf16.vlgmr.msra.gmra.mrb[8].mxu1 %vm1236_vm13, %v7062_v10  ;;  %v3215_v10 = vshll.u32 %v2999_v12, 16  ;;  %v3182_v12 = vsel %vm8577_vm12, %v3177_v41, %v3181_v36  ;;  %v7099_v31 = vcombine.low %v3454_v21, %v3458_v14  ;;  %v3489_v36 = vrot.slane %v9237_v13, 5  ;;  %v3418_v21 = vld [vmem:[#allocation2 + $0x98] sm:$0xe] }
 0x26d   :  { %7729 = vmatpush3.bf16.msra.mxu1 %v9196_v29  ;;  %7716 = vmatprep.mubr.msk.bf16.mxu1 %vm1236_vm13, %v7063_v0  ;;  %v9263_v29 = vld [vmem:[#allocation2 + $0x8c] sm:$0x1]  ;;  %v3509_v14 = vrot.slane %v9275_v7, 5  ;;  %v7094_v2 = vrot.slane %v3418_v21, 9 }
 0x26e   :  { %7730 = vmatprep.subr.bf16.mxu1 %v8220_v62  ;;  %v3193_v44 = vshll.u32 %v9263_v29, 16  ;;  %v3217_v4 = vrot.slane %v3215_v10, 5  ;;  %v3505_v17 = vrot.slane %v9263_v29, 5 }
 0x270   :  { %v3195_v45 = vrot.slane %v3193_v44, 5  ;;  %v3218_v9 = vor.u32 %v3217_v4, %v3214_v58  ;;  %v3473_v44 = vrot.slane %v9219_v38, 5  ;;  %v7083_v58 = vrot.slane %v3407_v61, 9  ;;  %v3412_v38 = vld [vmem:[#allocation2 + $0x68] sm:$0xe] }
 0x271   :  { %7731 = vmatpush3.bf16.msra.mxu1 %v8220_v62  ;;  %v9277_v62 = vld [vmem:[#allocation2 + $0x9c] sm:$0x1]  ;;  %v3469_v4 = vrot.slane %v9217_v42, 5  ;;  %v3477_v42 = vrot.slane %v9221_v55, 5  ;;  %v3482_v55 = vsel %vm8830_vm0, %v7086_v57, %v3481_v26  ;;  %v188_v61 = vld [vmem:[#allocation3 + $0x8] sm:$0x1] }
 0x272   :  { %v3221_v0 = vshll.u32 %v9277_v62, 16  ;;  %v3196_v22 = vsel %vm8577_vm12, %v3191_v18, %v3195_v45  ;;  %v3219_v35 = vrot.slane %v3218_v9, 4  ;;  %v3409_v18 = vld [vmem:[#allocation2 + $0x40] sm:$0xe]  ;;  %v3513_v16 = vrot.slane %v9277_v62, 5 }
 0x273   :  { %v7067_v48 = vcombine.low %v3182_v12, %v3196_v22  ;;  %v3470_v41 = vsel %vm8830_vm0, %v7083_v58, %v3469_v4  ;;  %v7085_v33 = vrot.slane %v3409_v18, 9  ;;  %v3411_v9 = vld [vmem:[#allocation2 + $0x60] sm:$0xe]  ;;  %v189_v7 = vsel %vm9104_vm4, 0, %v188_v61  ;;  %v191_v4 = vld [vmem:[#allocation3 + $0x10] sm:$0x1] }
 0x274   :  { %7717 = vmatmul.mubr.msk.bf16.gmra.mrb[12].mxu1 %vm1236_vm13, %v7064_v5  ;;  %v3223_v51 = vrot.slane %v3221_v0, 5  ;;  %v3408_v5 = vld [vmem:[#allocation2 + $0x38] sm:$0xe]  ;;  %v7088_v0 = vrot.slane %v3412_v38, 9  ;;  %v7087_v22 = vrot.slane %v3411_v9, 9  ;;  %v259_v58 = vsel %vm9129_vm3, 0, %v258_v46 }
 0x275   :  { %7720 = vmatprep.mubr.msk.bf16.mxu1 %vm1236_vm13, %v7065_v34  ;;  %v7082_v34 = vrot.slane %v3406_v47, 9  ;;  %v7084_v60 = vrot.slane %v3408_v5, 9  ;;  %v3478_v3 = vsel %vm8830_vm0, %v7085_v33, %v3477_v42  ;;  %190 = vst [vmem:[#allocation3 + $0x8] sm:$0x1] %v189_v7  ;;  %260 = vst [vmem:[#allocation3 + $0x24] sm:$0x1] %v259_v58 }
 0x276   :  { %v3224_v10 = vsel %vm8577_vm12, %v3219_v35, %v3223_v51  ;;  %v3490_v53 = vsel %vm8830_vm0, %v7088_v0, %v3489_v36  ;;  %v7102_v12 = vcombine.low %v3478_v3, %v3482_v55  ;;  %v3486_v13 = vsel %vm8830_vm0, %v7087_v22, %v3485_v43  ;;  %v3415_v51 = vld [vmem:[#allocation2 + $0x80] sm:$0xe]  ;;  %v209_v57 = vld [vmem:[#allocation3 + $0x40] sm:$0x1]  ;;  %v270_v26 = vld [vmem:[#allocation3 + $0x44] sm:$0x1] }
 0x277   :  { %v7068_v63 = vcombine.low %v3210_v37, %v3224_v10  ;;  %v3466_v59 = vsel %vm8830_vm0, %v7082_v34, %v3465_v50  ;;  %v3474_v27 = vsel %vm8830_vm0, %v7084_v60, %v3473_v44  ;;  %v7103_v32 = vcombine.low %v3486_v13, %v3490_v53  ;;  %v3417_v10 = vld [vmem:[#allocation2 + $0x90] sm:$0xe]  ;;  %v249_v60 = vld [vmem:[#allocation3 + $0xc] sm:$0x1]  ;;  %v197_v44 = vld [vmem:[#allocation3 + $0x20] sm:$0x1] }
 0x278   :  { %v7100_v40 = vcombine.low %v3462_v6, %v3466_v59  ;;  %v7101_v45 = vcombine.low %v3470_v41, %v3474_v27  ;;  %v7090_v35 = vrot.slane %v3414_v8, 9  ;;  %v7091_v25 = vrot.slane %v3415_v51, 9  ;;  %v252_v59 = vld [vmem:[#allocation3 + $0x14] sm:$0x1]  ;;  %v267_v6 = vld [vmem:[#allocation3 + $0x3c] sm:$0x1] }
 0x279   :  { %v3514_v34 = vsel %vm8830_vm0, %v7094_v2, %v3513_v16  ;;  %v250_v62 = vsel %vm9129_vm3, 0, %v249_v60  ;;  %v198_v1 = vsel %vm9104_vm4, 0, %v197_v44  ;;  %v192_v18 = vsel %vm9104_vm4, 0, %v191_v4  ;;  %v200_v41 = vld [vmem:[#allocation3 + $0x28] sm:$0x1]  ;;  %v9416_v60 = vld [vmem:[%s10268_s7] sm:$0xff]  }
 0x27a   :  { %v3498_v37 = vsel %vm8830_vm0, %v7090_v35, %v3497_v20  ;;  %v3502_v5 = vsel %vm8830_vm0, %v7091_v25, %v3501_v52  ;;  %251 = vst [vmem:[#allocation3 + $0xc] sm:$0x1] %v250_v62  ;;  %199 = vst [vmem:[#allocation3 + $0x20] sm:$0x1] %v198_v1  ;;  %v253_v27 = vsel %vm9129_vm3, 0, %v252_v59  ;;  %v207_v38 = vsel %vm9104_vm4, 0, %v206_v49 }
 0x27b   :  { %193 = vst [vmem:[#allocation3 + $0x10] sm:$0x1] %v192_v18  ;;  %254 = vst [vmem:[#allocation3 + $0x14] sm:$0x1] %v253_v27  ;;  %v201_v33 = vsel %vm9104_vm4, 0, %v200_v41  ;;  %v210_v9 = vsel %vm9104_vm4, 0, %v209_v57 }
 0x27c   :  { %7721 = vmatmul.mubr.msk.bf16.gmra.mrb[16].mxu1 %vm1236_vm13, %v7066_v15  ;;  %v3416_v15 = vld [vmem:[#allocation2 + $0x88] sm:$0xe]  ;;  %208 = vst [vmem:[#allocation3 + $0x38] sm:$0x1] %v207_v38  ;;  %202 = vst [vmem:[#allocation3 + $0x28] sm:$0x1] %v201_v33 }
 0x27d   :  { %7724 = vmatprep.mubr.msk.bf16.mxu1 %vm1236_vm13, %v7067_v48  ;;  %v3413_v48 = vld [vmem:[#allocation2 + $0x70] sm:$0xe]  ;;  %v7092_v19 = vrot.slane %v3416_v15, 9  ;;  %v271_v0 = vsel %vm9129_vm3, 0, %v270_v26  ;;  %211 = vst [vmem:[#allocation3 + $0x40] sm:$0x1] %v210_v9 }
 0x27e   :  { %v7089_v28 = vrot.slane %v3413_v48, 9  ;;  %272 = vst [vmem:[#allocation3 + $0x44] sm:$0x1] %v271_v0  ;;  %v203_v36 = vld [vmem:[#allocation3 + $0x30] sm:$0x1]  ;;  %v8221_v52 = vld [vmem:[%s10268_s7 + $0x8] sm:$0xff]  }
 0x27f   :  { %v3506_v54 = vsel %vm8830_vm0, %v7092_v19, %v3505_v17  ;;  %v264_v22 = vld [vmem:[#allocation3 + $0x34] sm:$0x1]  ;;  %v224_v43 = vld [vmem:[#allocation3 + $0x68] sm:$0x1]  ;;  %v204_v3 = vsel %vm9104_vm4, 0, %v203_v36  ;;  %7748 = vmatprep.subr.bf16.mxu0 %v8221_v52 }
 0x280   :  { %v3494_v47 = vsel %vm8830_vm0, %v7089_v28, %v3493_v56  ;;  %v7105_v23 = vcombine.low %v3502_v5, %v3506_v54  ;;  %v265_v55 = vsel %vm9129_vm3, 0, %v264_v22  ;;  %v225_v53 = vsel %vm9104_vm4, 0, %v224_v43  ;;  %v285_v8 = vld [vmem:[#allocation3 + $0x6c] sm:$0x1]  ;;  %205 = vst [vmem:[#allocation3 + $0x30] sm:$0x1] %v204_v3  ;;  %7749 = vmatpush3.bf16.msra.mxu0 %v8221_v52 }
 0x281   :  { %v7104_v29 = vcombine.low %v3494_v47, %v3498_v37  ;;  %266 = vst [vmem:[#allocation3 + $0x34] sm:$0x1] %v265_v55  ;;  %226 = vst [vmem:[#allocation3 + $0x68] sm:$0x1] %v225_v53  ;;  %v286_v15 = vsel %vm9129_vm3, 0, %v285_v8  ;;  %7766 = vmatprep.subr.bf16.mxu0 %v9416_v60 }
 0x282   :  { %287 = vst [vmem:[#allocation3 + $0x6c] sm:$0x1] %v286_v15  ;;  %v279_v13 = vld [vmem:[#allocation3 + $0x5c] sm:$0x1]  ;;  %v227_v48 = vld [vmem:[#allocation3 + $0x70] sm:$0x1] }
 0x283   :  { %v280_v35 = vsel %vm9129_vm3, 0, %v279_v13  ;;  %v228_v20 = vsel %vm9104_vm4, 0, %v227_v48  ;;  %v288_v51 = vld [vmem:[#allocation3 + $0x74] sm:$0x1]  ;;  %v221_v17 = vld [vmem:[#allocation3 + $0x60] sm:$0x1] }
 0x284   :  { %7725 = vmatmul.mubr.msk.bf16.gmra.mrb[20].mxu1 %vm1236_vm13, %v7068_v63  ;;  %v7093_v63 = vrot.slane %v3417_v10, 9  ;;  %281 = vst [vmem:[#allocation3 + $0x5c] sm:$0x1] %v280_v35  ;;  %229 = vst [vmem:[#allocation3 + $0x70] sm:$0x1] %v228_v20  ;;  %v289_v19 = vsel %vm9129_vm3, 0, %v288_v51 }
 0x285   :  { %7732 = vmatprep.mubr.msk.bf16.mxu1 %vm1236_vm13, %v7099_v31  ;;  %290 = vst [vmem:[#allocation3 + $0x74] sm:$0x1] %v289_v19  ;;  %v282_v28 = vld [vmem:[#allocation3 + $0x64] sm:$0x1]  ;;  %v222_v56 = vsel %vm9104_vm4, 0, %v221_v17 }
 0x286   :  { %v3510_v31 = vsel %vm8830_vm0, %v7093_v63, %v3509_v14  ;;  %v283_v25 = vsel %vm9129_vm3, 0, %v282_v28  ;;  %223 = vst [vmem:[#allocation3 + $0x60] sm:$0x1] %v222_v56  ;;  %v236_v37 = vld [vmem:[#allocation3 + $0x88] sm:$0x1] }
 0x287   :  { %v7106_v50 = vcombine.low %v3510_v31, %v3514_v34  ;;  %284 = vst [vmem:[#allocation3 + $0x64] sm:$0x1] %v283_v25  ;;  %v297_v10 = vld [vmem:[#allocation3 + $0x8c] sm:$0x1]  ;;  %v237_v54 = vsel %vm9104_vm4, 0, %v236_v37 }
 0x288   :  { %v298_v21 = vsel %vm9129_vm3, 0, %v297_v10  ;;  %238 = vst [vmem:[#allocation3 + $0x88] sm:$0x1] %v237_v54  ;;  %v230_v47 = vld [vmem:[#allocation3 + $0x78] sm:$0x1] }
 0x289   :  { %299 = vst [vmem:[#allocation3 + $0x8c] sm:$0x1] %v298_v21  ;;  %v239_v5 = vld [vmem:[#allocation3 + $0x90] sm:$0x1]  ;;  %v231_v63 = vsel %vm9104_vm4, 0, %v230_v47 }
 0x28a   :  { %v240_v14 = vsel %vm9104_vm4, 0, %v239_v5  ;;  %v300_v2 = vld [vmem:[#allocation3 + $0x94] sm:$0x1]  ;;  %232 = vst [vmem:[#allocation3 + $0x78] sm:$0x1] %v231_v63 }
 0x28b   :  { %241 = vst [vmem:[#allocation3 + $0x90] sm:$0x1] %v240_v14  ;;  %v301_v16 = vsel %vm9129_vm3, 0, %v300_v2  ;;  %v233_v31 = vld [vmem:[#allocation3 + $0x80] sm:$0x1] }
 0x28c   :  { %7733 = vmatmul.mubr.msk.bf16.vlgmr.msra.gmra.mrb[8].mxu1 %vm1236_vm13, %v7100_v40  ;;  %v268_v40 = vsel %vm9129_vm3, 0, %v267_v6  ;;  %302 = vst [vmem:[#allocation3 + $0x94] sm:$0x1] %v301_v16  ;;  %v234_v34 = vsel %vm9104_vm4, 0, %v233_v31  ;;  %v185_v61 = vld [vmem:[#allocation3] sm:$0x1] }
 0x28d   :  { %7736 = vmatprep.mubr.msk.bf16.mxu1 %vm1236_vm13, %v7101_v45  ;;  %269 = vst [vmem:[#allocation3 + $0x3c] sm:$0x1] %v268_v40  ;;  %v261_v45 = vld [vmem:[#allocation3 + $0x2c] sm:$0x1]  ;;  %235 = vst [vmem:[#allocation3 + $0x80] sm:$0x1] %v234_v34 }
 0x28e   :  { %v262_v42 = vsel %vm9129_vm3, 0, %v261_v45  ;;  %v186_v62 = vsel %vm9104_vm4, 0, %v185_v61  ;;  %v246_v44 = vld [vmem:[#allocation3 + $0x4] sm:$0x1]  ;;  %v215_v1 = vld [vmem:[#allocation3 + $0x50] sm:$0x1] }
 0x28f   :  { %263 = vst [vmem:[#allocation3 + $0x2c] sm:$0x1] %v262_v42  ;;  %187 = vst [vmem:[#allocation3] sm:$0x1] %v186_v62  ;;  %v247_v46 = vsel %vm9129_vm3, 0, %v246_v44  ;;  %v216_v4 = vsel %vm9104_vm4, 0, %v215_v1 }
 0x290   :  { %248 = vst [vmem:[#allocation3 + $0x4] sm:$0x1] %v247_v46  ;;  %v276_v58 = vld [vmem:[#allocation3 + $0x54] sm:$0x1]  ;;  %217 = vst [vmem:[#allocation3 + $0x50] sm:$0x1] %v216_v4 }
 0x291   :  { %v277_v59 = vsel %vm9129_vm3, 0, %v276_v58  ;;  %v9436_v45 = vld [vmem:[%s10269_s5] ss:$0 sm:$0xff]  ;;  %v3994_v31 = vld [vmem:[#allocation3 + $0x18] sm:$0xf] }
 0x292   :  { %278 = vst [vmem:[#allocation3 + $0x54] sm:$0x1] %v277_v59  ;;  %v9444_v0 = vld [vmem:[%s10270_s6] ss:$0 sm:$0xff]  ;;  %v3997_v34 = vld [vmem:[#allocation3 + $0x1c] sm:$0x1] }
 0x293   :  { %v3982_v1 = vld [vmem:[#allocation3 + $0x8] sm:$0xf] }
 0x294   :  { %7737 = vmatmul.mubr.msk.bf16.gmra.mrb[12].mxu1 %vm1236_vm13, %v7102_v12  ;;  %v218_v12 = vld [vmem:[#allocation3 + $0x58] sm:$0x1] }
 0x295   :  { %7740 = vmatprep.mubr.msk.bf16.mxu1 %vm1236_vm13, %v7103_v32  ;;  %v219_v32 = vsel %vm9104_vm4, 0, %v218_v12 }
 0x296   :  { %220 = vst [vmem:[#allocation3 + $0x58] sm:$0x1] %v219_v32  ;;  %v9429_v18 = vld [vmem:[#allocation3] sm:$0xf] }
 0x297   :  { %v4113_v27 = vshrl.u32 %v9429_v18, 16  ;;  %v4116_v49 = vshll.u32 %v9429_v18, 16  ;;  %v4086_v6 = vld [vmem:[#allocation3 + $0x50] sm:$0xf]  ;;  %v9438_v42 = vld [vmem:[#allocation3 + $0x4] sm:$0x1] }
 0x298   :  { %v4225_v41 = vshrl.u32 %v4086_v6, 16  ;;  %v4228_v33 = vshll.u32 %v4086_v6, 16  ;;  %v4122_v26 = vshll.u32 %v9438_v42, 16 }
 0x299   :  { %v4115_v38 = vrot.slane %v4113_v27, 4  ;;  %v4118_v40 = vrot.slane %v4116_v49, 5  ;;  %v4104_v32 = vld [vmem:[#allocation3 + $0x54] sm:$0x1] }
 0x29a   :  { %v4227_v36 = vrot.slane %v4225_v41, 4  ;;  %v4230_v22 = vrot.slane %v4228_v33, 5  ;;  %v9452_v48 = vrot.slane %v4122_v26, 5  ;;  %v4234_v19 = vshll.u32 %v4104_v32, 16 }
 0x29b   :  { %v4119_v57 = vor.u32 %v4118_v40, %v4115_v38  ;;  %v3985_v38 = vld [vmem:[#allocation3 + $0xc] sm:$0x1] }
 0x29c   :  { %7741 = vmatmul.mubr.msk.bf16.gmra.mrb[16].mxu1 %vm1236_vm13, %v7104_v29  ;;  %v291_v29 = vld [vmem:[#allocation3 + $0x7c] sm:$0x1]  ;;  %v4231_v51 = vor.u32 %v4230_v22, %v4227_v36  ;;  %v9464_v5 = vrot.slane %v4234_v19, 5  ;;  %v4000_v36 = vld [vmem:[#allocation3 + $0x20] sm:$0xf] }
 0x29d   :  { %7744 = vmatprep.mubr.msk.bf16.mxu1 %vm1236_vm13, %v7105_v23  ;;  %v292_v23 = vsel %vm9129_vm3, 0, %v291_v29  ;;  %v9450_v13 = vrot.slane %v4119_v57, 4 }
 0x29e   :  { %293 = vst [vmem:[#allocation3 + $0x7c] sm:$0x1] %v292_v23  ;;  %v9462_v29 = vrot.slane %v4231_v51, 4  ;;  %v3991_v51 = vld [vmem:[#allocation3 + $0x14] sm:$0x1] }
 0x29f   :  { %v4125_v10 = vsel %vm8577_vm12, %v9450_v13, %v9452_v48 }
 0x2a4   :  { %7745 = vmatmul.mubr.msk.bf16.gmra.mrb[20].mxu1 %vm1236_vm13, %v7106_v50  ;;  %v294_v50 = vld [vmem:[#allocation3 + $0x84] sm:$0x1] }
 0x2a5   :  { %v295_v7 = vsel %vm9129_vm3, 0, %v294_v50 }
 0x2a6   :  { %296 = vst [vmem:[#allocation3 + $0x84] sm:$0x1] %v295_v7 }
 0x35f   :  { %v7734_v9 = vpop.f32.mrb[8].mxu1 }
 0x360   :  { %v3702_v43 = vmul.f32 %v7734_v9, %v9436_v45  ;;  %v3614_v3 = vpop.f32.mrb[9].mxu1 }
 0x361   :  { %v3700_v55 = vmul.f32 %v9436_v45, %v3614_v3  ;;  %v7735_v53 = vpop.f32.mrb[10].mxu1 }
 0x362   :  { %v3725_v8 = vadd.f32 %v9444_v0, %v3702_v43  ;;  %v3703_v15 = vmul.f32 %v7735_v53, %v9436_v45  ;;  %v3617_v12 = vpop.f32.mrb[11].mxu1 }
 0x363   :  { %v3723_v35 = vadd.f32 %v9444_v0, %v3700_v55  ;;  %v3701_v20 = vmul.f32 %v9436_v45, %v3617_v12  ;;  %v4003_v55 = vld [vmem:[#allocation3 + $0x24] sm:$0x1] }
 0x364   :  { %v3741_v17 = vmax.f32 %v3725_v8, 0.0  ;;  %v3726_v28 = vadd.f32 %v9444_v0, %v3703_v15 }
 0x365   :  { %v3739_v56 = vmax.f32 %v3723_v35, 0.0  ;;  %v3724_v25 = vadd.f32 %v9444_v0, %v3701_v20  ;;  %v3988_v20 = vld [vmem:[#allocation3 + $0x10] sm:$0xf] }
 0x366   :  { %v7356_v52 = vpack.c.bf16 %v3741_v17, %v3741_v17  ;;  %v3742_v37 = vmax.f32 %v3726_v28, 0.0 }
 0x367   :  { %v7354_v54 = vpack.c.bf16 %v3739_v56, %v3739_v56  ;;  %v3740_v21 = vmax.f32 %v3724_v25, 0.0  ;;  %v7738_v47 = vpop.f32.mrb[12].mxu1 }
 0x368   :  { %v3836_v63 = vshrl.u32 %v7356_v52, 16  ;;  %v3839_v23 = vshll.u32 %v7356_v52, 16  ;;  %v7357_v14 = vpack.c.bf16 %v3742_v37, %v3742_v37  ;;  %v3706_v2 = vmul.f32 %v7738_v47, %v9436_v45  ;;  %v3630_v16 = vpop.f32.mrb[13].mxu1 }
 0x369   :  { %v3820_v50 = vshrl.u32 %v7354_v54, 16  ;;  %v3823_v61 = vshll.u32 %v7354_v54, 16  ;;  %v7355_v7 = vpack.c.bf16 %v3740_v21, %v3740_v21  ;;  %v3704_v62 = vmul.f32 %v9436_v45, %v3630_v16  ;;  %v7739_v44 = vpop.f32.mrb[14].mxu1 }
 0x36a   :  { %v3838_v46 = vrot.slane %v3836_v63, 7  ;;  %v3844_v58 = vshrl.u32 %v7357_v14, 16  ;;  %v3847_v4 = vshll.u32 %v7357_v14, 16  ;;  %v3729_v59 = vadd.f32 %v9444_v0, %v3706_v2  ;;  %v3633_v27 = vpop.f32.mrb[15].mxu1 }
 0x36b   :  { %v3822_v6 = vrot.slane %v3820_v50, 7  ;;  %v3828_v40 = vshrl.u32 %v7355_v7, 16  ;;  %v3831_v41 = vshll.u32 %v7355_v7, 16  ;;  %v3727_v33 = vadd.f32 %v9444_v0, %v3704_v62 }
 0x36c   :  { %v3841_v57 = vor.u32 %v3839_v23, %v3838_v46  ;;  %v3842_v26 = vrot.slane %v3838_v46, 4  ;;  %v3846_v9 = vrot.slane %v3844_v58, 7  ;;  %v3745_v22 = vmax.f32 %v3729_v59, 0.0  ;;  %v4021_v59 = vld [vmem:[#allocation3 + $0x3c] sm:$0x1] }
 0x36d   :  { %v3825_v43 = vor.u32 %v3823_v61, %v3822_v6  ;;  %v3826_v3 = vrot.slane %v3822_v6, 4  ;;  %v3830_v53 = vrot.slane %v3828_v40, 7  ;;  %v3743_v8 = vmax.f32 %v3727_v33, 0.0  ;;  %v4006_v40 = vld [vmem:[#allocation3 + $0x28] sm:$0xf] }
 0x36e   :  { %v3995_v15 = vsel %vm9471_vm6, %v3841_v57, %v3994_v31  ;;  %v3998_v12 = vsel %vm9104_vm4, %v3842_v26, %v3997_v34  ;;  %v3849_v32 = vor.u32 %v3847_v4, %v3846_v9  ;;  %v3850_v35 = vrot.slane %v3846_v9, 4 }
 0x36f   :  { %3996 = vst [vmem:[#allocation3 + $0x18] sm:$0xf] %v3995_v15  ;;  %3999 = vst [vmem:[#allocation3 + $0x1c] sm:$0x1] %v3998_v12  ;;  %v3983_v19 = vsel %vm9471_vm6, %v3825_v43, %v3982_v1  ;;  %v3986_v17 = vsel %vm9104_vm4, %v3826_v3, %v3985_v38  ;;  %v3833_v28 = vor.u32 %v3831_v41, %v3830_v53  ;;  %v3834_v56 = vrot.slane %v3830_v53, 4  ;;  %v7742_v25 = vpop.f32.mrb[16].mxu1 }
 0x370   :  { %3984 = vst [vmem:[#allocation3 + $0x8] sm:$0xf] %v3983_v19  ;;  %3987 = vst [vmem:[#allocation3 + $0xc] sm:$0x1] %v3986_v17  ;;  %v4001_v52 = vsel %vm9471_vm6, %v3849_v32, %v4000_v36  ;;  %v4004_v37 = vsel %vm9104_vm4, %v3850_v35, %v4003_v55  ;;  %v7360_v54 = vpack.c.bf16 %v3745_v22, %v3745_v22  ;;  %v3646_v47 = vpop.f32.mrb[17].mxu1 }
 0x371   :  { %v7358_v21 = vpack.c.bf16 %v3743_v8, %v3743_v8  ;;  %4002 = vst [vmem:[#allocation3 + $0x20] sm:$0xf] %v4001_v52  ;;  %4005 = vst [vmem:[#allocation3 + $0x24] sm:$0x1] %v4004_v37  ;;  %v3989_v63 = vsel %vm9471_vm6, %v3833_v28, %v3988_v20  ;;  %v3992_v23 = vsel %vm9104_vm4, %v3834_v56, %v3991_v51  ;;  %v7743_v16 = vpop.f32.mrb[18].mxu1 }
 0x372   :  { %v3707_v14 = vmul.f32 %v7739_v44, %v9436_v45  ;;  %v3705_v2 = vmul.f32 %v9436_v45, %v3633_v27  ;;  %3990 = vst [vmem:[#allocation3 + $0x10] sm:$0xf] %v3989_v63  ;;  %3993 = vst [vmem:[#allocation3 + $0x14] sm:$0x1] %v3992_v23  ;;  %v3868_v31 = vshrl.u32 %v7360_v54, 16  ;;  %v3871_v34 = vshll.u32 %v7360_v54, 16 }
 0x373   :  { %v3852_v50 = vshrl.u32 %v7358_v21, 16  ;;  %v3855_v61 = vshll.u32 %v7358_v21, 16  ;;  %v3649_v7 = vpop.f32.mrb[19].mxu1  ;;  %v3710_v1 = vmul.f32 %v7742_v25, %v9436_v45  ;;  %v3708_v58 = vmul.f32 %v9436_v45, %v3646_v47  ;;  %v4018_v44 = vld [vmem:[#allocation3 + $0x38] sm:$0xf] }
 0x374   :  { %v3730_v62 = vadd.f32 %v9444_v0, %v3707_v14  ;;  %v3728_v46 = vadd.f32 %v9444_v0, %v3705_v2  ;;  %v3870_v4 = vrot.slane %v3868_v31, 7  ;;  %v3711_v6 = vmul.f32 %v7743_v16, %v9436_v45  ;;  %v4009_v41 = vld [vmem:[#allocation3 + $0x2c] sm:$0x1]  ;;  %v4024_v37 = vld [vmem:[#allocation3 + $0x40] sm:$0xf] }
 0x375   :  { %v3854_v27 = vrot.slane %v3852_v50, 7  ;;  %v3709_v38 = vmul.f32 %v9436_v45, %v3649_v7  ;;  %v3733_v26 = vadd.f32 %v9444_v0, %v3710_v1  ;;  %v3731_v9 = vadd.f32 %v9444_v0, %v3708_v58  ;;  %v4027_v2 = vld [vmem:[#allocation3 + $0x44] sm:$0x1]  ;;  %v4012_v31 = vld [vmem:[#allocation3 + $0x30] sm:$0xf] }
 0x376   :  { %v3746_v33 = vmax.f32 %v3730_v62, 0.0  ;;  %v3744_v57 = vmax.f32 %v3728_v46, 0.0  ;;  %v3873_v36 = vor.u32 %v3871_v34, %v3870_v4  ;;  %v3874_v22 = vrot.slane %v3870_v4, 4 }
 0x377   :  { %v3857_v43 = vor.u32 %v3855_v61, %v3854_v27  ;;  %v3858_v3 = vrot.slane %v3854_v27, 4  ;;  %v3749_v8 = vmax.f32 %v3733_v26, 0.0  ;;  %v3747_v15 = vmax.f32 %v3731_v9, 0.0  ;;  %v7746_v12 = vpop.f32.mrb[20].mxu1  ;;  %v4015_v61 = vld [vmem:[#allocation3 + $0x34] sm:$0x1] }
 0x378   :  { %v7361_v55 = vpack.c.bf16 %v3746_v33, %v3746_v33  ;;  %v7359_v53 = vpack.c.bf16 %v3744_v57, %v3744_v57  ;;  %v4019_v32 = vsel %vm9471_vm6, %v3873_v36, %v4018_v44  ;;  %v4022_v35 = vsel %vm9104_vm4, %v3874_v22, %v4021_v59  ;;  %v3662_v19 = vpop.f32.mrb[21].mxu1  ;;  %v4042_v27 = vld [vmem:[#allocation3 + $0x68] sm:$0xf] }
 0x379   :  { %v4007_v20 = vsel %vm9471_vm6, %v3857_v43, %v4006_v40  ;;  %v4010_v51 = vsel %vm9104_vm4, %v3858_v3, %v4009_v41  ;;  %4020 = vst [vmem:[#allocation3 + $0x38] sm:$0xf] %v4019_v32  ;;  %4023 = vst [vmem:[#allocation3 + $0x3c] sm:$0x1] %v4022_v35  ;;  %v7747_v52 = vpop.f32.mrb[22].mxu1  ;;  %v7364_v54 = vpack.c.bf16 %v3749_v8, %v3749_v8 }
 0x37a   :  { %4008 = vst [vmem:[#allocation3 + $0x28] sm:$0xf] %v4007_v20  ;;  %4011 = vst [vmem:[#allocation3 + $0x2c] sm:$0x1] %v4010_v51  ;;  %v3876_v17 = vshrl.u32 %v7361_v55, 16  ;;  %v3879_v28 = vshll.u32 %v7361_v55, 16  ;;  %v7362_v21 = vpack.c.bf16 %v3747_v15, %v3747_v15  ;;  %v3734_v47 = vadd.f32 %v9444_v0, %v3711_v6 }
 0x37b   :  { %v3860_v56 = vshrl.u32 %v7359_v53, 16  ;;  %v3863_v25 = vshll.u32 %v7359_v53, 16  ;;  %v3732_v63 = vadd.f32 %v9444_v0, %v3709_v38  ;;  %v3665_v23 = vpop.f32.mrb[23].mxu1  ;;  %v3714_v34 = vmul.f32 %v7746_v12, %v9436_v45  ;;  %v4045_v6 = vld [vmem:[#allocation3 + $0x6c] sm:$0x1] }
 0x37c   :  { %v3878_v14 = vrot.slane %v3876_v17, 7  ;;  %v3712_v50 = vmul.f32 %v9436_v45, %v3662_v19  ;;  %v3900_v7 = vshrl.u32 %v7364_v54, 16  ;;  %v3903_v62 = vshll.u32 %v7364_v54, 16  ;;  %v4030_v38 = vld [vmem:[#allocation3 + $0x58] sm:$0xf] }
 0x37d   :  { %v3862_v16 = vrot.slane %v3860_v56, 7  ;;  %v3884_v46 = vshrl.u32 %v7362_v21, 16  ;;  %v3887_v1 = vshll.u32 %v7362_v21, 16  ;;  %v3750_v33 = vmax.f32 %v3734_v47, 0.0  ;;  %v4033_v43 = vld [vmem:[#allocation3 + $0x5c] sm:$0x1] }
 0x37e   :  { %v3881_v58 = vor.u32 %v3879_v28, %v3878_v14  ;;  %v3882_v4 = vrot.slane %v3878_v14, 4  ;;  %v3902_v40 = vrot.slane %v3900_v7, 7  ;;  %v3748_v57 = vmax.f32 %v3732_v63, 0.0  ;;  %v9532_v28 = vld [vmem:[#allocation3 + $0x8] sm:$0xf] }
 0x37f   :  { %v3865_v44 = vor.u32 %v3863_v25, %v3862_v16  ;;  %v3866_v59 = vrot.slane %v3862_v16, 4  ;;  %v3886_v41 = vrot.slane %v3884_v46, 7  ;;  %v7365_v15 = vpack.c.bf16 %v3750_v33, %v3750_v33  ;;  %v4048_v16 = vld [vmem:[#allocation3 + $0x70] sm:$0xf]  ;;  %v4036_v7 = vld [vmem:[#allocation3 + $0x60] sm:$0xf] }
 0x380   :  { %v4025_v26 = vsel %vm9471_vm6, %v3881_v58, %v4024_v37  ;;  %v4028_v9 = vsel %vm9104_vm4, %v3882_v4, %v4027_v2  ;;  %v3905_v3 = vor.u32 %v3903_v62, %v3902_v40  ;;  %v3906_v55 = vrot.slane %v3902_v40, 4  ;;  %v4039_v62 = vld [vmem:[#allocation3 + $0x64] sm:$0x1] }
 0x381   :  { %v4013_v36 = vsel %vm9471_vm6, %v3865_v44, %v4012_v31  ;;  %v4016_v22 = vsel %vm9104_vm4, %v3866_v59, %v4015_v61  ;;  %4026 = vst [vmem:[#allocation3 + $0x40] sm:$0xf] %v4025_v26  ;;  %4029 = vst [vmem:[#allocation3 + $0x44] sm:$0x1] %v4028_v9  ;;  %v3889_v53 = vor.u32 %v3887_v1, %v3886_v41  ;;  %v3890_v8 = vrot.slane %v3886_v41, 4 }
 0x382   :  { %4014 = vst [vmem:[#allocation3 + $0x30] sm:$0xf] %v4013_v36  ;;  %4017 = vst [vmem:[#allocation3 + $0x34] sm:$0x1] %v4016_v22  ;;  %v7363_v12 = vpack.c.bf16 %v3748_v57, %v3748_v57  ;;  %v3737_v32 = vadd.f32 %v9444_v0, %v3714_v34  ;;  %v3735_v35 = vadd.f32 %v9444_v0, %v3712_v50  ;;  %v3908_v56 = vshrl.u32 %v7365_v15, 16 }
 0x383   :  { %v4043_v20 = vsel %vm9471_vm6, %v3905_v3, %v4042_v27  ;;  %v4046_v51 = vsel %vm9104_vm4, %v3906_v55, %v4045_v6  ;;  %v4031_v19 = vsel %vm9471_vm6, %v3889_v53, %v4030_v38  ;;  %v4034_v17 = vsel %vm9104_vm4, %v3890_v8, %v4033_v43  ;;  %v4051_v61 = vld [vmem:[#allocation3 + $0x74] sm:$0x1]  ;;  %v9542_v41 = vld [vmem:[#allocation3 + $0x10] sm:$0xf]  ;;  %v4066_v9 = vld [vmem:[#allocation3 + $0x88] sm:$0xf] }
 0x384   :  { %4044 = vst [vmem:[#allocation3 + $0x68] sm:$0xf] %v4043_v20  ;;  %4047 = vst [vmem:[#allocation3 + $0x6c] sm:$0x1] %v4046_v51  ;;  %v3911_v25 = vshll.u32 %v7365_v15, 16  ;;  %v3892_v37 = vshrl.u32 %v7363_v12, 16  ;;  %v3715_v63 = vmul.f32 %v7747_v52, %v9436_v45  ;;  %v3713_v14 = vmul.f32 %v9436_v45, %v3665_v23 }
 0x385   :  { %4032 = vst [vmem:[#allocation3 + $0x58] sm:$0xf] %v4031_v19  ;;  %4035 = vst [vmem:[#allocation3 + $0x5c] sm:$0x1] %v4034_v17  ;;  %v3895_v54 = vshll.u32 %v7363_v12, 16  ;;  %v3753_v21 = vmax.f32 %v3737_v32, 0.0 }
 0x386   :  { %v3751_v47 = vmax.f32 %v3735_v35, 0.0  ;;  %v3910_v2 = vrot.slane %v3908_v56, 7  ;;  %v3894_v31 = vrot.slane %v3892_v37, 7  ;;  %v4127_v34 = vshrl.u32 %v9532_v28, 16  ;;  %v9540_v23 = vld [vmem:[#allocation3 + $0xc] sm:$0x1] }
 0x387   :  { %v4130_v50 = vshll.u32 %v9532_v28, 16  ;;  %v7368_v46 = vpack.c.bf16 %v3753_v21, %v3753_v21  ;;  %v3738_v58 = vadd.f32 %v9444_v0, %v3715_v63  ;;  %v3736_v4 = vadd.f32 %v9444_v0, %v3713_v14  ;;  %v4069_v36 = vld [vmem:[#allocation3 + $0x8c] sm:$0x1]  ;;  %v4054_v3 = vld [vmem:[#allocation3 + $0x78] sm:$0xf] }
 0x388   :  { %v7366_v1 = vpack.c.bf16 %v3751_v47, %v3751_v47  ;;  %v3913_v44 = vor.u32 %v3911_v25, %v3910_v2  ;;  %v3914_v52 = vrot.slane %v3910_v2, 4  ;;  %v3897_v59 = vor.u32 %v3895_v54, %v3894_v31  ;;  %v4057_v8 = vld [vmem:[#allocation3 + $0x7c] sm:$0x1]  ;;  %v9554_v54 = vld [vmem:[#allocation3 + $0x18] sm:$0xf] }
 0x389   :  { %v3898_v45 = vrot.slane %v3894_v31, 4  ;;  %v3932_v27 = vshrl.u32 %v7368_v46, 16  ;;  %v3935_v6 = vshll.u32 %v7368_v46, 16  ;;  %v3754_v55 = vmax.f32 %v3738_v58, 0.0  ;;  %v4075_v46 = vld [vmem:[#allocation3 + $0x94] sm:$0x1] }
 0x38a   :  { %v3916_v38 = vshrl.u32 %v7366_v1, 16  ;;  %v3919_v40 = vshll.u32 %v7366_v1, 16  ;;  %v4049_v33 = vsel %vm9471_vm6, %v3913_v44, %v4048_v16  ;;  %v4052_v57 = vsel %vm9104_vm4, %v3914_v52, %v4051_v61  ;;  %v9568_v16 = vld [vmem:[#allocation3 + $0x1c] sm:$0x1] }
 0x38b   :  { %v4037_v0 = vsel %vm9471_vm6, %v3897_v59, %v4036_v7  ;;  %v4040_v26 = vsel %vm9104_vm4, %v3898_v45, %v4039_v62  ;;  %4050 = vst [vmem:[#allocation3 + $0x70] sm:$0xf] %v4049_v33  ;;  %4053 = vst [vmem:[#allocation3 + $0x74] sm:$0x1] %v4052_v57  ;;  %v3934_v22 = vrot.slane %v3932_v27, 7  ;;  %v3752_v53 = vmax.f32 %v3736_v4, 0.0 }
 0x38c   :  { %4038 = vst [vmem:[#allocation3 + $0x60] sm:$0xf] %v4037_v0  ;;  %4041 = vst [vmem:[#allocation3 + $0x64] sm:$0x1] %v4040_v26  ;;  %v3918_v43 = vrot.slane %v3916_v38, 7  ;;  %v4129_v15 = vrot.slane %v4127_v34, 4  ;;  %v7369_v56 = vpack.c.bf16 %v3754_v55, %v3754_v55  ;;  %v4237_v21 = vsel %vm8577_vm12, %v9462_v29, %v9464_v5 }
 0x38d   :  { %v4132_v12 = vrot.slane %v4130_v50, 5  ;;  %v4136_v32 = vshll.u32 %v9540_v23, 16  ;;  %v4141_v35 = vshrl.u32 %v9542_v41, 16  ;;  %v3937_v20 = vor.u32 %v3935_v6, %v3934_v22  ;;  %v9570_v7 = vld [vmem:[#allocation3 + $0x14] sm:$0x1] }
 0x38e   :  { %v3938_v51 = vrot.slane %v3934_v22, 4  ;;  %v3921_v19 = vor.u32 %v3919_v40, %v3918_v43  ;;  %v3922_v17 = vrot.slane %v3918_v43, 4  ;;  %v7367_v25 = vpack.c.bf16 %v3752_v53, %v3752_v53  ;;  %v4072_v62 = vld [vmem:[#allocation3 + $0x90] sm:$0xf]  ;;  %v4060_v45 = vld [vmem:[#allocation3 + $0x80] sm:$0xf] }
 0x38f   :  { %v4133_v37 = vor.u32 %v4132_v12, %v4129_v15  ;;  %v4067_v47 = vsel %vm9471_vm6, %v3937_v20, %v4066_v9  ;;  %v3940_v31 = vshrl.u32 %v7369_v56, 16  ;;  %v3943_v34 = vshll.u32 %v7369_v56, 16  ;;  %v4063_v38 = vld [vmem:[#allocation3 + $0x84] sm:$0x1]  ;;  %v9579_v43 = vld [vmem:[#allocation3 + $0x20] sm:$0xf] }
 0x390   :  { %v4070_v63 = vsel %vm9104_vm4, %v3938_v51, %v4069_v36  ;;  %v4055_v14 = vsel %vm9471_vm6, %v3921_v19, %v4054_v3  ;;  %v4058_v2 = vsel %vm9104_vm4, %v3922_v17, %v4057_v8  ;;  %4068 = vst [vmem:[#allocation3 + $0x88] sm:$0xf] %v4067_v47  ;;  %v3924_v50 = vshrl.u32 %v7367_v25, 16  ;;  %v9586_v15 = vld [vmem:[#allocation3 + $0x28] sm:$0xf] }
 0x391   :  { %4071 = vst [vmem:[#allocation3 + $0x8c] sm:$0x1] %v4070_v63  ;;  %4056 = vst [vmem:[#allocation3 + $0x78] sm:$0xf] %v4055_v14  ;;  %v4138_v61 = vrot.slane %v4136_v32, 5  ;;  %v3927_v1 = vshll.u32 %v7367_v25, 16 }
 0x392   :  { %4059 = vst [vmem:[#allocation3 + $0x7c] sm:$0x1] %v4058_v2  ;;  %v4134_v58 = vrot.slane %v4133_v37, 4  ;;  %v4143_v4 = vrot.slane %v4141_v35, 4  ;;  %v4144_v44 = vshll.u32 %v9542_v41, 16  ;;  %v3942_v52 = vrot.slane %v3940_v31, 7 }
 0x393   :  { %v3926_v59 = vrot.slane %v3924_v50, 7  ;;  %v4155_v27 = vshrl.u32 %v9554_v54, 16  ;;  %v4158_v6 = vshll.u32 %v9554_v54, 16  ;;  %v4150_v57 = vshll.u32 %v9570_v7, 16  ;;  %v9588_v12 = vld [vmem:[#allocation3 + $0x24] sm:$0x1] }
 0x394   :  { %v4139_v40 = vsel %vm8577_vm12, %v4134_v58, %v4138_v61  ;;  %v4146_v33 = vrot.slane %v4144_v44, 5  ;;  %v4164_v0 = vshll.u32 %v9568_v16, 16  ;;  %v3945_v26 = vor.u32 %v3943_v34, %v3942_v52  ;;  %v9599_v19 = vld [vmem:[#allocation3 + $0x2c] sm:$0x1]  ;;  %v9606_v47 = vld [vmem:[#allocation3 + $0x30] sm:$0xf] }
 0x395   :  { %v3946_v9 = vrot.slane %v3942_v52, 4  ;;  %v3929_v36 = vor.u32 %v3927_v1, %v3926_v59  ;;  %v3930_v22 = vrot.slane %v3926_v59, 4  ;;  %v7137_v3 = vcombine.low %v4125_v10, %v4139_v40  ;;  %v9610_v34 = vld [vmem:[#allocation3 + $0x34] sm:$0x1]  ;;  %v9613_v1 = vld [vmem:[#allocation3 + $0x38] sm:$0xf] }
 0x396   :  { %v4147_v55 = vor.u32 %v4146_v33, %v4143_v4  ;;  %v4157_v53 = vrot.slane %v4155_v27, 4  ;;  %v4160_v8 = vrot.slane %v4158_v6, 5  ;;  %v4073_v32 = vsel %vm9471_vm6, %v3945_v26, %v4072_v62  ;;  %v9617_v44 = vld [vmem:[#allocation3 + $0x3c] sm:$0x1]  ;;  %v9622_v40 = vld [vmem:[#allocation3 + $0x58] sm:$0xf] }
 0x397   :  { %v4076_v35 = vsel %vm9104_vm4, %v3946_v9, %v4075_v46  ;;  %v4061_v20 = vsel %vm9471_vm6, %v3929_v36, %v4060_v45  ;;  %v4064_v13 = vsel %vm9104_vm4, %v3930_v22, %v4063_v38  ;;  %4074 = vst [vmem:[#allocation3 + $0x90] sm:$0xf] %v4073_v32  ;;  %7750 = vmatprep.mubr.msk.bf16.mxu0 %vm576_vm8, %v7137_v3  ;;  %v4152_v10 = vrot.slane %v4150_v57, 5  ;;  %v9627_v33 = vld [vmem:[%s10268_s7 + $0x10] sm:$0xff]  }
 0x398   :  { %4077 = vst [vmem:[#allocation3 + $0x94] sm:$0x1] %v4076_v35  ;;  %4062 = vst [vmem:[#allocation3 + $0x80] sm:$0xf] %v4061_v20  ;;  %v4148_v48 = vrot.slane %v4147_v55, 4  ;;  %v4161_v51 = vor.u32 %v4160_v8, %v4157_v53  ;;  %v4169_v17 = vshrl.u32 %v9579_v43, 16 }
 0x399   :  { %4065 = vst [vmem:[#allocation3 + $0x84] sm:$0x1] %v4064_v13  ;;  %v4172_v56 = vshll.u32 %v9579_v43, 16  ;;  %v4178_v49 = vshll.u32 %v9588_v12, 16  ;;  %v4183_v25 = vshrl.u32 %v9586_v15, 16  ;;  %v4186_v37 = vshll.u32 %v9586_v15, 16 }
 0x39a   :  { %v4153_v63 = vsel %vm8577_vm12, %v4148_v48, %v4152_v10  ;;  %v4162_v14 = vrot.slane %v4161_v51, 4  ;;  %v4166_v2 = vrot.slane %v4164_v0, 5  ;;  %v4171_v31 = vrot.slane %v4169_v17, 4  ;;  %v9633_v53 = vld [vmem:[#allocation3 + $0x5c] sm:$0x1] }
 0x39b   :  { %v4174_v50 = vrot.slane %v4172_v56, 5  ;;  %v4185_v61 = vrot.slane %v4183_v25, 4  ;;  %v4188_v62 = vrot.slane %v4186_v37, 5  ;;  %v4192_v46 = vshll.u32 %v9599_v19, 16  ;;  %v9637_v13 = vld [vmem:[#allocation3 + $0x60] sm:$0xf] }
 0x39c   :  { %v4167_v58 = vsel %vm8577_vm12, %v4162_v14, %v4166_v2  ;;  %v4180_v4 = vrot.slane %v4178_v49, 5  ;;  %v4197_v52 = vshrl.u32 %v9606_v47, 16  ;;  %v4200_v59 = vshll.u32 %v9606_v47, 16  ;;  %v9644_v56 = vld [vmem:[#allocation3 + $0x68] sm:$0xf] }
 0x39d   :  { %v7138_v45 = vcombine.low %v4153_v63, %v4167_v58  ;;  %v4175_v27 = vor.u32 %v4174_v50, %v4171_v31  ;;  %v4189_v6 = vor.u32 %v4188_v62, %v4185_v61  ;;  %v4206_v38 = vshll.u32 %v9610_v34, 16  ;;  %v9647_v63 = vld [vmem:[#allocation3 + $0x64] sm:$0x1]  ;;  %v9655_v58 = vld [vmem:[#allocation3 + $0x6c] sm:$0x1] }
 0x39e   :  { %v4199_v57 = vrot.slane %v4197_v52, 4  ;;  %v4202_v0 = vrot.slane %v4200_v59, 5  ;;  %v4211_v26 = vshrl.u32 %v9613_v1, 16  ;;  %v4214_v9 = vshll.u32 %v9613_v1, 16 }
 0x39f   :  { %7751 = vmatmul.mubr.msk.bf16.vlgmr.msra.gmra.mrb[8].mxu0 %vm576_vm8, %v7138_v45  ;;  %v4176_v36 = vrot.slane %v4175_v27, 4  ;;  %v4190_v22 = vrot.slane %v4189_v6, 4  ;;  %v4194_v3 = vrot.slane %v4192_v46, 5  ;;  %v4220_v55 = vshll.u32 %v9617_v44, 16  ;;  %v9659_v6 = vld [vmem:[#allocation3 + $0x70] sm:$0xf] }
 0x3a0   :  { %7767 = vmatpush3.bf16.msra.mxu0 %v9416_v60  ;;  %v4203_v8 = vor.u32 %v4202_v0, %v4199_v57  ;;  %v4213_v32 = vrot.slane %v4211_v26, 4  ;;  %v4216_v35 = vrot.slane %v4214_v9, 5  ;;  %v4239_v20 = vshrl.u32 %v9622_v40, 16  ;;  %v9664_v9 = vld [vmem:[#allocation3 + $0x78] sm:$0xf] }
 0x3a1   :  { %v4181_v48 = vsel %vm8577_vm12, %v4176_v36, %v4180_v4  ;;  %v4195_v10 = vsel %vm8577_vm12, %v4190_v22, %v4194_v3  ;;  %v4208_v51 = vrot.slane %v4206_v38, 5  ;;  %v4242_v17 = vshll.u32 %v9622_v40, 16  ;;  %7784 = vmatprep.subr.bf16.mxu0 %v9627_v33 }
 0x3a2   :  { %v7139_v60 = vcombine.low %v4181_v48, %v4195_v10  ;;  %v4204_v49 = vrot.slane %v4203_v8, 4  ;;  %v4217_v25 = vor.u32 %v4216_v35, %v4213_v32  ;;  %v4241_v37 = vrot.slane %v4239_v20, 4  ;;  %v9667_v32 = vld [vmem:[#allocation3 + $0x74] sm:$0x1] }
 0x3a3   :  { %v4244_v14 = vrot.slane %v4242_v17, 5  ;;  %v4248_v2 = vshll.u32 %v9633_v53, 16  ;;  %v4253_v31 = vshrl.u32 %v9637_v13, 16  ;;  %v4256_v50 = vshll.u32 %v9637_v13, 16 }
 0x3a4   :  { %7754 = vmatprep.mubr.msk.bf16.mxu0 %vm576_vm8, %v7139_v60  ;;  %v4209_v61 = vsel %vm8577_vm12, %v4204_v49, %v4208_v51  ;;  %v4218_v62 = vrot.slane %v4217_v25, 4  ;;  %v4222_v46 = vrot.slane %v4220_v55, 5  ;;  %v4267_v4 = vshrl.u32 %v9644_v56, 16  ;;  %v9675_v60 = vld [vmem:[#allocation3 + $0x80] sm:$0xf] }
 0x3a5   :  { %v4245_v52 = vor.u32 %v4244_v14, %v4241_v37  ;;  %v4255_v59 = vrot.slane %v4253_v31, 4  ;;  %v4258_v45 = vrot.slane %v4256_v50, 5  ;;  %v4262_v27 = vshll.u32 %v9647_v63, 16  ;;  %v9682_v37 = vld [vmem:[#allocation3 + $0x7c] sm:$0x1] }
 0x3a6   :  { %v4223_v38 = vsel %vm8577_vm12, %v4218_v62, %v4222_v46  ;;  %v4250_v57 = vrot.slane %v4248_v2, 5  ;;  %v4269_v0 = vrot.slane %v4267_v4, 4  ;;  %v4270_v26 = vshll.u32 %v9644_v56, 16  ;;  %v9684_v31 = vld [vmem:[#allocation3 + $0x88] sm:$0xf] }
 0x3a7   :  { %v7140_v36 = vcombine.low %v4209_v61, %v4223_v38  ;;  %v4246_v22 = vrot.slane %v4245_v52, 4  ;;  %v4259_v3 = vor.u32 %v4258_v45, %v4255_v59  ;;  %v4276_v55 = vshll.u32 %v9655_v58, 16  ;;  %v9688_v4 = vld [vmem:[#allocation3 + $0x84] sm:$0x1]  ;;  %v4657_v59 = vld [vmem:[#allocation3] sm:$0xe] }
 0x3a8   :  { %v4272_v8 = vrot.slane %v4270_v26, 5  ;;  %v4281_v35 = vshrl.u32 %v9659_v6, 16  ;;  %v4284_v20 = vshll.u32 %v9659_v6, 16  ;;  %v4264_v51 = vrot.slane %v4262_v27, 5  ;;  %v9695_v38 = vld [vmem:[#allocation3 + $0x8c] sm:$0x1] }
 0x3a9   :  { %7755 = vmatmul.mubr.msk.bf16.gmra.mrb[12].mxu0 %vm576_vm8, %v7140_v36  ;;  %v4251_v48 = vsel %vm8577_vm12, %v4246_v22, %v4250_v57  ;;  %v4260_v10 = vrot.slane %v4259_v3, 4  ;;  %v4295_v17 = vshrl.u32 %v9664_v9, 16  ;;  %v4278_v50 = vrot.slane %v4276_v55, 5 }
 0x3aa   :  { %v7141_v49 = vcombine.low %v4237_v21, %v4251_v48  ;;  %v4273_v25 = vor.u32 %v4272_v8, %v4269_v0  ;;  %v4283_v14 = vrot.slane %v4281_v35, 4  ;;  %v4286_v2 = vrot.slane %v4284_v20, 5 }
 0x3ab   :  { %v4290_v61 = vshll.u32 %v9667_v32, 16  ;;  %v4297_v62 = vrot.slane %v4295_v17, 4  ;;  %v4298_v46 = vshll.u32 %v9664_v9, 16  ;;  %v4265_v29 = vsel %vm8577_vm12, %v4260_v10, %v4264_v51 }
 0x3ac   :  { %7758 = vmatprep.mubr.msk.bf16.mxu0 %vm576_vm8, %v7141_v49  ;;  %v4274_v5 = vrot.slane %v4273_v25, 4  ;;  %v4287_v21 = vor.u32 %v4286_v2, %v4283_v14  ;;  %v4309_v52 = vshrl.u32 %v9675_v60, 16  ;;  %v4304_v27 = vshll.u32 %v9682_v37, 16 }
 0x3ad   :  { %v4300_v45 = vrot.slane %v4298_v46, 5  ;;  %v4312_v57 = vshll.u32 %v9675_v60, 16  ;;  %v4323_v0 = vshrl.u32 %v9684_v31, 16  ;;  %v4318_v22 = vshll.u32 %v9688_v4, 16  ;;  %v4658_v46 = vld [vmem:[#allocation3 + $0x8] sm:$0xe] }
 0x3ae   :  { %v4279_v26 = vsel %vm8577_vm12, %v4274_v5, %v4278_v50  ;;  %v4311_v36 = vrot.slane %v4309_v52, 4  ;;  %v4707_v3 = vrot.slane %v9438_v42, 5  ;;  %v4288_v8 = vrot.slane %v4287_v21, 4  ;;  %v4659_v5 = vld [vmem:[#allocation3 + $0x10] sm:$0xe] }
 0x3af   :  { %v7142_v55 = vcombine.low %v4265_v29, %v4279_v26  ;;  %v4301_v35 = vor.u32 %v4300_v45, %v4297_v62  ;;  %v4314_v20 = vrot.slane %v4312_v57, 5  ;;  %v4325_v48 = vrot.slane %v4323_v0, 4  ;;  %v4660_v52 = vld [vmem:[#allocation3 + $0x18] sm:$0xe]  ;;  %v4662_v0 = vld [vmem:[#allocation3 + $0x28] sm:$0xe] }
 0x3b0   :  { %v4326_v10 = vshll.u32 %v9684_v31, 16  ;;  %v4332_v51 = vshll.u32 %v9695_v38, 16  ;;  %v7171_v17 = vrot.slane %v4657_v59, 9  ;;  %v4292_v49 = vrot.slane %v4290_v61, 5 }
 0x3b1   :  { %7759 = vmatmul.mubr.msk.bf16.gmra.mrb[16].mxu0 %vm576_vm8, %v7142_v55  ;;  %v4302_v25 = vrot.slane %v4301_v35, 4  ;;  %v4306_v14 = vrot.slane %v4304_v27, 5  ;;  %v4315_v2 = vor.u32 %v4314_v20, %v4311_v36  ;;  %v4320_v21 = vrot.slane %v4318_v22, 5  ;;  %v4661_v27 = vld [vmem:[#allocation3 + $0x20] sm:$0xe] }
 0x3b2   :  { %v4328_v50 = vrot.slane %v4326_v10, 5  ;;  %v4293_v42 = vsel %vm8577_vm12, %v4288_v8, %v4292_v49  ;;  %v4334_v57 = vrot.slane %v4332_v51, 5  ;;  %v9712_v61 = vsel %vm8830_vm0, %v7171_v17, %v4707_v3  ;;  %v4664_v10 = vld [vmem:[#allocation3 + $0x38] sm:$0xe] }
 0x3b3   :  { %v4307_v62 = vsel %vm8577_vm12, %v4302_v25, %v4306_v14  ;;  %v4316_v29 = vrot.slane %v4315_v2, 4  ;;  %v7172_v36 = vrot.slane %v4658_v46, 9  ;;  %v4711_v55 = vrot.slane %v9540_v23, 5  ;;  %v4663_v25 = vld [vmem:[#allocation3 + $0x30] sm:$0xe] }
 0x3b4   :  { %v7143_v45 = vcombine.low %v4293_v42, %v4307_v62  ;;  %v4329_v59 = vor.u32 %v4328_v50, %v4325_v48  ;;  %v7173_v8 = vrot.slane %v4659_v5, 9  ;;  %v4715_v35 = vrot.slane %v9570_v7, 5 }
 0x3b5   :  { %v4321_v26 = vsel %vm8577_vm12, %v4316_v29, %v4320_v21  ;;  %v7174_v20 = vrot.slane %v4660_v52, 9  ;;  %v4719_v48 = vrot.slane %v9568_v16, 5  ;;  %v9722_v3 = vsel %vm8830_vm0, %v7172_v36, %v4711_v55  ;;  %v4667_v21 = vld [vmem:[#allocation3 + $0x60] sm:$0xe] }
 0x3b6   :  { %7762 = vmatprep.mubr.msk.bf16.mxu0 %vm576_vm8, %v7143_v45  ;;  %v4330_v22 = vrot.slane %v4329_v59, 4  ;;  %v7175_v51 = vrot.slane %v4661_v27, 9  ;;  %v4723_v17 = vrot.slane %v9588_v12, 5  ;;  %v7176_v49 = vrot.slane %v4662_v0, 9  ;;  %v4669_v45 = vld [vmem:[#allocation3 + $0x70] sm:$0xe] }
 0x3b7   :  { %v7189_v14 = vcombine.low %v9712_v61, %v9722_v3  ;;  %v9731_v7 = vsel %vm8830_vm0, %v7173_v8, %v4715_v35  ;;  %v9735_v16 = vsel %vm8830_vm0, %v7174_v20, %v4719_v48  ;;  %v7154_v12 = vcombine.low %v9429_v18, %v9532_v28  ;;  %v4668_v28 = vld [vmem:[#allocation3 + $0x68] sm:$0xe]  ;;  %v4670_v59 = vld [vmem:[#allocation3 + $0x78] sm:$0xe] }
 0x3b8   :  { %v4335_v23 = vsel %vm8577_vm12, %v4330_v22, %v4334_v57  ;;  %v7190_v50 = vcombine.low %v9731_v7, %v9735_v16  ;;  %v4727_v46 = vrot.slane %v9599_v19, 5  ;;  %v7177_v5 = vrot.slane %v4663_v25, 9  ;;  %v4672_v22 = vld [vmem:[#allocation3 + $0x88] sm:$0xe]  ;;  %v212_v7 = vld [vmem:[#allocation3 + $0x48] sm:$0x1] }
 0x3b9   :  { %v7144_v2 = vcombine.low %v4321_v26, %v4335_v23  ;;  %v4731_v42 = vrot.slane %v9610_v34, 5  ;;  %v7178_v62 = vrot.slane %v4664_v10, 9  ;;  %v4735_v29 = vrot.slane %v9617_v44, 5  ;;  %v4671_v26 = vld [vmem:[#allocation3 + $0x80] sm:$0xe] }
 0x3ba   :  { %v9747_v52 = vsel %vm8830_vm0, %v7175_v51, %v4723_v17  ;;  %v4728_v18 = vsel %vm8830_vm0, %v7176_v49, %v4727_v46  ;;  %v7181_v27 = vrot.slane %v4667_v21, 9  ;;  %v4747_v0 = vrot.slane %v9647_v63, 5  ;;  %v242_v16 = vld [vmem:[#allocation3 + $0x98] sm:$0x1]  ;;  %v9829_v21 = vld [vmem:[%s10268_s7 + $0x28] sm:$0xff]  }
 0x3bb   :  { %7763 = vmatmul.mubr.msk.bf16.gmra.mrb[20].mxu0 %vm576_vm8, %v7144_v2  ;;  %v7191_v19 = vcombine.low %v9747_v52, %v4728_v18  ;;  %v4732_v34 = vsel %vm8830_vm0, %v7177_v5, %v4731_v42  ;;  %v4736_v44 = vsel %vm8830_vm0, %v7178_v62, %v4735_v29  ;;  %v7182_v36 = vrot.slane %v4668_v28, 9  ;;  %v8233_v42 = vld [vmem:[#allocation3 + $0x8] ss:$8 sps:$4 sm:$0xff]   ;;  %v8235_v29 = vld [vmem:[#allocation3 + $0x18] ss:$8 sps:$4 sm:$0xff]  }
 0x3bc   :  { %7768 = vmatprep.mubr.msk.bf16.mxu0 %vm576_vm8, %v7154_v12  ;;  %v7192_v57 = vcombine.low %v4732_v34, %v4736_v44  ;;  %v4751_v55 = vrot.slane %v9655_v58, 5  ;;  %v7183_v8 = vrot.slane %v4669_v45, 9  ;;  %v4748_v35 = vsel %vm8830_vm0, %v7181_v27, %v4747_v0  ;;  %v8232_v58 = vld [vmem:[%s10268_s7 + $0x18] sm:$0xff]   ;;  %v5141_v62 = vld [vmem:[#allocation3 + $0x8] sm:$0xf] }
 0x3bd   :  { %v4755_v20 = vrot.slane %v9667_v32, 5  ;;  %v7184_v48 = vrot.slane %v4670_v59, 9  ;;  %v4759_v51 = vrot.slane %v9682_v37, 5  ;;  %v7185_v17 = vrot.slane %v4671_v26, 9  ;;  %v273_v52 = vld [vmem:[#allocation3 + $0x4c] sm:$0x1] }
 0x3be   :  { %v4752_v10 = vsel %vm8830_vm0, %v7182_v36, %v4751_v55  ;;  %v4763_v63 = vrot.slane %v9688_v4, 5  ;;  %v7155_v49 = vcombine.low %v9542_v41, %v9554_v54  ;;  %v7186_v23 = vrot.slane %v4672_v22, 9  ;;  %v8236_v18 = vld [vmem:[#allocation3 + $0x28] ss:$8 sps:$4 sm:$0xff]   ;;  %v5145_v59 = vld [vmem:[#allocation3 + $0x18] sm:$0xf] }
 0x3bf   :  { %v7194_v25 = vcombine.low %v4748_v35, %v4752_v10  ;;  %v4767_v32 = vrot.slane %v9695_v38, 5  ;;  %v7156_v2 = vcombine.low %v9579_v43, %v9586_v15  ;;  %v4756_v37 = vsel %vm8830_vm0, %v7183_v8, %v4755_v20  ;;  %v8255_v38 = vld [vmem:[#allocation3 + $0x50] sm:$0xf]  ;;  %v8237_v8 = vld [vmem:[#allocation3 + $0x38] ss:$8 sps:$4 sm:$0xff]  }
 0x3c0   :  { %v4760_v4 = vsel %vm8830_vm0, %v7184_v48, %v4759_v51  ;;  %v4764_v41 = vsel %vm8830_vm0, %v7185_v17, %v4763_v63  ;;  %v7157_v15 = vcombine.low %v9606_v47, %v9613_v1  ;;  %v7158_v46 = vcombine.low %v8255_v38, %v9622_v40  ;;  %v4665_v1 = vld [vmem:[#allocation3 + $0x50] sm:$0xe]  ;;  %v4666_v40 = vld [vmem:[#allocation3 + $0x58] sm:$0xe]  ;;  %v5149_v10 = vld [vmem:[#allocation3 + $0x28] sm:$0xf] }
 0x3c1   :  { %v7195_v54 = vcombine.low %v4756_v37, %v4760_v4  ;;  %v4768_v12 = vsel %vm8830_vm0, %v7186_v23, %v4767_v32  ;;  %v7159_v5 = vcombine.low %v9637_v13, %v9644_v56  ;;  %v7161_v47 = vcombine.low %v9675_v60, %v9684_v31  ;;  %v8234_v13 = vld [vmem:[%s10268_s7 + $0x20] sm:$0xff]   ;;  %v5143_v28 = vld [vmem:[#allocation3 + $0x10] sm:$0xf]  ;;  %v9837_v51 = vld [vmem:[#allocation3 + $0xc] sm:$0x1] }
 0x3c2   :  { %v7196_v43 = vcombine.low %v4764_v41, %v4768_v12  ;;  %v7179_v56 = vrot.slane %v4665_v1, 9  ;;  %v7180_v60 = vrot.slane %v4666_v40, 9  ;;  %v4743_v31 = vrot.slane %v9633_v53, 5  ;;  %v8238_v48 = vld [vmem:[#allocation3 + $0x58] ss:$8 sps:$4 sm:$0xff]  }
 0x3c3   :  { %7769 = vmatmul.mubr.msk.bf16.vlgmr.msra.gmra.mrb[8].mxu0 %vm576_vm8, %v7155_v49  ;;  %v213_v53 = vsel %vm9104_vm4, 0, %v212_v7  ;;  %v5174_v11 = vshrl.u32 %v5141_v62, 16  ;;  %v5177_v45 = vshll.u32 %v5141_v62, 16  ;;  %v5188_v34 = vshrl.u32 %v5143_v28, 16  ;;  %v9839_v17 = vld [vmem:[#allocation3 + $0x14] sm:$0x1] }
 0x3c4   :  { %7785 = vmatpush3.bf16.msra.mxu0 %v9627_v33  ;;  %7772 = vmatprep.mubr.msk.bf16.mxu0 %vm576_vm8, %v7156_v2  ;;  %v7160_v33 = vcombine.low %v9659_v6, %v9664_v9  ;;  %v8256_v6 = vld [vmem:[#allocation3 + $0x54] sm:$0x1]  ;;  %v4744_v3 = vsel %vm8830_vm0, %v7180_v60, %v4743_v31  ;;  %214 = vst [vmem:[#allocation3 + $0x48] sm:$0x1] %v213_v53  ;;  %v5191_v44 = vshll.u32 %v5143_v28, 16  ;;  %v5202_v26 = vshrl.u32 %v5145_v59, 16 }
 0x3c5   :  { %7802 = vmatprep.subr.bf16.mxu0 %v8232_v58  ;;  %v4739_v9 = vrot.slane %v8256_v6, 5  ;;  %v5176_v27 = vrot.slane %v5174_v11, 4  ;;  %v5179_v0 = vrot.slane %v5177_v45, 5  ;;  %v5190_v22 = vrot.slane %v5188_v34, 4  ;;  %v9841_v63 = vld [vmem:[#allocation3 + $0x1c] sm:$0x1] }
 0x3c6   :  { %v5193_v35 = vrot.slane %v5191_v44, 5  ;;  %v5205_v20 = vshll.u32 %v5145_v59, 16  ;;  %v5151_v32 = vld [vmem:[#allocation3 + $0x30] sm:$0xf]  ;;  %v9844_v37 = vld [vmem:[#allocation3 + $0x24] sm:$0x1] }
 0x3c7   :  { %v4740_v61 = vsel %vm8830_vm0, %v7179_v56, %v4739_v9  ;;  %v5180_v49 = vor.u32 %v5179_v0, %v5176_v27  ;;  %v5230_v41 = vshrl.u32 %v5149_v10, 16  ;;  %v5183_v12 = vshll.u32 %v9837_v51, 16  ;;  %v9850_v6 = vld [vmem:[#allocation3 + $0x2c] sm:$0x1]  ;;  %v5159_v53 = vld [vmem:[#allocation3 + $0x60] sm:$0xf] }
 0x3c8   :  { %v5194_v2 = vor.u32 %v5193_v35, %v5190_v22  ;;  %v5207_v4 = vrot.slane %v5205_v20, 5  ;;  %v5244_v38 = vshrl.u32 %v5151_v32, 16  ;;  %v5225_v40 = vshll.u32 %v9844_v37, 16  ;;  %v9859_v45 = vld [vmem:[#allocation3 + $0x34] sm:$0x1] }
 0x3c9   :  { %v5232_v9 = vrot.slane %v5230_v41, 4  ;;  %v5185_v31 = vrot.slane %v5183_v12, 5  ;;  %v9861_v34 = vld [vmem:[#allocation3 + $0x3c] sm:$0x1]  ;;  %v5157_v0 = vld [vmem:[#allocation3 + $0x58] sm:$0xf] }
 0x3ca   :  { %v5246_v7 = vrot.slane %v5244_v38, 4  ;;  %v5227_v11 = vrot.slane %v5225_v40, 5  ;;  %v9872_v12 = vld [vmem:[#allocation3 + $0x44] sm:$0x1]  ;;  %v5163_v38 = vld [vmem:[#allocation3 + $0x70] sm:$0xf] }
 0x3cb   :  { %7773 = vmatmul.mubr.msk.bf16.gmra.mrb[12].mxu0 %vm576_vm8, %v7157_v15  ;;  %v5197_v15 = vshll.u32 %v9839_v17, 16 }
 0x3cc   :  { %7776 = vmatprep.mubr.msk.bf16.mxu0 %vm576_vm8, %v7158_v46  ;;  %v5247_v46 = vshll.u32 %v5151_v32, 16 }
 0x3d3   :  { %7777 = vmatmul.mubr.msk.bf16.gmra.mrb[16].mxu0 %vm576_vm8, %v7159_v5  ;;  %v8240_v5 = vld [vmem:[#allocation3 + $0x78] ss:$8 sps:$4 sm:$0xff]  }
 0x3d4   :  { %7780 = vmatprep.mubr.msk.bf16.mxu0 %vm576_vm8, %v7160_v33  ;;  %v5181_v33 = vrot.slane %v5180_v49, 4 }
 0x3db   :  { %7781 = vmatmul.mubr.msk.bf16.gmra.mrb[20].mxu0 %vm576_vm8, %v7161_v47  ;;  %v5211_v47 = vshll.u32 %v9841_v63, 16 }
 0x3dc   :  { %7786 = vmatprep.mubr.msk.bf16.mxu0 %vm576_vm8, %v7189_v14  ;;  %v7193_v14 = vcombine.low %v4740_v61, %v4744_v3  ;;  %v5153_v61 = vld [vmem:[#allocation3 + $0x38] sm:$0xf]  ;;  %v5155_v3 = vld [vmem:[#allocation3 + $0x40] sm:$0xf] }
 0x3dd   :  { %v5258_v44 = vshrl.u32 %v5153_v61, 16  ;;  %v5261_v59 = vshll.u32 %v5153_v61, 16  ;;  %v5275_v27 = vshll.u32 %v5155_v3, 16  ;;  %v9879_v61 = vld [vmem:[#allocation3 + $0x64] sm:$0x1] }
 0x3df   :  { %v5260_v32 = vrot.slane %v5258_v44, 4  ;;  %v5277_v41 = vrot.slane %v5275_v27, 5 }
 0x3e3   :  { %7787 = vmatmul.mubr.msk.bf16.vlgmr.msra.gmra.mrb[8].mxu0 %vm576_vm8, %v7190_v50  ;;  %v243_v50 = vsel %vm9104_vm4, 0, %v242_v16  ;;  %v5249_v16 = vrot.slane %v5247_v46, 5 }
 0x3e4   :  { %7803 = vmatpush3.bf16.msra.mxu0 %v8232_v58  ;;  %7790 = vmatprep.mubr.msk.bf16.mxu0 %vm576_vm8, %v7191_v19  ;;  %244 = vst [vmem:[#allocation3 + $0x98] sm:$0x1] %v243_v50  ;;  %v274_v19 = vsel %vm9129_vm3, 0, %v273_v52  ;;  %v5204_v58 = vrot.slane %v5202_v26, 4  ;;  %v5186_v50 = vsel %vm8577_vm12, %v5181_v33, %v5185_v31  ;;  %v303_v52 = vld [vmem:[#allocation3 + $0x9c] sm:$0x1] }
 0x3e5   :  { %7820 = vmatprep.subr.bf16.mxu0 %v8234_v13  ;;  %275 = vst [vmem:[#allocation3 + $0x4c] sm:$0x1] %v274_v19  ;;  %v5250_v26 = vor.u32 %v5249_v16, %v5246_v7  ;;  %v9875_v33 = vld [vmem:[#allocation3 + $0x5c] sm:$0x1]  ;;  %v5165_v7 = vld [vmem:[#allocation3 + $0x78] sm:$0xf] }
 0x3e6   :  { %v5208_v56 = vor.u32 %v5207_v4, %v5204_v58  ;;  %v5267_v58 = vshll.u32 %v9861_v34, 16  ;;  %v5345_v44 = vshll.u32 %v5165_v7, 16 }
 0x3e8   :  { %v5209_v28 = vrot.slane %v5208_v56, 4  ;;  %v5269_v40 = vrot.slane %v5267_v58, 5 }
 0x3eb   :  { %7791 = vmatmul.mubr.msk.bf16.gmra.mrb[12].mxu0 %vm576_vm8, %v7192_v57  ;;  %v5147_v57 = vld [vmem:[#allocation3 + $0x20] sm:$0xf] }
 0x3ec   :  { %7794 = vmatprep.mubr.msk.bf16.mxu0 %vm576_vm8, %v7193_v14  ;;  %v5216_v36 = vshrl.u32 %v5147_v57, 16  ;;  %v5219_v55 = vshll.u32 %v5147_v57, 16  ;;  %v5199_v14 = vrot.slane %v5197_v15, 5  ;;  %v5272_v57 = vshrl.u32 %v5155_v3, 16 }
 0x3ed   :  { %v5328_v3 = vshrl.u32 %v5163_v38, 16 }
 0x3ee   :  { %v5221_v23 = vrot.slane %v5219_v55, 5  ;;  %v5303_v55 = vshll.u32 %v5159_v53, 16  ;;  %v5274_v4 = vrot.slane %v5272_v57, 4 }
 0x3f0   :  { %v5305_v15 = vrot.slane %v5303_v55, 5  ;;  %v5278_v31 = vor.u32 %v5277_v41, %v5274_v4  ;;  %v5347_v4 = vrot.slane %v5345_v44, 5  ;;  %v5169_v41 = vld [vmem:[#allocation3 + $0x88] sm:$0xf]  ;;  %v9917_v44 = vld [vmem:[#allocation3 + $0x94] sm:$0x1] }
 0x3f2   :  { %v5279_v27 = vrot.slane %v5278_v31, 4 }
 0x3f3   :  { %7795 = vmatmul.mubr.msk.bf16.gmra.mrb[16].mxu0 %vm576_vm8, %v7194_v25  ;;  %v5218_v25 = vrot.slane %v5216_v36, 4  ;;  %v5300_v36 = vshrl.u32 %v5159_v53, 16 }
 0x3f4   :  { %7798 = vmatprep.mubr.msk.bf16.mxu0 %vm576_vm8, %v7195_v54  ;;  %v5233_v54 = vshll.u32 %v5149_v10, 16  ;;  %v8241_v10 = vld [vmem:[#allocation3 + $0x88] ss:$8 sps:$4 sm:$0xff]  }
 0x3f5   :  { %v5222_v1 = vor.u32 %v5221_v23, %v5218_v25  ;;  %v5286_v25 = vshrl.u32 %v5157_v0, 16  ;;  %v5289_v23 = vshll.u32 %v5157_v0, 16  ;;  %v9891_v0 = vld [vmem:[#allocation3 + $0x6c] sm:$0x1] }
 0x3f6   :  { %v5235_v60 = vrot.slane %v5233_v54, 5  ;;  %v5251_v54 = vrot.slane %v5250_v26, 4  ;;  %v5330_v26 = vrot.slane %v5328_v3, 4 }
 0x3f7   :  { %v5223_v62 = vrot.slane %v5222_v1, 4  ;;  %v5291_v56 = vrot.slane %v5289_v23, 5 }
 0x3f8   :  { %v5236_v19 = vor.u32 %v5235_v60, %v5232_v9  ;;  %v5161_v9 = vld [vmem:[#allocation3 + $0x68] sm:$0xf] }
 0x3f9   :  { %v5228_v35 = vsel %vm8577_vm12, %v5223_v62, %v5227_v11  ;;  %v5281_v62 = vshll.u32 %v9872_v12, 16  ;;  %v5309_v11 = vshll.u32 %v9879_v61, 16 }
 0x3fa   :  { %v5237_v49 = vrot.slane %v5236_v19, 4  ;;  %v5342_v19 = vshrl.u32 %v5165_v7, 16 }
 0x3fb   :  { %7799 = vmatmul.mubr.msk.bf16.gmra.mrb[20].mxu0 %vm576_vm8, %v7196_v43  ;;  %v8239_v43 = vld [vmem:[#allocation3 + $0x68] ss:$8 sps:$4 sm:$0xff]  }
 0x3fc   :  { %7804 = vmatprep.mubr.msk.bf16.mxu0 %vm576_vm8, %v8233_v42  ;;  %v5213_v42 = vrot.slane %v5211_v47, 5  ;;  %v5167_v47 = vld [vmem:[#allocation3 + $0x80] sm:$0xf] }
 0x3fe   :  { %v5214_v30 = vsel %vm8577_vm12, %v5209_v28, %v5213_v42  ;;  %v5359_v42 = vshll.u32 %v5167_v47, 16 }
 0x3ff   :  { %v7228_v46 = vcombine.low %v5214_v30, %v5228_v35 }
 0x400   :  { %v5361_v35 = vrot.slane %v5359_v42, 5 }
 0x403   :  { %7805 = vmatmul.mubr.msk.bf16.vlgmr.msra.gmra.mrb[8].mxu0 %vm576_vm8, %v8235_v29  ;;  %v5239_v29 = vshll.u32 %v9850_v6, 16 }
 0x404   :  { %7821 = vmatpush3.bf16.msra.mxu0 %v8234_v13  ;;  %7808 = vmatprep.mubr.msk.bf16.mxu0 %vm576_vm8, %v8236_v18  ;;  %v5195_v13 = vrot.slane %v5194_v2, 4  ;;  %v5263_v2 = vrot.slane %v5261_v59, 5  ;;  %v9889_v59 = vld [vmem:[%s10268_s7 + $0x30] sm:$0xff]  }
 0x405   :  { %7838 = vmatprep.subr.bf16.mxu0 %v9829_v21  ;;  %v5241_v20 = vrot.slane %v5239_v29, 5  ;;  %v5295_v29 = vshll.u32 %v9875_v33, 16 }
 0x406   :  { %v5200_v18 = vsel %vm8577_vm12, %v5195_v13, %v5199_v14  ;;  %v5288_v13 = vrot.slane %v5286_v25, 4  ;;  %v5264_v60 = vor.u32 %v5263_v2, %v5260_v32  ;;  %v5331_v14 = vshll.u32 %v5163_v38, 16 }
 0x407   :  { %v7227_v22 = vcombine.low %v5186_v50, %v5200_v18  ;;  %v5242_v1 = vsel %vm8577_vm12, %v5237_v49, %v5241_v20  ;;  %v5356_v50 = vshrl.u32 %v5167_v47, 16  ;;  %v5317_v18 = vshll.u32 %v5161_v9, 16  ;;  %v5171_v20 = vld [vmem:[#allocation3 + $0x90] sm:$0xf]  ;;  %v9896_v49 = vld [vmem:[#allocation3 + $0x74] sm:$0x1] }
 0x408   :  { %v5292_v28 = vor.u32 %v5291_v56, %v5288_v13  ;;  %v5265_v55 = vrot.slane %v5264_v60, 4  ;;  %v5311_v32 = vrot.slane %v5309_v11, 5  ;;  %v5344_v2 = vrot.slane %v5342_v19, 4  ;;  %v9909_v56 = vld [vmem:[#allocation3 + $0x7c] sm:$0x1] }
 0x409   :  { %v5319_v25 = vrot.slane %v5317_v18, 5  ;;  %v5337_v13 = vshll.u32 %v9896_v49, 16  ;;  %v5373_v60 = vshll.u32 %v5169_v41, 16  ;;  %v5351_v42 = vshll.u32 %v9909_v56, 16 }
 0x40a   :  { %v5293_v23 = vrot.slane %v5292_v28, 4  ;;  %v5270_v38 = vsel %vm8577_vm12, %v5265_v55, %v5269_v40 }
 0x40b   :  { %7809 = vmatmul.mubr.msk.bf16.gmra.mrb[12].mxu0 %vm576_vm8, %v8237_v8  ;;  %v304_v8 = vsel %vm9129_vm3, 0, %v303_v52  ;;  %v5314_v52 = vshrl.u32 %v5161_v9, 16  ;;  %v5370_v9 = vshrl.u32 %v5169_v41, 16  ;;  %v5375_v28 = vrot.slane %v5373_v60, 5  ;;  %v5569_v60 = vld [vmem:[#allocation3 + $0x18] sm:$0xe] }
 0x40c   :  { %7812 = vmatprep.mubr.msk.bf16.mxu0 %vm576_vm8, %v8238_v48  ;;  %v5253_v48 = vshll.u32 %v9859_v45, 16  ;;  %305 = vst [vmem:[#allocation3 + $0x9c] sm:$0x1] %v304_v8  ;;  %v5621_v41 = vrot.slane %v9839_v17, 5 }
 0x40d   :  { %v5316_v58 = vrot.slane %v5314_v52, 4  ;;  %v5339_v52 = vrot.slane %v5337_v13, 5  ;;  %v5372_v18 = vrot.slane %v5370_v9, 4  ;;  %v5572_v13 = vld [vmem:[#allocation3 + $0x30] sm:$0xe] }
 0x413   :  { %7813 = vmatmul.mubr.msk.bf16.gmra.mrb[16].mxu0 %vm576_vm8, %v8239_v43  ;;  %v5302_v43 = vrot.slane %v5300_v36, 4  ;;  %v5333_v36 = vrot.slane %v5331_v14, 5  ;;  %v5348_v14 = vor.u32 %v5347_v4, %v5344_v2  ;;  %v5567_v2 = vld [vmem:[#allocation3 + $0x8] sm:$0xe] }
 0x414   :  { %7816 = vmatprep.mubr.msk.bf16.mxu0 %vm576_vm8, %v8240_v5  ;;  %v5255_v5 = vrot.slane %v5253_v48, 5  ;;  %v5283_v48 = vrot.slane %v5281_v62, 5 }
 0x415   :  { %v5306_v53 = vor.u32 %v5305_v15, %v5302_v43  ;;  %v5384_v43 = vshrl.u32 %v5171_v20, 16  ;;  %v5387_v15 = vshll.u32 %v5171_v20, 16  ;;  %v5349_v11 = vrot.slane %v5348_v14, 4  ;;  %v5571_v14 = vld [vmem:[#allocation3 + $0x28] sm:$0xe] }
 0x416   :  { %v5256_v16 = vsel %vm8577_vm12, %v5251_v54, %v5255_v5  ;;  %v5284_v30 = vsel %vm8577_vm12, %v5279_v27, %v5283_v48  ;;  %v5334_v54 = vor.u32 %v5333_v36, %v5330_v26  ;;  %v5323_v5 = vshll.u32 %v9891_v0, 16  ;;  %v5568_v48 = vld [vmem:[#allocation3 + $0x10] sm:$0xe] }
 0x417   :  { %v7229_v57 = vcombine.low %v5242_v1, %v5256_v16  ;;  %v5307_v8 = vrot.slane %v5306_v53, 4  ;;  %v5320_v1 = vor.u32 %v5319_v25, %v5316_v58  ;;  %v7230_v31 = vcombine.low %v5270_v38, %v5284_v30 }
 0x418   :  { %v5335_v16 = vrot.slane %v5334_v54, 4  ;;  %v5386_v53 = vrot.slane %v5384_v43, 4  ;;  %v5353_v36 = vrot.slane %v5351_v42, 5  ;;  %v5393_v20 = vshll.u32 %v9917_v44, 16 }
 0x419   :  { %v7245_v4 = vrot.slane %v5568_v48, 9  ;;  %v7244_v43 = vrot.slane %v5567_v2, 9  ;;  %v5633_v42 = vrot.slane %v9850_v6, 5  ;;  %v5579_v2 = vld [vmem:[#allocation3 + $0x78] sm:$0xe] }
 0x41a   :  { %v5340_v27 = vsel %vm8577_vm12, %v5335_v16, %v5339_v52  ;;  %v5354_v58 = vsel %vm8577_vm12, %v5349_v11, %v5353_v36  ;;  %v5395_v54 = vrot.slane %v5393_v20, 5  ;;  %v7246_v16 = vrot.slane %v5569_v60, 9  ;;  %v5573_v11 = vld [vmem:[#allocation3 + $0x38] sm:$0xe] }
 0x41b   :  { %7817 = vmatmul.mubr.msk.bf16.gmra.mrb[20].mxu0 %vm576_vm8, %v8241_v10  ;;  %v5297_v10 = vrot.slane %v5295_v29, 5  ;;  %v5321_v29 = vrot.slane %v5320_v1, 4  ;;  %v5653_v36 = vrot.slane %v9879_v61, 5  ;;  %v5649_v20 = vrot.slane %v9875_v33, 5 }
 0x41c   :  { %7822 = vmatprep.mubr.msk.bf16.mxu0 %vm576_vm8, %v7227_v22  ;;  %v5358_v22 = vrot.slane %v5356_v50, 4  ;;  %v5389_v50 = vrot.slane %v5387_v15, 5  ;;  %v5617_v15 = vrot.slane %v9837_v51, 5  ;;  %v5629_v51 = vrot.slane %v9844_v37, 5 }
 0x41d   :  { %v5298_v3 = vsel %vm8577_vm12, %v5293_v23, %v5297_v10  ;;  %v5661_v33 = vrot.slane %v9896_v49, 5 }
 0x41e   :  { %v5362_v47 = vor.u32 %v5361_v35, %v5358_v22  ;;  %v5390_v26 = vor.u32 %v5389_v50, %v5386_v53  ;;  %v5376_v35 = vor.u32 %v5375_v28, %v5372_v18  ;;  %v5618_v9 = vsel %vm8830_vm0, %v7244_v43, %v5617_v15  ;;  %v5576_v18 = vld [vmem:[#allocation3 + $0x60] sm:$0xe] }
 0x41f   :  { %v5625_v53 = vrot.slane %v9841_v63, 5  ;;  %v7248_v50 = vrot.slane %v5571_v14, 9  ;;  %v8245_v63 = vld [vmem:[%s10268_s7 + $0x38] sm:$0xff]   ;;  %v7256_v43 = vrot.slane %v5579_v2, 9  ;;  %v5665_v15 = vrot.slane %v9909_v56, 5 }
 0x420   :  { %v5363_v62 = vrot.slane %v5362_v47, 4  ;;  %v5377_v30 = vrot.slane %v5376_v35, 4  ;;  %v5570_v47 = vld [vmem:[#allocation3 + $0x20] sm:$0xe]  ;;  %v6052_v14 = vld [vmem:[#allocation3 + $0x10] sm:$0xf] }
 0x421   :  { %v5626_v52 = vsel %vm8830_vm0, %v7246_v16, %v5625_v53  ;;  %v5634_v28 = vsel %vm8830_vm0, %v7248_v50, %v5633_v42  ;;  %v6088_v16 = vshll.u32 %v6052_v14, 16  ;;  %v6058_v53 = vld [vmem:[#allocation3 + $0x28] sm:$0xf]  ;;  %v6054_v50 = vld [vmem:[#allocation3 + $0x18] sm:$0xf] }
 0x422   :  { %v6056_v42 = vld [vmem:[#allocation3 + $0x20] sm:$0xf] }
 0x423   :  { %7823 = vmatmul.mubr.msk.bf16.vlgmr.msra.gmra.mrb[8].mxu0 %vm576_vm8, %v7228_v46  ;;  %v5312_v46 = vsel %vm8577_vm12, %v5307_v8, %v5311_v32  ;;  %v9923_v8 = vld [vmem:[#allocation3 + $0x8c] sm:$0x1]  ;;  %v5391_v32 = vrot.slane %v5390_v26, 4  ;;  %v7253_v26 = vrot.slane %v5576_v18, 9  ;;  %v6099_v18 = vshrl.u32 %v6054_v50, 16 }
 0x424   :  { %7839 = vmatpush3.bf16.msra.mxu0 %v9829_v21  ;;  %7826 = vmatprep.mubr.msk.bf16.mxu0 %vm576_vm8, %v7229_v57  ;;  %v9901_v21 = vld [vmem:[#allocation3 + $0x84] sm:$0x1]  ;;  %v7231_v7 = vcombine.low %v5298_v3, %v5312_v46  ;;  %v5325_v57 = vrot.slane %v5323_v5, 5  ;;  %v5379_v23 = vshll.u32 %v9923_v8, 16  ;;  %v5622_v5 = vsel %vm8830_vm0, %v7245_v4, %v5621_v41 }
 0x425   :  { %7856 = vmatprep.subr.bf16.mxu0 %v9889_v59  ;;  %v5365_v40 = vshll.u32 %v9901_v21, 16  ;;  %v5396_v46 = vsel %vm8577_vm12, %v5391_v32, %v5395_v54  ;;  %v7247_v3 = vrot.slane %v5570_v47, 9  ;;  %v5654_v48 = vsel %vm8830_vm0, %v7253_v26, %v5653_v36  ;;  %v6062_v36 = vld [vmem:[#allocation3 + $0x38] sm:$0xf] }
 0x426   :  { %v5326_v22 = vsel %vm8577_vm12, %v5321_v29, %v5325_v57  ;;  %v5381_v38 = vrot.slane %v5379_v23, 5  ;;  %v5574_v29 = vld [vmem:[#allocation3 + $0x40] sm:$0xe]  ;;  %v5645_v57 = vrot.slane %v9872_v12, 5  ;;  %v5669_v41 = vrot.slane %v9901_v21, 5 }
 0x427   :  { %v5367_v19 = vrot.slane %v5365_v40, 5  ;;  %v7232_v10 = vcombine.low %v5326_v22, %v5340_v27  ;;  %v7249_v40 = vrot.slane %v5572_v13, 9  ;;  %v5575_v27 = vld [vmem:[#allocation3 + $0x58] sm:$0xe]  ;;  %v5641_v22 = vrot.slane %v9861_v34, 5 }
 0x428   :  { %v5382_v1 = vsel %vm8577_vm12, %v5377_v30, %v5381_v38  ;;  %v7252_v35 = vrot.slane %v5575_v27, 9  ;;  %v5577_v34 = vld [vmem:[#allocation3 + $0x68] sm:$0xe]  ;;  %v5657_v54 = vrot.slane %v9891_v0, 5  ;;  %v5666_v21 = vsel %vm8830_vm0, %v7256_v43, %v5665_v15 }
 0x429   :  { %v5368_v55 = vsel %vm8577_vm12, %v5363_v62, %v5367_v19  ;;  %v7234_v17 = vcombine.low %v5382_v1, %v5396_v46  ;;  %v5630_v62 = vsel %vm8830_vm0, %v7247_v3, %v5629_v51  ;;  %v7251_v19 = vrot.slane %v5574_v29, 9  ;;  %v5582_v46 = vld [vmem:[#allocation3 + $0x90] sm:$0xe]  ;;  %v5581_v1 = vld [vmem:[#allocation3 + $0x88] sm:$0xe] }
 0x42a   :  { %v7233_v25 = vcombine.low %v5354_v58, %v5368_v55  ;;  %v7250_v55 = vrot.slane %v5573_v11, 9  ;;  %v7254_v30 = vrot.slane %v5577_v34, 9  ;;  %v7259_v0 = vrot.slane %v5582_v46, 9  ;;  %v8244_v51 = vld [vmem:[#allocation3 + $0x10] ss:$8 sps:$4 sm:$0xff]  }
 0x42b   :  { %7827 = vmatmul.mubr.msk.bf16.gmra.mrb[12].mxu0 %vm576_vm8, %v7230_v31  ;;  %v7262_v31 = vcombine.low %v5618_v9, %v5622_v5  ;;  %v5646_v12 = vsel %vm8830_vm0, %v7251_v19, %v5645_v57  ;;  %v7258_v56 = vrot.slane %v5581_v1, 9  ;;  %v5673_v9 = vrot.slane %v9923_v8, 5  ;;  %v8247_v8 = vld [vmem:[#allocation3 + $0x30] ss:$8 sps:$4 sm:$0xff]   ;;  %v10007_v11 = vld [vmem:[#allocation3 + $0x14] sm:$0x1] }
 0x42c   :  { %7830 = vmatprep.mubr.msk.bf16.mxu0 %vm576_vm8, %v7231_v7  ;;  %v5637_v7 = vrot.slane %v9859_v45, 5  ;;  %v7263_v45 = vcombine.low %v5626_v52, %v5630_v62  ;;  %v5642_v61 = vsel %vm8830_vm0, %v7250_v55, %v5641_v22  ;;  %v5658_v5 = vsel %vm8830_vm0, %v7254_v30, %v5657_v54  ;;  %v8249_v19 = vld [vmem:[#allocation3 + $0x60] ss:$8 sps:$4 sm:$0xff]   ;;  %v6060_v57 = vld [vmem:[#allocation3 + $0x30] sm:$0xf] }
 0x42d   :  { %v7265_v58 = vcombine.low %v5642_v61, %v5646_v12  ;;  %v6127_v62 = vshrl.u32 %v6058_v53, 16  ;;  %v6090_v52 = vrot.slane %v6088_v16, 5  ;;  %v10011_v55 = vld [vmem:[#allocation3 + $0x1c] sm:$0x1]  ;;  %v6155_v34 = vshrl.u32 %v6062_v36, 16 }
 0x42e   :  { %v5638_v37 = vsel %vm8830_vm0, %v7249_v40, %v5637_v7  ;;  %v10002_v40 = vld [vmem:[%s10268_s7 + $0x40] sm:$0xff]   ;;  %v6085_v7 = vshrl.u32 %v6052_v14, 16  ;;  %v6066_v15 = vld [vmem:[#allocation3 + $0x48] sm:$0xf]  ;;  %v10027_v14 = vld [vmem:[#allocation3 + $0x3c] sm:$0x1] }
 0x42f   :  { %v7264_v6 = vcombine.low %v5634_v28, %v5638_v37  ;;  %v6130_v37 = vshll.u32 %v6058_v53, 16  ;;  %v8248_v28 = vld [vmem:[#allocation3 + $0x40] ss:$8 sps:$4 sm:$0xff]   ;;  %v6129_v27 = vrot.slane %v6127_v62, 4  ;;  %v6157_v1 = vrot.slane %v6155_v34, 4 }
 0x430   :  { %v6087_v29 = vrot.slane %v6085_v7, 4  ;;  %v6070_v62 = vld [vmem:[#allocation3 + $0x68] sm:$0xf] }
 0x431   :  { %v6132_v26 = vrot.slane %v6130_v37, 5 }
 0x432   :  { %v6091_v22 = vor.u32 %v6090_v52, %v6087_v29  ;;  %v10030_v52 = vld [vmem:[#allocation3 + $0x44] sm:$0x1] }
 0x433   :  { %7831 = vmatmul.mubr.msk.bf16.gmra.mrb[16].mxu0 %vm576_vm8, %v7232_v10  ;;  %v5578_v10 = vld [vmem:[#allocation3 + $0x70] sm:$0xe]  ;;  %v6133_v2 = vor.u32 %v6132_v26, %v6129_v27  ;;  %v6211_v26 = vshrl.u32 %v6070_v62, 16 }
 0x434   :  { %7834 = vmatprep.mubr.msk.bf16.mxu0 %vm576_vm8, %v7233_v25  ;;  %v5650_v25 = vsel %vm8830_vm0, %v7252_v35, %v5649_v20  ;;  %v7255_v32 = vrot.slane %v5578_v10, 9  ;;  %v6094_v35 = vshll.u32 %v10007_v11, 16  ;;  %v6101_v20 = vrot.slane %v6099_v18, 4 }
 0x435   :  { %v7266_v23 = vcombine.low %v5650_v25, %v5654_v48  ;;  %v10014_v48 = vld [vmem:[#allocation3 + $0x24] sm:$0x1]  ;;  %v10016_v25 = vld [vmem:[#allocation3 + $0x2c] sm:$0x1] }
 0x436   :  { %v5662_v38 = vsel %vm8830_vm0, %v7255_v32, %v5661_v33  ;;  %v8250_v32 = vld [vmem:[#allocation3 + $0x70] ss:$8 sps:$4 sm:$0xff]   ;;  %v6108_v33 = vshll.u32 %v10011_v55, 16  ;;  %v6096_v30 = vrot.slane %v6094_v35, 5  ;;  %v6122_v43 = vshll.u32 %v10014_v48, 16 }
 0x437   :  { %v7267_v47 = vcombine.low %v5658_v5, %v5662_v38 }
 0x43b   :  { %7835 = vmatmul.mubr.msk.bf16.gmra.mrb[20].mxu0 %vm576_vm8, %v7234_v17  ;;  %v5677_v17 = vrot.slane %v9917_v44, 5  ;;  %v8246_v44 = vld [vmem:[#allocation3 + $0x20] ss:$8 sps:$4 sm:$0xff]  }
 0x43c   :  { %7840 = vmatprep.mubr.msk.bf16.mxu0 %vm576_vm8, %v7262_v31  ;;  %v5674_v31 = vsel %vm8830_vm0, %v7258_v56, %v5673_v9  ;;  %v6110_v56 = vrot.slane %v6108_v33, 5  ;;  %v6134_v9 = vrot.slane %v6133_v2, 4 }
 0x43d   :  { %v5678_v60 = vsel %vm8830_vm0, %v7259_v0, %v5677_v17 }
 0x43e   :  { %v7269_v3 = vcombine.low %v5674_v31, %v5678_v60  ;;  %v10022_v60 = vld [vmem:[#allocation3 + $0x34] sm:$0x1]  ;;  %v6183_v31 = vshrl.u32 %v6066_v15, 16 }
 0x43f   :  { %v6150_v37 = vshll.u32 %v10022_v60, 16  ;;  %v6544_v39 = vrot.slane %v10022_v60, 5  ;;  %v6486_v60 = vld [vmem:[#allocation3 + $0x60] sm:$0xe] }
 0x441   :  { %v6152_v2 = vrot.slane %v6150_v37, 5 }
 0x443   :  { %7841 = vmatmul.mubr.msk.bf16.vlgmr.msra.gmra.mrb[8].mxu0 %vm576_vm8, %v7263_v45  ;;  %v6102_v45 = vshll.u32 %v6054_v50, 16 }
 0x444   :  { %7857 = vmatpush3.bf16.msra.mxu0 %v9889_v59  ;;  %7844 = vmatprep.mubr.msk.bf16.mxu0 %vm576_vm8, %v7264_v6  ;;  %v5580_v59 = vld [vmem:[#allocation3 + $0x80] sm:$0xe]  ;;  %v6113_v6 = vshrl.u32 %v6056_v42, 16 }
 0x445   :  { %7874 = vmatprep.subr.bf16.mxu0 %v8245_v63  ;;  %v7257_v4 = vrot.slane %v5580_v59, 9  ;;  %v6104_v12 = vrot.slane %v6102_v45, 5  ;;  %v6141_v59 = vshrl.u32 %v6060_v57, 16 }
 0x446   :  { %v6115_v10 = vrot.slane %v6113_v6, 4  ;;  %v6164_v6 = vshll.u32 %v10027_v14, 16 }
 0x447   :  { %v5670_v49 = vsel %vm8830_vm0, %v7257_v4, %v5669_v41  ;;  %v6064_v4 = vld [vmem:[#allocation3 + $0x40] sm:$0xf]  ;;  %v6092_v41 = vrot.slane %v6091_v22, 4  ;;  %v6105_v54 = vor.u32 %v6104_v12, %v6101_v20  ;;  %v6143_v46 = vrot.slane %v6141_v59, 4  ;;  %v8252_v22 = vld [vmem:[#allocation3 + $0x90] ss:$8 sps:$4 sm:$0xff]  }
 0x448   :  { %v7268_v13 = vcombine.low %v5666_v21, %v5670_v49  ;;  %v6136_v49 = vshll.u32 %v10016_v25, 16  ;;  %v8251_v21 = vld [vmem:[#allocation3 + $0x80] ss:$8 sps:$4 sm:$0xff]   ;;  %v6169_v0 = vshrl.u32 %v6064_v4, 16  ;;  %v6172_v17 = vshll.u32 %v6064_v4, 16 }
 0x449   :  { %v6106_v16 = vrot.slane %v6105_v54, 4  ;;  %v6178_v12 = vshll.u32 %v10030_v52, 16  ;;  %v6166_v4 = vrot.slane %v6164_v6, 5  ;;  %v6072_v54 = vld [vmem:[#allocation3 + $0x70] sm:$0xf] }
 0x44a   :  { %v6138_v50 = vrot.slane %v6136_v49, 5  ;;  %v6171_v18 = vrot.slane %v6169_v0, 4  ;;  %v6174_v45 = vrot.slane %v6172_v17, 5 }
 0x44b   :  { %7845 = vmatmul.mubr.msk.bf16.gmra.mrb[12].mxu0 %vm576_vm8, %v7265_v58  ;;  %v6144_v58 = vshll.u32 %v6060_v57, 16  ;;  %v6111_v35 = vsel %vm8577_vm12, %v6106_v16, %v6110_v56 }
 0x44c   :  { %7848 = vmatprep.mubr.msk.bf16.mxu0 %vm576_vm8, %v7266_v23  ;;  %v6158_v23 = vshll.u32 %v6062_v36, 16  ;;  %v6214_v36 = vshll.u32 %v6070_v62, 16  ;;  %v6175_v34 = vor.u32 %v6174_v45, %v6171_v18  ;;  %v6080_v45 = vld [vmem:[#allocation3 + $0x90] sm:$0xf] }
 0x44d   :  { %v6146_v5 = vrot.slane %v6144_v58, 5 }
 0x44e   :  { %v6216_v49 = vrot.slane %v6214_v36, 5  ;;  %v6176_v0 = vrot.slane %v6175_v34, 4  ;;  %v10062_v36 = vld [vmem:[#allocation3 + $0x74] sm:$0x1]  ;;  %v10068_v34 = vld [vmem:[#allocation3 + $0x84] sm:$0x1] }
 0x453   :  { %7849 = vmatmul.mubr.msk.bf16.gmra.mrb[16].mxu0 %vm576_vm8, %v7267_v47  ;;  %v6068_v47 = vld [vmem:[#allocation3 + $0x60] sm:$0xf] }
 0x454   :  { %7852 = vmatprep.mubr.msk.bf16.mxu0 %vm576_vm8, %v7268_v13  ;;  %v6160_v13 = vrot.slane %v6158_v23, 5  ;;  %v6200_v7 = vshll.u32 %v6068_v47, 16  ;;  %v10042_v23 = vld [vmem:[#allocation3 + $0x6c] sm:$0x1] }
 0x455   :  { %v6220_v56 = vshll.u32 %v10042_v23, 16 }
 0x456   :  { %v6161_v29 = vor.u32 %v6160_v13, %v6157_v1  ;;  %v6202_v27 = vrot.slane %v6200_v7, 5 }
 0x457   :  { %v6222_v6 = vrot.slane %v6220_v56, 5 }
 0x458   :  { %v6162_v58 = vrot.slane %v6161_v29, 4 }
 0x45a   :  { %v6167_v13 = vsel %vm8577_vm12, %v6162_v58, %v6166_v4  ;;  %v6234_v4 = vshll.u32 %v10062_v36, 16 }
 0x45b   :  { %7853 = vmatmul.mubr.msk.bf16.gmra.mrb[20].mxu0 %vm576_vm8, %v7269_v3  ;;  %v6186_v3 = vshll.u32 %v6066_v15, 16 }
 0x45c   :  { %7858 = vmatprep.mubr.msk.bf16.mxu0 %vm576_vm8, %v8244_v51  ;;  %v6097_v51 = vsel %vm8577_vm12, %v6092_v41, %v6096_v30  ;;  %v10045_v41 = vld [vmem:[#allocation3 + $0x4c] sm:$0x1] }
 0x463   :  { %7859 = vmatmul.mubr.msk.bf16.vlgmr.msra.gmra.mrb[8].mxu0 %vm576_vm8, %v8246_v44  ;;  %v6124_v44 = vrot.slane %v6122_v43, 5  ;;  %v6192_v43 = vshll.u32 %v10045_v41, 16 }
 0x464   :  { %7875 = vmatpush3.bf16.msra.mxu0 %v8245_v63  ;;  %7862 = vmatprep.mubr.msk.bf16.mxu0 %vm576_vm8, %v8247_v8  ;;  %v6116_v63 = vshll.u32 %v6056_v42, 16  ;;  %v6197_v8 = vshrl.u32 %v6068_v47, 16  ;;  %v6147_v42 = vor.u32 %v6146_v5, %v6143_v46  ;;  %v6076_v46 = vld [vmem:[#allocation3 + $0x80] sm:$0xf]  ;;  %v6180_v47 = vrot.slane %v6178_v12, 5 }
 0x465   :  { %7892 = vmatprep.subr.bf16.mxu0 %v10002_v40  ;;  %v10066_v12 = vld [vmem:[#allocation3 + $0x7c] sm:$0x1] }
 0x466   :  { %v6118_v61 = vrot.slane %v6116_v63, 5  ;;  %v6185_v63 = vrot.slane %v6183_v31, 4  ;;  %v6199_v57 = vrot.slane %v6197_v8, 4  ;;  %v6148_v20 = vrot.slane %v6147_v42, 4 }
 0x467   :  { %v6194_v8 = vrot.slane %v6192_v43, 5 }
 0x468   :  { %v6119_v38 = vor.u32 %v6118_v61, %v6115_v10  ;;  %v10038_v10 = vld [vmem:[#allocation3 + $0x64] sm:$0x1]  ;;  %v7300_v61 = vcombine.low %v6097_v51, %v6111_v35  ;;  %v6203_v15 = vor.u32 %v6202_v27, %v6199_v57  ;;  %v6153_v5 = vsel %vm8577_vm12, %v6148_v20, %v6152_v2  ;;  %v6082_v57 = vld [vmem:[#allocation3 + $0x98] sm:$0xf] }
 0x469   :  { %v6206_v17 = vshll.u32 %v10038_v10, 16  ;;  %v6253_v51 = vshrl.u32 %v6076_v46, 16  ;;  %v7302_v29 = vcombine.low %v6153_v5, %v6167_v13  ;;  %v6298_v2 = vshll.u32 %v6082_v57, 16 }
 0x46a   :  { %v6120_v53 = vrot.slane %v6119_v38, 4  ;;  %v6213_v38 = vrot.slane %v6211_v26, 4  ;;  %v6204_v7 = vrot.slane %v6203_v15, 4 }
 0x46b   :  { %7863 = vmatmul.mubr.msk.bf16.gmra.mrb[12].mxu0 %vm576_vm8, %v8248_v28  ;;  %v6139_v28 = vsel %vm8577_vm12, %v6134_v9, %v6138_v50  ;;  %v6078_v9 = vld [vmem:[#allocation3 + $0x88] sm:$0xf]  ;;  %v6208_v18 = vrot.slane %v6206_v17, 5  ;;  %v6300_v17 = vrot.slane %v6298_v2, 5 }
 0x46c   :  { %7866 = vmatprep.mubr.msk.bf16.mxu0 %vm576_vm8, %v8249_v19  ;;  %v6188_v19 = vrot.slane %v6186_v3, 5  ;;  %v6125_v59 = vsel %vm8577_vm12, %v6120_v53, %v6124_v44  ;;  %v6225_v3 = vshrl.u32 %v6072_v54, 16  ;;  %v6256_v44 = vshll.u32 %v6076_v46, 16  ;;  %v6481_v2 = vld [vmem:[#allocation3 + $0x28] sm:$0xe] }
 0x46d   :  { %v7301_v33 = vcombine.low %v6125_v59, %v6139_v28  ;;  %v6217_v16 = vor.u32 %v6216_v49, %v6213_v38  ;;  %v6228_v53 = vshll.u32 %v6072_v54, 16  ;;  %v6267_v62 = vshrl.u32 %v6078_v9, 16  ;;  %v10074_v49 = vld [vmem:[#allocation3 + $0x8c] sm:$0x1] }
 0x46e   :  { %v6189_v30 = vor.u32 %v6188_v19, %v6185_v63  ;;  %v6270_v37 = vshll.u32 %v6078_v9, 16  ;;  %v6181_v28 = vsel %vm8577_vm12, %v6176_v0, %v6180_v47  ;;  %v6255_v63 = vrot.slane %v6253_v51, 4  ;;  %v10080_v51 = vld [vmem:[#allocation3 + $0x94] sm:$0x1] }
 0x46f   :  { %v6258_v19 = vrot.slane %v6256_v44, 5  ;;  %v6209_v27 = vsel %vm8577_vm12, %v6204_v7, %v6208_v18  ;;  %v6218_v26 = vrot.slane %v6217_v16, 4  ;;  %v6230_v35 = vrot.slane %v6228_v53, 5  ;;  %v10082_v16 = vld [vmem:[#allocation3 + $0x9c] sm:$0x1] }
 0x470   :  { %v6190_v31 = vrot.slane %v6189_v30, 4  ;;  %v6269_v59 = vrot.slane %v6267_v62, 4  ;;  %v6272_v58 = vrot.slane %v6270_v37, 5  ;;  %v6248_v38 = vshll.u32 %v10066_v12, 16 }
 0x471   :  { %v6259_v30 = vor.u32 %v6258_v19, %v6255_v63  ;;  %v6223_v43 = vsel %vm8577_vm12, %v6218_v26, %v6222_v6  ;;  %v6262_v47 = vshll.u32 %v10068_v34, 16  ;;  %v6276_v9 = vshll.u32 %v10074_v49, 16 }
 0x472   :  { %v6195_v20 = vsel %vm8577_vm12, %v6190_v31, %v6194_v8  ;;  %v7304_v46 = vcombine.low %v6209_v27, %v6223_v43  ;;  %v6236_v44 = vrot.slane %v6234_v4, 5  ;;  %v6304_v62 = vshll.u32 %v10082_v16, 16  ;;  %v6482_v4 = vld [vmem:[#allocation3 + $0x30] sm:$0xe] }
 0x473   :  { %7867 = vmatmul.mubr.msk.bf16.gmra.mrb[16].mxu0 %vm576_vm8, %v8250_v32  ;;  %v6074_v32 = vld [vmem:[#allocation3 + $0x78] sm:$0xf]  ;;  %v7303_v54 = vcombine.low %v6181_v28, %v6195_v20  ;;  %v6260_v56 = vrot.slane %v6259_v30, 4  ;;  %v6264_v8 = vrot.slane %v6262_v47, 5  ;;  %v6478_v28 = vld [vmem:[#allocation3 + $0x10] sm:$0xe] }
 0x474   :  { %7870 = vmatprep.mubr.msk.bf16.mxu0 %vm576_vm8, %v8251_v21  ;;  %v6239_v21 = vshrl.u32 %v6074_v32, 16  ;;  %v6242_v1 = vshll.u32 %v6074_v32, 16  ;;  %v6284_v32 = vshll.u32 %v6080_v45, 16  ;;  %v6306_v26 = vrot.slane %v6304_v62, 5 }
 0x475   :  { %v6265_v37 = vsel %vm8577_vm12, %v6260_v56, %v6264_v8  ;;  %v6528_v20 = vrot.slane %v10007_v11, 5  ;;  %v6536_v47 = vrot.slane %v10014_v48, 5  ;;  %v6556_v8 = vrot.slane %v10045_v41, 5 }
 0x476   :  { %v6241_v50 = vrot.slane %v6239_v21, 4  ;;  %v6244_v42 = vrot.slane %v6242_v1, 5  ;;  %v6273_v21 = vor.u32 %v6272_v58, %v6269_v59  ;;  %v6286_v13 = vrot.slane %v6284_v32, 5 }
 0x477   :  { %v6532_v58 = vrot.slane %v10011_v55, 5  ;;  %v6540_v55 = vrot.slane %v10016_v25, 5  ;;  %v6564_v62 = vrot.slane %v10042_v23, 5  ;;  %v6572_v23 = vrot.slane %v10066_v12, 5 }
 0x478   :  { %v6274_v7 = vrot.slane %v6273_v21, 4 }
 0x47b   :  { %7871 = vmatmul.mubr.msk.bf16.gmra.mrb[20].mxu0 %vm576_vm8, %v8252_v22  ;;  %v6227_v22 = vrot.slane %v6225_v3, 4  ;;  %v6250_v3 = vrot.slane %v6248_v38, 5  ;;  %v6483_v38 = vld [vmem:[#allocation3 + $0x38] sm:$0xe] }
 0x47c   :  { %7876 = vmatprep.mubr.msk.bf16.mxu0 %vm576_vm8, %v7300_v61  ;;  %v6245_v61 = vor.u32 %v6244_v42, %v6241_v50  ;;  %v7322_v21 = vrot.slane %v6483_v38, 9 }
 0x47d   :  { %v6231_v15 = vor.u32 %v6230_v35, %v6227_v22  ;;  %v6479_v22 = vld [vmem:[#allocation3 + $0x18] sm:$0xe]  ;;  %v7317_v35 = vrot.slane %v6478_v28, 9  ;;  %v6488_v28 = vld [vmem:[#allocation3 + $0x70] sm:$0xe] }
 0x47e   :  { %v6246_v5 = vrot.slane %v6245_v61, 4  ;;  %v7318_v59 = vrot.slane %v6479_v22, 9  ;;  %v6568_v22 = vrot.slane %v10062_v36, 5 }
 0x47f   :  { %v6232_v31 = vrot.slane %v6231_v15, 4  ;;  %v7320_v15 = vrot.slane %v6481_v2, 9  ;;  %v6584_v2 = vrot.slane %v10080_v51, 5 }
 0x480   :  { %v6251_v53 = vsel %vm8577_vm12, %v6246_v5, %v6250_v3  ;;  %v6533_v11 = vsel %vm8830_vm0, %v7318_v59, %v6532_v58  ;;  %v6492_v59 = vld [vmem:[#allocation3 + $0x90] sm:$0xe]  ;;  %v6493_v58 = vld [vmem:[#allocation3 + $0x98] sm:$0xe] }
 0x481   :  { %v6237_v18 = vsel %vm8577_vm12, %v6232_v31, %v6236_v44 }
 0x482   :  { %v7305_v6 = vcombine.low %v6237_v18, %v6251_v53  ;;  %v7325_v53 = vrot.slane %v6486_v60, 9  ;;  %v6490_v18 = vld [vmem:[#allocation3 + $0x80] sm:$0xe] }
 0x483   :  { %7877 = vmatmul.mubr.msk.bf16.vlgmr.msra.gmra.mrb[8].mxu0 %vm576_vm8, %v7301_v33  ;;  %v6295_v33 = vshrl.u32 %v6082_v57, 16 }
 0x484   :  { %7893 = vmatpush3.bf16.msra.mxu0 %v10002_v40  ;;  %7880 = vmatprep.mubr.msk.bf16.mxu0 %vm576_vm8, %v7302_v29  ;;  %v6281_v40 = vshrl.u32 %v6080_v45, 16  ;;  %v6278_v29 = vrot.slane %v6276_v9, 5  ;;  %v6290_v45 = vshll.u32 %v10080_v51, 16  ;;  %v10160_v51 = vld [vmem:[%s10271_s8] ss:$0 sm:$0xff] }
 0x485   :  { %v6297_v0 = vrot.slane %v6295_v33, 4  ;;  %v6529_v33 = vsel %vm8830_vm0, %v7317_v35, %v6528_v20  ;;  %v6580_v20 = vrot.slane %v10074_v49, 5  ;;  %v7332_v49 = vrot.slane %v6493_v58, 9 }
 0x486   :  { %v6283_v1 = vrot.slane %v6281_v40, 4  ;;  %v6279_v63 = vsel %vm8577_vm12, %v6274_v7, %v6278_v29  ;;  %v6292_v61 = vrot.slane %v6290_v45, 5  ;;  %v7335_v43 = vcombine.low %v6529_v33, %v6533_v11  ;;  %v6487_v7 = vld [vmem:[#allocation3 + $0x68] sm:$0xe]  ;;  %v6489_v29 = vld [vmem:[#allocation3 + $0x78] sm:$0xe] }
 0x487   :  { %v6301_v42 = vor.u32 %v6300_v17, %v6297_v0  ;;  %v7306_v19 = vcombine.low %v6265_v37, %v6279_v63  ;;  %v6484_v0 = vld [vmem:[#allocation3 + $0x40] sm:$0xe]  ;;  %v6485_v17 = vld [vmem:[#allocation3 + $0x48] sm:$0xe]  ;;  %v7328_v63 = vrot.slane %v6489_v29, 9  ;;  %v7331_v33 = vrot.slane %v6492_v59, 9 }
 0x488   :  { %v6287_v50 = vor.u32 %v6286_v13, %v6283_v1  ;;  %v6548_v1 = vrot.slane %v10027_v14, 5  ;;  %v6541_v13 = vsel %vm8830_vm0, %v7320_v15, %v6540_v55  ;;  %v7323_v48 = vrot.slane %v6484_v0, 9 }
 0x489   :  { %v6302_v27 = vrot.slane %v6301_v42, 4  ;;  %v6552_v14 = vrot.slane %v10030_v52, 5  ;;  %v7324_v44 = vrot.slane %v6485_v17, 9  ;;  %v7326_v42 = vrot.slane %v6487_v7, 9 }
 0x48a   :  { %v6288_v57 = vrot.slane %v6287_v50, 4  ;;  %v6549_v31 = vsel %vm8830_vm0, %v7322_v21, %v6548_v1  ;;  %v6560_v50 = vrot.slane %v10038_v10, 5 }
 0x48b   :  { %7881 = vmatmul.mubr.msk.bf16.gmra.mrb[12].mxu0 %vm576_vm8, %v7303_v54  ;;  %v6307_v32 = vsel %vm8577_vm12, %v6302_v27, %v6306_v26  ;;  %v6480_v54 = vld [vmem:[#allocation3 + $0x20] sm:$0xe]  ;;  %v6553_v37 = vsel %vm8830_vm0, %v7323_v48, %v6552_v14  ;;  %v6557_v52 = vsel %vm8830_vm0, %v7324_v44, %v6556_v8  ;;  %v6565_v10 = vsel %vm8830_vm0, %v7326_v42, %v6564_v62 }
 0x48c   :  { %7884 = vmatprep.mubr.msk.bf16.mxu0 %vm576_vm8, %v7304_v46  ;;  %v6293_v40 = vsel %vm8577_vm12, %v6288_v57, %v6292_v61  ;;  %v7321_v46 = vrot.slane %v6482_v4, 9  ;;  %v7319_v5 = vrot.slane %v6480_v54, 9  ;;  %v6561_v41 = vsel %vm8830_vm0, %v7325_v53, %v6560_v50 }
 0x48d   :  { %v7307_v30 = vcombine.low %v6293_v40, %v6307_v32  ;;  %v7338_v45 = vcombine.low %v6553_v37, %v6557_v52  ;;  %v7329_v57 = vrot.slane %v6490_v18, 9  ;;  %v6576_v27 = vrot.slane %v10068_v34, 5 }
 0x48e   :  { %v6545_v25 = vsel %vm8830_vm0, %v7321_v46, %v6544_v39  ;;  %v6537_v56 = vsel %vm8830_vm0, %v7319_v5, %v6536_v47  ;;  %v7327_v26 = vrot.slane %v6488_v28, 9  ;;  %v6573_v61 = vsel %vm8830_vm0, %v7328_v63, %v6572_v23 }
 0x48f   :  { %v7336_v9 = vcombine.low %v6537_v56, %v6541_v13  ;;  %v7337_v3 = vcombine.low %v6545_v25, %v6549_v31  ;;  %v6577_v12 = vsel %vm8830_vm0, %v7329_v57, %v6576_v27  ;;  %v6588_v4 = vrot.slane %v10082_v16, 5  ;;  %v10165_v16 = vld [vmem:[%s10272_s9] ss:$0 sm:$0xff] }
 0x490   :  { %v6569_v40 = vsel %vm8830_vm0, %v7327_v26, %v6568_v22 }
 0x491   :  { %v7340_v34 = vcombine.low %v6569_v40, %v6573_v61  ;;  %v6589_v11 = vsel %vm8830_vm0, %v7332_v49, %v6588_v4 }
 0x493   :  { %7885 = vmatmul.mubr.msk.bf16.gmra.mrb[16].mxu0 %vm576_vm8, %v7305_v6  ;;  %v7339_v6 = vcombine.low %v6561_v41, %v6565_v10 }
 0x494   :  { %7888 = vmatprep.mubr.msk.bf16.mxu0 %vm576_vm8, %v7306_v19  ;;  %v6491_v19 = vld [vmem:[#allocation3 + $0x88] sm:$0xe] }
 0x495   :  { %v7330_v35 = vrot.slane %v6491_v19, 9 }
 0x497   :  { %v6581_v32 = vsel %vm8830_vm0, %v7330_v35, %v6580_v20 }
 0x498   :  { %v7341_v36 = vcombine.low %v6577_v12, %v6581_v32 }
 0x49b   :  { %7889 = vmatmul.mubr.msk.bf16.gmra.mrb[20].mxu0 %vm576_vm8, %v7307_v30  ;;  %v6585_v30 = vsel %vm8830_vm0, %v7331_v33, %v6584_v2 }
 0x49c   :  { %7894 = vmatprep.mubr.msk.bf16.mxu0 %vm576_vm8, %v7335_v43  ;;  %v7342_v54 = vcombine.low %v6585_v30, %v6589_v11 }
 0x4a3   :  { %7895 = vmatmul.mubr.msk.bf16.vlgmr.msra.gmra.mrb[8].mxu0 %vm576_vm8, %v7336_v9 }
 0x4a4   :  { %7898 = vmatprep.mubr.msk.bf16.mxu0 %vm576_vm8, %v7337_v3 }
 0x4ab   :  { %7899 = vmatmul.mubr.msk.bf16.gmra.mrb[12].mxu0 %vm576_vm8, %v7338_v45 }
 0x4ac   :  { %7902 = vmatprep.mubr.msk.bf16.mxu0 %vm576_vm8, %v7339_v6 }
 0x4b3   :  { %7903 = vmatmul.mubr.msk.bf16.gmra.mrb[16].mxu0 %vm576_vm8, %v7340_v34 }
 0x4b4   :  { %7906 = vmatprep.mubr.msk.bf16.mxu0 %vm576_vm8, %v7341_v36 }
 0x4bb   :  { %7907 = vmatmul.mubr.msk.bf16.gmra.mrb[20].mxu0 %vm576_vm8, %v7342_v54 }
 0x576   :  { %v7896_v43 = vpop.f32.mrb[8].mxu0 }
 0x577   :  { %v6769_v15 = vmul.f32 %v7896_v43, %v10160_v51  ;;  %v6681_v55 = vpop.f32.mrb[9].mxu0 }
 0x578   :  { %v6767_v24 = vmul.f32 %v10160_v51, %v6681_v55  ;;  %v7897_v38 = vpop.f32.mrb[10].mxu0 }
 0x579   :  { %v6792_v46 = vadd.f32 %v10165_v16, %v6769_v15  ;;  %v6770_v39 = vmul.f32 %v7897_v38, %v10160_v51  ;;  %v6684_v5 = vpop.f32.mrb[11].mxu0 }
 0x57a   :  { %v6790_v47 = vadd.f32 %v10165_v16, %v6767_v24  ;;  %v6768_v21 = vmul.f32 %v10160_v51, %v6684_v5 }
 0x57b   :  { %v6808_v1 = vmax.f32 %v6792_v46, 0.0  ;;  %v6793_v13 = vadd.f32 %v10165_v16, %v6770_v39 }
 0x57c   :  { %v6806_v0 = vmax.f32 %v6790_v47, 0.0  ;;  %v6791_v25 = vadd.f32 %v10165_v16, %v6768_v21 }
 0x57d   :  { %6824 = vst.msk [vmem:[%s10273_s10 + $0x10] sm:$0xff] %vm1236_vm13, %v6808_v1  ;;  %v6809_v17 = vmax.f32 %v6793_v13, 0.0 }
 0x57e   :  { %6822 = vst.msk [vmem:[%s10273_s10] sm:$0xff] %vm1236_vm13, %v6806_v0  ;;  %v6807_v56 = vmax.f32 %v6791_v25, 0.0  ;;  %v7900_v60 = vpop.f32.mrb[12].mxu0 }
 0x57f   :  { %6825 = vst.msk [vmem:[%s10273_s10 + $0x18] sm:$0xff] %vm1236_vm13, %v6809_v17  ;;  %v6773_v9 = vmul.f32 %v7900_v60, %v10160_v51  ;;  %v6697_v31 = vpop.f32.mrb[13].mxu0 }
 0x580   :  { %6823 = vst.msk [vmem:[%s10273_s10 + $0x8] sm:$0xff] %vm1236_vm13, %v6807_v56  ;;  %v6771_v48 = vmul.f32 %v10160_v51, %v6697_v31  ;;  %v7901_v3 = vpop.f32.mrb[14].mxu0 }
 0x581   :  { %v6796_v14 = vadd.f32 %v10165_v16, %v6773_v9  ;;  %v6774_v44 = vmul.f32 %v7901_v3, %v10160_v51  ;;  %v6700_v8 = vpop.f32.mrb[15].mxu0 }
 0x582   :  { %v6794_v7 = vadd.f32 %v10165_v16, %v6771_v48  ;;  %v6772_v53 = vmul.f32 %v10160_v51, %v6700_v8 }
 0x583   :  { %v6812_v50 = vmax.f32 %v6796_v14, 0.0  ;;  %v6797_v42 = vadd.f32 %v10165_v16, %v6774_v44 }
 0x584   :  { %v6810_v62 = vmax.f32 %v6794_v7, 0.0  ;;  %v6795_v37 = vadd.f32 %v10165_v16, %v6772_v53 }
 0x585   :  { %6828 = vst.msk [vmem:[%s10273_s10 + $0x30] sm:$0xff] %vm1236_vm13, %v6812_v50  ;;  %v6813_v52 = vmax.f32 %v6797_v42, 0.0 }
 0x586   :  { %6826 = vst.msk [vmem:[%s10273_s10 + $0x20] sm:$0xff] %vm1236_vm13, %v6810_v62  ;;  %v6811_v41 = vmax.f32 %v6795_v37, 0.0  ;;  %v7904_v29 = vpop.f32.mrb[16].mxu0 }
 0x587   :  { %6829 = vst.msk [vmem:[%s10273_s10 + $0x38] sm:$0xff] %vm1236_vm13, %v6813_v52  ;;  %v6777_v18 = vmul.f32 %v7904_v29, %v10160_v51  ;;  %v6713_v45 = vpop.f32.mrb[17].mxu0 }
 0x588   :  { %6827 = vst.msk [vmem:[%s10273_s10 + $0x28] sm:$0xff] %vm1236_vm13, %v6811_v41  ;;  %v6775_v10 = vmul.f32 %v10160_v51, %v6713_v45  ;;  %v7905_v28 = vpop.f32.mrb[18].mxu0 }
 0x589   :  { %v6800_v6 = vadd.f32 %v10165_v16, %v6777_v18  ;;  %v6778_v63 = vmul.f32 %v7905_v28, %v10160_v51  ;;  %v6716_v23 = vpop.f32.mrb[19].mxu0 }
 0x58a   :  { %v6798_v19 = vadd.f32 %v10165_v16, %v6775_v10  ;;  %v6776_v57 = vmul.f32 %v10160_v51, %v6716_v23 }
 0x58b   :  { %v6816_v27 = vmax.f32 %v6800_v6, 0.0  ;;  %v6801_v26 = vadd.f32 %v10165_v16, %v6778_v63 }
 0x58c   :  { %v6814_v22 = vmax.f32 %v6798_v19, 0.0  ;;  %v6799_v35 = vadd.f32 %v10165_v16, %v6776_v57 }
 0x58d   :  { %6832 = vst.msk [vmem:[%s10273_s10 + $0x50] sm:$0xff] %vm1236_vm13, %v6816_v27  ;;  %v6817_v20 = vmax.f32 %v6801_v26, 0.0 }
 0x58e   :  { %6830 = vst.msk [vmem:[%s10273_s10 + $0x40] sm:$0xff] %vm1236_vm13, %v6814_v22  ;;  %v6815_v61 = vmax.f32 %v6799_v35, 0.0  ;;  %v7908_v59 = vpop.f32.mrb[20].mxu0 }
 0x58f   :  { %6833 = vst.msk [vmem:[%s10273_s10 + $0x58] sm:$0xff] %vm1236_vm13, %v6817_v20  ;;  %v6781_v12 = vmul.f32 %v7908_v59, %v10160_v51  ;;  %v6729_v58 = vpop.f32.mrb[21].mxu0 }
 0x590   :  { %6831 = vst.msk [vmem:[%s10273_s10 + $0x48] sm:$0xff] %vm1236_vm13, %v6815_v61  ;;  %v6779_v40 = vmul.f32 %v10160_v51, %v6729_v58  ;;  %v7909_v34 = vpop.f32.mrb[22].mxu0 }
 0x591   :  { %v6804_v32 = vadd.f32 %v10165_v16, %v6781_v12  ;;  %v6782_v33 = vmul.f32 %v7909_v34, %v10160_v51  ;;  %v6732_v36 = vpop.f32.mrb[23].mxu0 }
 0x592   :  { %v6802_v2 = vadd.f32 %v10165_v16, %v6779_v40  ;;  %v6780_v49 = vmul.f32 %v10160_v51, %v6732_v36 }
 0x593   :  { %v6820_v4 = vmax.f32 %v6804_v32, 0.0  ;;  %v6805_v30 = vadd.f32 %v10165_v16, %v6782_v33 }
 0x594   :  { %v6818_v11 = vmax.f32 %v6802_v2, 0.0  ;;  %v6803_v54 = vadd.f32 %v10165_v16, %v6780_v49 }
 0x595   :  { %6836 = vst.msk [vmem:[%s10273_s10 + $0x70] sm:$0xff] %vm1236_vm13, %v6820_v4  ;;  %v6821_v43 = vmax.f32 %v6805_v30, 0.0 }
 0x596   :  { %6834 = vst.msk [vmem:[%s10273_s10 + $0x60] sm:$0xff] %vm1236_vm13, %v6818_v11  ;;  %v6819_v15 = vmax.f32 %v6803_v54, 0.0 }
 0x597   :  { %6837 = vst.msk [vmem:[%s10273_s10 + $0x78] sm:$0xff] %vm1236_vm13, %v6821_v43 }
 0x598   :  { %6835 = vst.msk [vmem:[%s10273_s10 + $0x68] sm:$0xff] %vm1236_vm13, %v6819_v15 }

</bundles_post_ra>
